<compile_context>
chip_gen: v6e
topology: v6e:2x2x1
jax: 0.10.0
libtpu: 0.0.40
codegen_flags: <defaults>
</compile_context>

<pallas_src>
import functools

import jax
import jax.numpy as jnp
import numpy as np
from jax.experimental import pallas as pl
from jax.experimental.pallas import tpu as pltpu


# ----------------------------------------------------------------------------
# Fully fused SetTransformer kernel (runs once per batch element)
# ----------------------------------------------------------------------------
def set_transformer_kernel(x_ref, ind_ref, w0f_ref, w0r_ref, b0_ref,
                           wq_ref, bq_ref, wkv_ref, bkv_ref, wo_ref, bo_ref,
                           wft_ref, bfc_ref, out_ref,
                           *, num_isab, num_heads, head_dim, compute_dtype):
    f32 = jnp.float32
    cdt = compute_dtype                       # MXU input dtype (bf16)
    D = num_heads * head_dim

    def split_heads(t):                       # (Nt, D) -> (h, Nt, hd)
        n = t.shape[0]
        return t.reshape(n, num_heads, head_dim).transpose(1, 0, 2)

    def mha(q_in, kv_in, idx):
        # Lane-dense projections: one (Nq,D)@(D,D) and one (Nk,D)@(D,2D)
        # matmul per MAB.  The 1/sqrt(hd) scale is folded into wq/bq.
        q = jnp.dot(q_in.astype(cdt), wq_ref[idx],
                    preferred_element_type=f32) + bq_ref[idx]          # (Nq, D)
        kv = jnp.dot(kv_in.astype(cdt), wkv_ref[idx],
                     preferred_element_type=f32) + bkv_ref[idx]        # (Nk, 2D)
        qh = split_heads(q)                                            # (h, Nq, hd)
        kh = split_heads(kv[:, :D])                                    # (h, Nk, hd)
        vh = split_heads(kv[:, D:])                                    # (h, Nk, hd)

        # Scores / softmax (f32).  Leading-batch einsums, last-axis contraction.
        s = jnp.einsum('hqe,hke->hqk', qh.astype(cdt), kh.astype(cdt),
                       preferred_element_type=f32)                     # (h, Nq, Nk)
        s = s - jnp.max(s, axis=-1, keepdims=True)
        p = jnp.exp(s)
        # EUP approximate reciprocal instead of a VPU divide.
        p = p * pl.reciprocal(jnp.sum(p, axis=-1, keepdims=True), approx=True)

        o = jnp.einsum('hqk,hke->hqe', p.astype(cdt), vh.astype(cdt),
                       preferred_element_type=f32)                     # (h, Nq, hd)
        # Re-interleave heads back onto the lane axis (cheap relayout), then a
        # single (Nq,D)@(D,D) output projection.
        o = o.transpose(1, 0, 2).reshape(q_in.shape[0], D)             # (Nq, D)
        return jnp.dot(o.astype(cdt), wo_ref[idx],
                       preferred_element_type=f32) + bo_ref[idx]       # (Nq, D)

    # ISAB stack.  X arrives feature-major (Din, N); this tiny transpose
    # replaces the host-side permute of the whole (B, dim_in, N) tensor.
    h = x_ref[...].T                                                   # (N, Din)
    for i in range(num_isab):
        w0 = w0f_ref[...] if i == 0 else w0r_ref[i - 1]
        hid = jnp.dot(h.astype(cdt), w0,
                      preferred_element_type=f32) + b0_ref[i]          # (N, D)
        h1 = mha(ind_ref[i], hid, 2 * i)                               # (M, D)
        h = mha(hid, h1, 2 * i + 1)                                    # (N, D)

    # fc_out with a pre-transposed weight: the result lands directly in the
    # module's (dim_out, N) layout (no final transpose, no host permute).
    out_ref[...] = jnp.einsum('od,nd->on', wft_ref[...], h.astype(cdt),
                              preferred_element_type=f32) + bfc_ref[...]


# ----------------------------------------------------------------------------
# Wrapper
# ----------------------------------------------------------------------------
def _const_spec(a):
    """Full-array block fetched at block index 0 for every grid step (weights
    stay resident in VMEM; no per-batch re-DMA)."""
    nd = a.ndim
    return pl.BlockSpec(a.shape, lambda i, _nd=nd: (0,) * _nd)


def set_transformer_forward(packed, x, *, num_heads, num_isab):
    """Fused SetTransformer forward.  x: (B, dim_in, N) -> (B, dim_out, N)."""
    B, Din, N = x.shape
    D = packed["wq"].shape[-1]
    Dout = packed["wf_t"].shape[0]
    head_dim = D // num_heads

    weights = [packed["inducing"], packed["w0_first"], packed["w0_rest"],
               packed["b0"], packed["wq"], packed["bq"], packed["wkv"],
               packed["bkv"], packed["wo"], packed["bo"], packed["wf_t"],
               packed["bf_col"]]

    kern = functools.partial(set_transformer_kernel, num_isab=num_isab,
                             num_heads=num_heads, head_dim=head_dim,
                             compute_dtype=packed["wq"].dtype)
    return pl.pallas_call(
        kern,
        out_shape=jax.ShapeDtypeStruct((B, Dout, N), jnp.float32),
        grid=(B,),
        in_specs=[pl.BlockSpec((None, Din, N), lambda i: (i, 0, 0))]
                 + [_const_spec(a) for a in weights],
        out_specs=pl.BlockSpec((None, Dout, N), lambda i: (i, 0, 0)),
        compiler_params=pltpu.CompilerParams(dimension_semantics=("parallel",)),
    )(x, *weights)


# ----------------------------------------------------------------------------
# Host-side weight packing (done once, outside the kernel)
# ----------------------------------------------------------------------------
def pack_params(params, num_heads, compute_dtype=jnp.bfloat16):
    isabs = params["isabs"]
    D = isabs[0]["mab1"]["wq"].shape[0]
    head_dim = D // num_heads
    scale = 1.0 / float(np.sqrt(head_dim))
    cd = compute_dtype

    wq, bq, wkv, bkv, wo, bo = [], [], [], [], [], []
    for ip in isabs:
        for mab in (ip["mab1"], ip["mab2"]):
            wq.append(mab["wq"] * scale)                           # scale folded
            bq.append((mab["bq"] * scale).reshape(1, D))
            wkv.append(jnp.concatenate([mab["wk"], mab["wv"]], axis=1))   # (D, 2D)
            bkv.append(jnp.concatenate([mab["bk"], mab["bv"]]).reshape(1, 2 * D))
            wo.append(mab["wo"])
            bo.append(mab["bo"].reshape(1, D))

    if len(isabs) > 1:
        w0_rest = jnp.stack([ip["w0"] for ip in isabs[1:]])        # (nI-1, D, D)
    else:
        w0_rest = jnp.zeros((1, D, D), jnp.float32)                # never read

    return dict(
        inducing=jnp.stack([ip["inducing"][0] for ip in isabs]).astype(cd),  # (nI, M, D)
        w0_first=isabs[0]["w0"].astype(cd),                                  # (Din, D)
        w0_rest=w0_rest.astype(cd),
        b0=jnp.stack([ip["b0"].reshape(1, D) for ip in isabs]),              # (nI, 1, D) f32
        wq=jnp.stack(wq).astype(cd),   bq=jnp.stack(bq),                     # (2nI, D, D) / (2nI,1,D)
        wkv=jnp.stack(wkv).astype(cd), bkv=jnp.stack(bkv),                   # (2nI, D, 2D) / (2nI,1,2D)
        wo=jnp.stack(wo).astype(cd),   bo=jnp.stack(bo),                     # (2nI, D, D) / (2nI,1,D)
        wf_t=params["fc_out_w"].T.astype(cd),                                # (Dout, D)
        bf_col=params["fc_out_b"].reshape(-1, 1),                            # (Dout, 1) f32
    )


# ----------------------------------------------------------------------------
# Pure-JAX reference (correctness verification only; uses the unpacked params)
# ----------------------------------------------------------------------------
def _mha_ref(p, query, key, value, num_heads):
    B, Nq, D = query.shape
    Nk = key.shape[1]
    hd = D // num_heads
    q = (query @ p["wq"] + p["bq"]).reshape(B, Nq, num_heads, hd).transpose(0, 2, 1, 3)
    k = (key @ p["wk"] + p["bk"]).reshape(B, Nk, num_heads, hd).transpose(0, 2, 1, 3)
    v = (value @ p["wv"] + p["bv"]).reshape(B, Nk, num_heads, hd).transpose(0, 2, 1, 3)
    attn = jax.nn.softmax(q @ jnp.swapaxes(k, -2, -1) / hd ** 0.5, axis=-1)
    out = (attn @ v).transpose(0, 2, 1, 3).reshape(B, Nq, D)
    return out @ p["wo"] + p["bo"]


def _set_transformer_ref(params, X, num_heads):
    X = jnp.transpose(X, (0, 2, 1))
    for p in params["isabs"]:
        B = X.shape[0]
        H = X @ p["w0"] + p["b0"]
        I = jnp.broadcast_to(p["inducing"], (B,) + p["inducing"].shape[1:])
        H1 = _mha_ref(p["mab1"], I, H, H, num_heads)
        X = _mha_ref(p["mab2"], H, H1, H1, num_heads)
    X = X @ params["fc_out_w"] + params["fc_out_b"]
    return jnp.transpose(X, (0, 2, 1))


# ----------------------------------------------------------------------------
# Deterministic parameter construction
# ----------------------------------------------------------------------------
def _linear_params(key, din, dout, scale=0.1):
    kw, kb = jax.random.split(key)
    return (jax.random.normal(kw, (din, dout), jnp.float32) * scale,
            jax.random.normal(kb, (dout,), jnp.float32) * scale)


def _mha_params(key, dim):
    ks = jax.random.split(key, 4)
    wq, bq = _linear_params(ks[0], dim, dim)
    wk, bk = _linear_params(ks[1], dim, dim)
    wv, bv = _linear_params(ks[2], dim, dim)
    wo, bo = _linear_params(ks[3], dim, dim)
    return dict(wq=wq, bq=bq, wk=wk, bk=bk, wv=wv, bv=bv, wo=wo, bo=bo)


def make_params(key, dim_in, dim_hidden, num_inds, num_isab, dim_out):
    keys = jax.random.split(key, num_isab + 1)
    isabs = []
    for i in range(num_isab):
        k0, k1, k2, k3 = jax.random.split(keys[i], 4)
        din = dim_in if i == 0 else dim_hidden
        w0, b0 = _linear_params(k0, din, dim_hidden)
        isabs.append(dict(
            inducing=jax.random.normal(k3, (1, num_inds, dim_hidden), jnp.float32),
            w0=w0, b0=b0,
            mab1=_mha_params(k1, dim_hidden),
            mab2=_mha_params(k2, dim_hidden),
        ))
    fw, fb = _linear_params(keys[-1], dim_hidden, dim_out)
    return dict(isabs=isabs, fc_out_w=fw, fc_out_b=fb)


# ----------------------------------------------------------------------------
if __name__ == "__main__":
    B, dim_in, N = 2, 4, 16
    dim_hidden, num_heads, num_inds, num_isab = 32, 4, 8, 2
    dim_out = dim_in  # dim_out=None in the module => dim_in

    root = jax.random.PRNGKey(0)
    kx, kp = jax.random.split(root)
    x = jax.random.normal(kx, (B, dim_in, N), jnp.float32)
    params = make_params(kp, dim_in, dim_hidden, num_inds, num_isab, dim_out)
    packed = pack_params(params, num_heads)

    fwd = jax.jit(functools.partial(set_transformer_forward,
                                    num_heads=num_heads, num_isab=num_isab))
    out = jax.block_until_ready(fwd(packed, x))

    ref = _set_transformer_ref(params, x, num_heads)
    assert out.shape == (B, dim_out, N), out.shape
    # Tolerance accounts for bf16 MXU inputs (f32 accumulation) and the EUP
    # approximate reciprocal in the softmax denominator; all reductions,
    # softmax and bias adds are f32.
    np.testing.assert_allclose(np.asarray(out), np.asarray(ref),
                               rtol=2e-2, atol=2e-2)

    print("KERNEL_OK")
</pallas_src>

<mosaic_0001>
module attributes {stable_mosaic.version = 11 : i64} {
  func.func @set_transformer_kernel(%arg0: i32, %arg1: memref<1x4x16xf32, #tpu.memory_space<vmem>>, %arg2: memref<2x8x32xbf16, #tpu.memory_space<vmem>>, %arg3: memref<4x32xbf16, #tpu.memory_space<vmem>>, %arg4: memref<1x32x32xbf16, #tpu.memory_space<vmem>>, %arg5: memref<2x1x32xf32, #tpu.memory_space<vmem>>, %arg6: memref<4x32x32xbf16, #tpu.memory_space<vmem>>, %arg7: memref<4x1x32xf32, #tpu.memory_space<vmem>>, %arg8: memref<4x32x64xbf16, #tpu.memory_space<vmem>>, %arg9: memref<4x1x64xf32, #tpu.memory_space<vmem>>, %arg10: memref<4x32x32xbf16, #tpu.memory_space<vmem>>, %arg11: memref<4x1x32xf32, #tpu.memory_space<vmem>>, %arg12: memref<4x32xbf16, #tpu.memory_space<vmem>>, %arg13: memref<4x1xf32, #tpu.memory_space<vmem>>, %arg14: memref<1x4x16xf32, #tpu.memory_space<vmem>>) attributes {dimension_semantics = [#tpu.dimension_semantics<parallel>], iteration_bounds = array<i64: 2>, scalar_prefetch = 0 : i64, scratch_operands = 0 : i64, tpu.core_type = #tpu.core_type<tc>, window_params = [{transform_indices = @transform_0, window_bounds = array<i64: 1, 4, 16>}, {pipeline_mode = #tpu.pipeline_mode<synchronous>, transform_indices = @transform_1, window_bounds = array<i64: 2, 8, 32>}, {pipeline_mode = #tpu.pipeline_mode<synchronous>, transform_indices = @transform_2, window_bounds = array<i64: 4, 32>}, {pipeline_mode = #tpu.pipeline_mode<synchronous>, transform_indices = @transform_3, window_bounds = array<i64: 1, 32, 32>}, {pipeline_mode = #tpu.pipeline_mode<synchronous>, transform_indices = @transform_4, window_bounds = array<i64: 2, 1, 32>}, {pipeline_mode = #tpu.pipeline_mode<synchronous>, transform_indices = @transform_5, window_bounds = array<i64: 4, 32, 32>}, {pipeline_mode = #tpu.pipeline_mode<synchronous>, transform_indices = @transform_6, window_bounds = array<i64: 4, 1, 32>}, {pipeline_mode = #tpu.pipeline_mode<synchronous>, transform_indices = @transform_7, window_bounds = array<i64: 4, 32, 64>}, {pipeline_mode = #tpu.pipeline_mode<synchronous>, transform_indices = @transform_8, window_bounds = array<i64: 4, 1, 64>}, {pipeline_mode = #tpu.pipeline_mode<synchronous>, transform_indices = @transform_9, window_bounds = array<i64: 4, 32, 32>}, {pipeline_mode = #tpu.pipeline_mode<synchronous>, transform_indices = @transform_10, window_bounds = array<i64: 4, 1, 32>}, {pipeline_mode = #tpu.pipeline_mode<synchronous>, transform_indices = @transform_11, window_bounds = array<i64: 4, 32>}, {pipeline_mode = #tpu.pipeline_mode<synchronous>, transform_indices = @transform_12, window_bounds = array<i64: 4, 1>}, {transform_indices = @transform_13, window_bounds = array<i64: 1, 4, 16>}]} {
    %c0 = arith.constant 0 : index
    %c0_0 = arith.constant 0 : index
    %c0_1 = arith.constant 0 : index
    %0 = vector.load %arg1[%c0, %c0_0, %c0_1] : memref<1x4x16xf32, #tpu.memory_space<vmem>>, vector<1x4x16xf32>
    %1 = vector.shape_cast %0 : vector<1x4x16xf32> to vector<4x16xf32>
    %2 = tpu.transpose %1, [1, 0] : vector<4x16xf32> -> vector<16x4xf32>
    %c0_2 = arith.constant 0 : index
    %c0_3 = arith.constant 0 : index
    %3 = vector.load %arg3[%c0_2, %c0_3] : memref<4x32xbf16, #tpu.memory_space<vmem>>, vector<4x32xbf16>
    %4 = arith.truncf %2 : vector<16x4xf32> to vector<16x4xbf16>
    %cst = arith.constant dense<0.000000e+00> : vector<16x32xf32>
    %5 = tpu.matmul %4, %3, %cst {dimension_numbers = #tpu.dot_dimension_numbers<[1], [0], [0], [1], [0, 0, 1, 1], [], []>} : vector<16x4xbf16>, vector<4x32xbf16>, vector<16x32xf32> -> vector<16x32xf32>
    %c0_4 = arith.constant 0 : index
    %c0_5 = arith.constant 0 : index
    %c0_6 = arith.constant 0 : index
    %6 = vector.load %arg5[%c0_4, %c0_5, %c0_6] : memref<2x1x32xf32, #tpu.memory_space<vmem>>, vector<1x1x32xf32>
    %7 = vector.shape_cast %6 : vector<1x1x32xf32> to vector<1x32xf32>
    %8 = vector.broadcast %7 : vector<1x32xf32> to vector<16x32xf32>
    %9 = arith.addf %5, %8 : vector<16x32xf32>
    %c0_7 = arith.constant 0 : index
    %c0_8 = arith.constant 0 : index
    %c0_9 = arith.constant 0 : index
    %10 = vector.load %arg2[%c0_7, %c0_8, %c0_9] : memref<2x8x32xbf16, #tpu.memory_space<vmem>>, vector<1x8x32xbf16>
    %11 = vector.shape_cast %10 : vector<1x8x32xbf16> to vector<8x32xbf16>
    %c0_10 = arith.constant 0 : index
    %c0_11 = arith.constant 0 : index
    %c0_12 = arith.constant 0 : index
    %12 = vector.load %arg6[%c0_10, %c0_11, %c0_12] : memref<4x32x32xbf16, #tpu.memory_space<vmem>>, vector<1x32x32xbf16>
    %13 = vector.shape_cast %12 : vector<1x32x32xbf16> to vector<32x32xbf16>
    %cst_13 = arith.constant dense<0.000000e+00> : vector<8x32xf32>
    %14 = tpu.matmul %11, %13, %cst_13 {dimension_numbers = #tpu.dot_dimension_numbers<[1], [0], [0], [1], [0, 0, 1, 1], [], []>} : vector<8x32xbf16>, vector<32x32xbf16>, vector<8x32xf32> -> vector<8x32xf32>
    %c0_14 = arith.constant 0 : index
    %c0_15 = arith.constant 0 : index
    %c0_16 = arith.constant 0 : index
    %15 = vector.load %arg7[%c0_14, %c0_15, %c0_16] : memref<4x1x32xf32, #tpu.memory_space<vmem>>, vector<1x1x32xf32>
    %16 = vector.shape_cast %15 : vector<1x1x32xf32> to vector<1x32xf32>
    %17 = vector.broadcast %16 : vector<1x32xf32> to vector<8x32xf32>
    %18 = arith.addf %14, %17 : vector<8x32xf32>
    %19 = arith.truncf %9 : vector<16x32xf32> to vector<16x32xbf16>
    %c0_17 = arith.constant 0 : index
    %c0_18 = arith.constant 0 : index
    %c0_19 = arith.constant 0 : index
    %20 = vector.load %arg8[%c0_17, %c0_18, %c0_19] : memref<4x32x64xbf16, #tpu.memory_space<vmem>>, vector<1x32x64xbf16>
    %21 = vector.shape_cast %20 : vector<1x32x64xbf16> to vector<32x64xbf16>
    %cst_20 = arith.constant dense<0.000000e+00> : vector<16x64xf32>
    %22 = tpu.matmul %19, %21, %cst_20 {dimension_numbers = #tpu.dot_dimension_numbers<[1], [0], [0], [1], [0, 0, 1, 1], [], []>} : vector<16x32xbf16>, vector<32x64xbf16>, vector<16x64xf32> -> vector<16x64xf32>
    %c0_21 = arith.constant 0 : index
    %c0_22 = arith.constant 0 : index
    %c0_23 = arith.constant 0 : index
    %23 = vector.load %arg9[%c0_21, %c0_22, %c0_23] : memref<4x1x64xf32, #tpu.memory_space<vmem>>, vector<1x1x64xf32>
    %24 = vector.shape_cast %23 : vector<1x1x64xf32> to vector<1x64xf32>
    %25 = vector.broadcast %24 : vector<1x64xf32> to vector<16x64xf32>
    %26 = arith.addf %22, %25 : vector<16x64xf32>
    %27 = vector.shape_cast %18 : vector<8x32xf32> to vector<8x4x8xf32>
    %28 = tpu.transpose %27, [1, 0, 2] : vector<8x4x8xf32> -> vector<4x8x8xf32>
    %29 = vector.extract_strided_slice %26 {offsets = [0, 0], sizes = [16, 32], strides = [1, 1]} : vector<16x64xf32> to vector<16x32xf32>
    %30 = vector.shape_cast %29 : vector<16x32xf32> to vector<16x4x8xf32>
    %31 = tpu.transpose %30, [1, 0, 2] : vector<16x4x8xf32> -> vector<4x16x8xf32>
    %32 = vector.extract_strided_slice %26 {offsets = [0, 32], sizes = [16, 32], strides = [1, 1]} : vector<16x64xf32> to vector<16x32xf32>
    %33 = vector.shape_cast %32 : vector<16x32xf32> to vector<16x4x8xf32>
    %34 = tpu.transpose %33, [1, 0, 2] : vector<16x4x8xf32> -> vector<4x16x8xf32>
    %35 = arith.truncf %28 : vector<4x8x8xf32> to vector<4x8x8xbf16>
    %36 = arith.truncf %31 : vector<4x16x8xf32> to vector<4x16x8xbf16>
    "tpu.trace_start"() <{level = 10 : i32, message = "hqe,hke->hqk"}> : () -> ()
    %cst_24 = arith.constant dense<0.000000e+00> : vector<4x8x16xf32>
    %37 = tpu.matmul %35, %36, %cst_24 {dimension_numbers = #tpu.dot_dimension_numbers<[2], [2], [1], [1], [0, 0, 0, 1, 1, 1], [0], [0]>} : vector<4x8x8xbf16>, vector<4x16x8xbf16>, vector<4x8x16xf32> -> vector<4x8x16xf32>
    "tpu.trace_stop"() : () -> ()
    %cst_25 = arith.constant dense<0xFF800000> : vector<4x8xf32>
    %38 = vector.multi_reduction <maximumf>, %37, %cst_25 [2] : vector<4x8x16xf32> to vector<4x8xf32>
    %39 = vector.shape_cast %38 : vector<4x8xf32> to vector<4x8x1xf32>
    %40 = vector.broadcast %39 : vector<4x8x1xf32> to vector<4x8x16xf32>
    %41 = arith.subf %37, %40 : vector<4x8x16xf32>
    %42 = math.exp %41 : vector<4x8x16xf32>
    %cst_26 = arith.constant dense<0.000000e+00> : vector<4x8xf32>
    %43 = vector.multi_reduction <add>, %42, %cst_26 [2] : vector<4x8x16xf32> to vector<4x8xf32>
    %44 = vector.shape_cast %43 : vector<4x8xf32> to vector<4x8x1xf32>
    %45 = tpu.reciprocal %44 {approx = true} : vector<4x8x1xf32> -> vector<4x8x1xf32>
    %46 = vector.broadcast %45 : vector<4x8x1xf32> to vector<4x8x16xf32>
    %47 = arith.mulf %42, %46 : vector<4x8x16xf32>
    %48 = arith.truncf %47 : vector<4x8x16xf32> to vector<4x8x16xbf16>
    %49 = arith.truncf %34 : vector<4x16x8xf32> to vector<4x16x8xbf16>
    "tpu.trace_start"() <{level = 10 : i32, message = "hqk,hke->hqe"}> : () -> ()
    %cst_27 = arith.constant dense<0.000000e+00> : vector<4x8x8xf32>
    %50 = tpu.matmul %48, %49, %cst_27 {dimension_numbers = #tpu.dot_dimension_numbers<[2], [1], [1], [2], [0, 0, 0, 1, 1, 2], [0], [0]>} : vector<4x8x16xbf16>, vector<4x16x8xbf16>, vector<4x8x8xf32> -> vector<4x8x8xf32>
    "tpu.trace_stop"() : () -> ()
    %51 = tpu.transpose %50, [1, 0, 2] : vector<4x8x8xf32> -> vector<8x4x8xf32>
    %52 = vector.shape_cast %51 : vector<8x4x8xf32> to vector<8x32xf32>
    %53 = arith.truncf %52 : vector<8x32xf32> to vector<8x32xbf16>
    %c0_28 = arith.constant 0 : index
    %c0_29 = arith.constant 0 : index
    %c0_30 = arith.constant 0 : index
    %54 = vector.load %arg10[%c0_28, %c0_29, %c0_30] : memref<4x32x32xbf16, #tpu.memory_space<vmem>>, vector<1x32x32xbf16>
    %55 = vector.shape_cast %54 : vector<1x32x32xbf16> to vector<32x32xbf16>
    %cst_31 = arith.constant dense<0.000000e+00> : vector<8x32xf32>
    %56 = tpu.matmul %53, %55, %cst_31 {dimension_numbers = #tpu.dot_dimension_numbers<[1], [0], [0], [1], [0, 0, 1, 1], [], []>} : vector<8x32xbf16>, vector<32x32xbf16>, vector<8x32xf32> -> vector<8x32xf32>
    %c0_32 = arith.constant 0 : index
    %c0_33 = arith.constant 0 : index
    %c0_34 = arith.constant 0 : index
    %57 = vector.load %arg11[%c0_32, %c0_33, %c0_34] : memref<4x1x32xf32, #tpu.memory_space<vmem>>, vector<1x1x32xf32>
    %58 = vector.shape_cast %57 : vector<1x1x32xf32> to vector<1x32xf32>
    %59 = vector.broadcast %58 : vector<1x32xf32> to vector<8x32xf32>
    %60 = arith.addf %56, %59 : vector<8x32xf32>
    %61 = arith.truncf %9 : vector<16x32xf32> to vector<16x32xbf16>
    %c1 = arith.constant 1 : index
    %c0_35 = arith.constant 0 : index
    %c0_36 = arith.constant 0 : index
    %62 = vector.load %arg6[%c1, %c0_35, %c0_36] : memref<4x32x32xbf16, #tpu.memory_space<vmem>>, vector<1x32x32xbf16>
    %63 = vector.shape_cast %62 : vector<1x32x32xbf16> to vector<32x32xbf16>
    %cst_37 = arith.constant dense<0.000000e+00> : vector<16x32xf32>
    %64 = tpu.matmul %61, %63, %cst_37 {dimension_numbers = #tpu.dot_dimension_numbers<[1], [0], [0], [1], [0, 0, 1, 1], [], []>} : vector<16x32xbf16>, vector<32x32xbf16>, vector<16x32xf32> -> vector<16x32xf32>
    %c1_38 = arith.constant 1 : index
    %c0_39 = arith.constant 0 : index
    %c0_40 = arith.constant 0 : index
    %65 = vector.load %arg7[%c1_38, %c0_39, %c0_40] : memref<4x1x32xf32, #tpu.memory_space<vmem>>, vector<1x1x32xf32>
    %66 = vector.shape_cast %65 : vector<1x1x32xf32> to vector<1x32xf32>
    %67 = vector.broadcast %66 : vector<1x32xf32> to vector<16x32xf32>
    %68 = arith.addf %64, %67 : vector<16x32xf32>
    %69 = arith.truncf %60 : vector<8x32xf32> to vector<8x32xbf16>
    %c1_41 = arith.constant 1 : index
    %c0_42 = arith.constant 0 : index
    %c0_43 = arith.constant 0 : index
    %70 = vector.load %arg8[%c1_41, %c0_42, %c0_43] : memref<4x32x64xbf16, #tpu.memory_space<vmem>>, vector<1x32x64xbf16>
    %71 = vector.shape_cast %70 : vector<1x32x64xbf16> to vector<32x64xbf16>
    %cst_44 = arith.constant dense<0.000000e+00> : vector<8x64xf32>
    %72 = tpu.matmul %69, %71, %cst_44 {dimension_numbers = #tpu.dot_dimension_numbers<[1], [0], [0], [1], [0, 0, 1, 1], [], []>} : vector<8x32xbf16>, vector<32x64xbf16>, vector<8x64xf32> -> vector<8x64xf32>
    %c1_45 = arith.constant 1 : index
    %c0_46 = arith.constant 0 : index
    %c0_47 = arith.constant 0 : index
    %73 = vector.load %arg9[%c1_45, %c0_46, %c0_47] : memref<4x1x64xf32, #tpu.memory_space<vmem>>, vector<1x1x64xf32>
    %74 = vector.shape_cast %73 : vector<1x1x64xf32> to vector<1x64xf32>
    %75 = vector.broadcast %74 : vector<1x64xf32> to vector<8x64xf32>
    %76 = arith.addf %72, %75 : vector<8x64xf32>
    %77 = vector.shape_cast %68 : vector<16x32xf32> to vector<16x4x8xf32>
    %78 = tpu.transpose %77, [1, 0, 2] : vector<16x4x8xf32> -> vector<4x16x8xf32>
    %79 = vector.extract_strided_slice %76 {offsets = [0, 0], sizes = [8, 32], strides = [1, 1]} : vector<8x64xf32> to vector<8x32xf32>
    %80 = vector.shape_cast %79 : vector<8x32xf32> to vector<8x4x8xf32>
    %81 = tpu.transpose %80, [1, 0, 2] : vector<8x4x8xf32> -> vector<4x8x8xf32>
    %82 = vector.extract_strided_slice %76 {offsets = [0, 32], sizes = [8, 32], strides = [1, 1]} : vector<8x64xf32> to vector<8x32xf32>
    %83 = vector.shape_cast %82 : vector<8x32xf32> to vector<8x4x8xf32>
    %84 = tpu.transpose %83, [1, 0, 2] : vector<8x4x8xf32> -> vector<4x8x8xf32>
    %85 = arith.truncf %78 : vector<4x16x8xf32> to vector<4x16x8xbf16>
    %86 = arith.truncf %81 : vector<4x8x8xf32> to vector<4x8x8xbf16>
    "tpu.trace_start"() <{level = 10 : i32, message = "hqe,hke->hqk"}> : () -> ()
    %cst_48 = arith.constant dense<0.000000e+00> : vector<4x16x8xf32>
    %87 = tpu.matmul %85, %86, %cst_48 {dimension_numbers = #tpu.dot_dimension_numbers<[2], [2], [1], [1], [0, 0, 0, 1, 1, 1], [0], [0]>} : vector<4x16x8xbf16>, vector<4x8x8xbf16>, vector<4x16x8xf32> -> vector<4x16x8xf32>
    "tpu.trace_stop"() : () -> ()
    %cst_49 = arith.constant dense<0xFF800000> : vector<4x16xf32>
    %88 = vector.multi_reduction <maximumf>, %87, %cst_49 [2] : vector<4x16x8xf32> to vector<4x16xf32>
    %89 = vector.shape_cast %88 : vector<4x16xf32> to vector<4x16x1xf32>
    %90 = vector.broadcast %89 : vector<4x16x1xf32> to vector<4x16x8xf32>
    %91 = arith.subf %87, %90 : vector<4x16x8xf32>
    %92 = math.exp %91 : vector<4x16x8xf32>
    %cst_50 = arith.constant dense<0.000000e+00> : vector<4x16xf32>
    %93 = vector.multi_reduction <add>, %92, %cst_50 [2] : vector<4x16x8xf32> to vector<4x16xf32>
    %94 = vector.shape_cast %93 : vector<4x16xf32> to vector<4x16x1xf32>
    %95 = tpu.reciprocal %94 {approx = true} : vector<4x16x1xf32> -> vector<4x16x1xf32>
    %96 = vector.broadcast %95 : vector<4x16x1xf32> to vector<4x16x8xf32>
    %97 = arith.mulf %92, %96 : vector<4x16x8xf32>
    %98 = arith.truncf %97 : vector<4x16x8xf32> to vector<4x16x8xbf16>
    %99 = arith.truncf %84 : vector<4x8x8xf32> to vector<4x8x8xbf16>
    "tpu.trace_start"() <{level = 10 : i32, message = "hqk,hke->hqe"}> : () -> ()
    %cst_51 = arith.constant dense<0.000000e+00> : vector<4x16x8xf32>
    %100 = tpu.matmul %98, %99, %cst_51 {dimension_numbers = #tpu.dot_dimension_numbers<[2], [1], [1], [2], [0, 0, 0, 1, 1, 2], [0], [0]>} : vector<4x16x8xbf16>, vector<4x8x8xbf16>, vector<4x16x8xf32> -> vector<4x16x8xf32>
    "tpu.trace_stop"() : () -> ()
    %101 = tpu.transpose %100, [1, 0, 2] : vector<4x16x8xf32> -> vector<16x4x8xf32>
    %102 = vector.shape_cast %101 : vector<16x4x8xf32> to vector<16x32xf32>
    %103 = arith.truncf %102 : vector<16x32xf32> to vector<16x32xbf16>
    %c1_52 = arith.constant 1 : index
    %c0_53 = arith.constant 0 : index
    %c0_54 = arith.constant 0 : index
    %104 = vector.load %arg10[%c1_52, %c0_53, %c0_54] : memref<4x32x32xbf16, #tpu.memory_space<vmem>>, vector<1x32x32xbf16>
    %105 = vector.shape_cast %104 : vector<1x32x32xbf16> to vector<32x32xbf16>
    %cst_55 = arith.constant dense<0.000000e+00> : vector<16x32xf32>
    %106 = tpu.matmul %103, %105, %cst_55 {dimension_numbers = #tpu.dot_dimension_numbers<[1], [0], [0], [1], [0, 0, 1, 1], [], []>} : vector<16x32xbf16>, vector<32x32xbf16>, vector<16x32xf32> -> vector<16x32xf32>
    %c1_56 = arith.constant 1 : index
    %c0_57 = arith.constant 0 : index
    %c0_58 = arith.constant 0 : index
    %107 = vector.load %arg11[%c1_56, %c0_57, %c0_58] : memref<4x1x32xf32, #tpu.memory_space<vmem>>, vector<1x1x32xf32>
    %108 = vector.shape_cast %107 : vector<1x1x32xf32> to vector<1x32xf32>
    %109 = vector.broadcast %108 : vector<1x32xf32> to vector<16x32xf32>
    %110 = arith.addf %106, %109 : vector<16x32xf32>
    %c0_59 = arith.constant 0 : index
    %c0_60 = arith.constant 0 : index
    %c0_61 = arith.constant 0 : index
    %111 = vector.load %arg4[%c0_59, %c0_60, %c0_61] : memref<1x32x32xbf16, #tpu.memory_space<vmem>>, vector<1x32x32xbf16>
    %112 = vector.shape_cast %111 : vector<1x32x32xbf16> to vector<32x32xbf16>
    %113 = arith.truncf %110 : vector<16x32xf32> to vector<16x32xbf16>
    %cst_62 = arith.constant dense<0.000000e+00> : vector<16x32xf32>
    %114 = tpu.matmul %113, %112, %cst_62 {dimension_numbers = #tpu.dot_dimension_numbers<[1], [0], [0], [1], [0, 0, 1, 1], [], []>} : vector<16x32xbf16>, vector<32x32xbf16>, vector<16x32xf32> -> vector<16x32xf32>
    %c1_63 = arith.constant 1 : index
    %c0_64 = arith.constant 0 : index
    %c0_65 = arith.constant 0 : index
    %115 = vector.load %arg5[%c1_63, %c0_64, %c0_65] : memref<2x1x32xf32, #tpu.memory_space<vmem>>, vector<1x1x32xf32>
    %116 = vector.shape_cast %115 : vector<1x1x32xf32> to vector<1x32xf32>
    %117 = vector.broadcast %116 : vector<1x32xf32> to vector<16x32xf32>
    %118 = arith.addf %114, %117 : vector<16x32xf32>
    %c1_66 = arith.constant 1 : index
    %c0_67 = arith.constant 0 : index
    %c0_68 = arith.constant 0 : index
    %119 = vector.load %arg2[%c1_66, %c0_67, %c0_68] : memref<2x8x32xbf16, #tpu.memory_space<vmem>>, vector<1x8x32xbf16>
    %120 = vector.shape_cast %119 : vector<1x8x32xbf16> to vector<8x32xbf16>
    %c2 = arith.constant 2 : index
    %c0_69 = arith.constant 0 : index
    %c0_70 = arith.constant 0 : index
    %121 = vector.load %arg6[%c2, %c0_69, %c0_70] : memref<4x32x32xbf16, #tpu.memory_space<vmem>>, vector<1x32x32xbf16>
    %122 = vector.shape_cast %121 : vector<1x32x32xbf16> to vector<32x32xbf16>
    %cst_71 = arith.constant dense<0.000000e+00> : vector<8x32xf32>
    %123 = tpu.matmul %120, %122, %cst_71 {dimension_numbers = #tpu.dot_dimension_numbers<[1], [0], [0], [1], [0, 0, 1, 1], [], []>} : vector<8x32xbf16>, vector<32x32xbf16>, vector<8x32xf32> -> vector<8x32xf32>
    %c2_72 = arith.constant 2 : index
    %c0_73 = arith.constant 0 : index
    %c0_74 = arith.constant 0 : index
    %124 = vector.load %arg7[%c2_72, %c0_73, %c0_74] : memref<4x1x32xf32, #tpu.memory_space<vmem>>, vector<1x1x32xf32>
    %125 = vector.shape_cast %124 : vector<1x1x32xf32> to vector<1x32xf32>
    %126 = vector.broadcast %125 : vector<1x32xf32> to vector<8x32xf32>
    %127 = arith.addf %123, %126 : vector<8x32xf32>
    %128 = arith.truncf %118 : vector<16x32xf32> to vector<16x32xbf16>
    %c2_75 = arith.constant 2 : index
    %c0_76 = arith.constant 0 : index
    %c0_77 = arith.constant 0 : index
    %129 = vector.load %arg8[%c2_75, %c0_76, %c0_77] : memref<4x32x64xbf16, #tpu.memory_space<vmem>>, vector<1x32x64xbf16>
    %130 = vector.shape_cast %129 : vector<1x32x64xbf16> to vector<32x64xbf16>
    %cst_78 = arith.constant dense<0.000000e+00> : vector<16x64xf32>
    %131 = tpu.matmul %128, %130, %cst_78 {dimension_numbers = #tpu.dot_dimension_numbers<[1], [0], [0], [1], [0, 0, 1, 1], [], []>} : vector<16x32xbf16>, vector<32x64xbf16>, vector<16x64xf32> -> vector<16x64xf32>
    %c2_79 = arith.constant 2 : index
    %c0_80 = arith.constant 0 : index
    %c0_81 = arith.constant 0 : index
    %132 = vector.load %arg9[%c2_79, %c0_80, %c0_81] : memref<4x1x64xf32, #tpu.memory_space<vmem>>, vector<1x1x64xf32>
    %133 = vector.shape_cast %132 : vector<1x1x64xf32> to vector<1x64xf32>
    %134 = vector.broadcast %133 : vector<1x64xf32> to vector<16x64xf32>
    %135 = arith.addf %131, %134 : vector<16x64xf32>
    %136 = vector.shape_cast %127 : vector<8x32xf32> to vector<8x4x8xf32>
    %137 = tpu.transpose %136, [1, 0, 2] : vector<8x4x8xf32> -> vector<4x8x8xf32>
    %138 = vector.extract_strided_slice %135 {offsets = [0, 0], sizes = [16, 32], strides = [1, 1]} : vector<16x64xf32> to vector<16x32xf32>
    %139 = vector.shape_cast %138 : vector<16x32xf32> to vector<16x4x8xf32>
    %140 = tpu.transpose %139, [1, 0, 2] : vector<16x4x8xf32> -> vector<4x16x8xf32>
    %141 = vector.extract_strided_slice %135 {offsets = [0, 32], sizes = [16, 32], strides = [1, 1]} : vector<16x64xf32> to vector<16x32xf32>
    %142 = vector.shape_cast %141 : vector<16x32xf32> to vector<16x4x8xf32>
    %143 = tpu.transpose %142, [1, 0, 2] : vector<16x4x8xf32> -> vector<4x16x8xf32>
    %144 = arith.truncf %137 : vector<4x8x8xf32> to vector<4x8x8xbf16>
    %145 = arith.truncf %140 : vector<4x16x8xf32> to vector<4x16x8xbf16>
    "tpu.trace_start"() <{level = 10 : i32, message = "hqe,hke->hqk"}> : () -> ()
    %cst_82 = arith.constant dense<0.000000e+00> : vector<4x8x16xf32>
    %146 = tpu.matmul %144, %145, %cst_82 {dimension_numbers = #tpu.dot_dimension_numbers<[2], [2], [1], [1], [0, 0, 0, 1, 1, 1], [0], [0]>} : vector<4x8x8xbf16>, vector<4x16x8xbf16>, vector<4x8x16xf32> -> vector<4x8x16xf32>
    "tpu.trace_stop"() : () -> ()
    %cst_83 = arith.constant dense<0xFF800000> : vector<4x8xf32>
    %147 = vector.multi_reduction <maximumf>, %146, %cst_83 [2] : vector<4x8x16xf32> to vector<4x8xf32>
    %148 = vector.shape_cast %147 : vector<4x8xf32> to vector<4x8x1xf32>
    %149 = vector.broadcast %148 : vector<4x8x1xf32> to vector<4x8x16xf32>
    %150 = arith.subf %146, %149 : vector<4x8x16xf32>
    %151 = math.exp %150 : vector<4x8x16xf32>
    %cst_84 = arith.constant dense<0.000000e+00> : vector<4x8xf32>
    %152 = vector.multi_reduction <add>, %151, %cst_84 [2] : vector<4x8x16xf32> to vector<4x8xf32>
    %153 = vector.shape_cast %152 : vector<4x8xf32> to vector<4x8x1xf32>
    %154 = tpu.reciprocal %153 {approx = true} : vector<4x8x1xf32> -> vector<4x8x1xf32>
    %155 = vector.broadcast %154 : vector<4x8x1xf32> to vector<4x8x16xf32>
    %156 = arith.mulf %151, %155 : vector<4x8x16xf32>
    %157 = arith.truncf %156 : vector<4x8x16xf32> to vector<4x8x16xbf16>
    %158 = arith.truncf %143 : vector<4x16x8xf32> to vector<4x16x8xbf16>
    "tpu.trace_start"() <{level = 10 : i32, message = "hqk,hke->hqe"}> : () -> ()
    %cst_85 = arith.constant dense<0.000000e+00> : vector<4x8x8xf32>
    %159 = tpu.matmul %157, %158, %cst_85 {dimension_numbers = #tpu.dot_dimension_numbers<[2], [1], [1], [2], [0, 0, 0, 1, 1, 2], [0], [0]>} : vector<4x8x16xbf16>, vector<4x16x8xbf16>, vector<4x8x8xf32> -> vector<4x8x8xf32>
    "tpu.trace_stop"() : () -> ()
    %160 = tpu.transpose %159, [1, 0, 2] : vector<4x8x8xf32> -> vector<8x4x8xf32>
    %161 = vector.shape_cast %160 : vector<8x4x8xf32> to vector<8x32xf32>
    %162 = arith.truncf %161 : vector<8x32xf32> to vector<8x32xbf16>
    %c2_86 = arith.constant 2 : index
    %c0_87 = arith.constant 0 : index
    %c0_88 = arith.constant 0 : index
    %163 = vector.load %arg10[%c2_86, %c0_87, %c0_88] : memref<4x32x32xbf16, #tpu.memory_space<vmem>>, vector<1x32x32xbf16>
    %164 = vector.shape_cast %163 : vector<1x32x32xbf16> to vector<32x32xbf16>
    %cst_89 = arith.constant dense<0.000000e+00> : vector<8x32xf32>
    %165 = tpu.matmul %162, %164, %cst_89 {dimension_numbers = #tpu.dot_dimension_numbers<[1], [0], [0], [1], [0, 0, 1, 1], [], []>} : vector<8x32xbf16>, vector<32x32xbf16>, vector<8x32xf32> -> vector<8x32xf32>
    %c2_90 = arith.constant 2 : index
    %c0_91 = arith.constant 0 : index
    %c0_92 = arith.constant 0 : index
    %166 = vector.load %arg11[%c2_90, %c0_91, %c0_92] : memref<4x1x32xf32, #tpu.memory_space<vmem>>, vector<1x1x32xf32>
    %167 = vector.shape_cast %166 : vector<1x1x32xf32> to vector<1x32xf32>
    %168 = vector.broadcast %167 : vector<1x32xf32> to vector<8x32xf32>
    %169 = arith.addf %165, %168 : vector<8x32xf32>
    %170 = arith.truncf %118 : vector<16x32xf32> to vector<16x32xbf16>
    %c3 = arith.constant 3 : index
    %c0_93 = arith.constant 0 : index
    %c0_94 = arith.constant 0 : index
    %171 = vector.load %arg6[%c3, %c0_93, %c0_94] : memref<4x32x32xbf16, #tpu.memory_space<vmem>>, vector<1x32x32xbf16>
    %172 = vector.shape_cast %171 : vector<1x32x32xbf16> to vector<32x32xbf16>
    %cst_95 = arith.constant dense<0.000000e+00> : vector<16x32xf32>
    %173 = tpu.matmul %170, %172, %cst_95 {dimension_numbers = #tpu.dot_dimension_numbers<[1], [0], [0], [1], [0, 0, 1, 1], [], []>} : vector<16x32xbf16>, vector<32x32xbf16>, vector<16x32xf32> -> vector<16x32xf32>
    %c3_96 = arith.constant 3 : index
    %c0_97 = arith.constant 0 : index
    %c0_98 = arith.constant 0 : index
    %174 = vector.load %arg7[%c3_96, %c0_97, %c0_98] : memref<4x1x32xf32, #tpu.memory_space<vmem>>, vector<1x1x32xf32>
    %175 = vector.shape_cast %174 : vector<1x1x32xf32> to vector<1x32xf32>
    %176 = vector.broadcast %175 : vector<1x32xf32> to vector<16x32xf32>
    %177 = arith.addf %173, %176 : vector<16x32xf32>
    %178 = arith.truncf %169 : vector<8x32xf32> to vector<8x32xbf16>
    %c3_99 = arith.constant 3 : index
    %c0_100 = arith.constant 0 : index
    %c0_101 = arith.constant 0 : index
    %179 = vector.load %arg8[%c3_99, %c0_100, %c0_101] : memref<4x32x64xbf16, #tpu.memory_space<vmem>>, vector<1x32x64xbf16>
    %180 = vector.shape_cast %179 : vector<1x32x64xbf16> to vector<32x64xbf16>
    %cst_102 = arith.constant dense<0.000000e+00> : vector<8x64xf32>
    %181 = tpu.matmul %178, %180, %cst_102 {dimension_numbers = #tpu.dot_dimension_numbers<[1], [0], [0], [1], [0, 0, 1, 1], [], []>} : vector<8x32xbf16>, vector<32x64xbf16>, vector<8x64xf32> -> vector<8x64xf32>
    %c3_103 = arith.constant 3 : index
    %c0_104 = arith.constant 0 : index
    %c0_105 = arith.constant 0 : index
    %182 = vector.load %arg9[%c3_103, %c0_104, %c0_105] : memref<4x1x64xf32, #tpu.memory_space<vmem>>, vector<1x1x64xf32>
    %183 = vector.shape_cast %182 : vector<1x1x64xf32> to vector<1x64xf32>
    %184 = vector.broadcast %183 : vector<1x64xf32> to vector<8x64xf32>
    %185 = arith.addf %181, %184 : vector<8x64xf32>
    %186 = vector.shape_cast %177 : vector<16x32xf32> to vector<16x4x8xf32>
    %187 = tpu.transpose %186, [1, 0, 2] : vector<16x4x8xf32> -> vector<4x16x8xf32>
    %188 = vector.extract_strided_slice %185 {offsets = [0, 0], sizes = [8, 32], strides = [1, 1]} : vector<8x64xf32> to vector<8x32xf32>
    %189 = vector.shape_cast %188 : vector<8x32xf32> to vector<8x4x8xf32>
    %190 = tpu.transpose %189, [1, 0, 2] : vector<8x4x8xf32> -> vector<4x8x8xf32>
    %191 = vector.extract_strided_slice %185 {offsets = [0, 32], sizes = [8, 32], strides = [1, 1]} : vector<8x64xf32> to vector<8x32xf32>
    %192 = vector.shape_cast %191 : vector<8x32xf32> to vector<8x4x8xf32>
    %193 = tpu.transpose %192, [1, 0, 2] : vector<8x4x8xf32> -> vector<4x8x8xf32>
    %194 = arith.truncf %187 : vector<4x16x8xf32> to vector<4x16x8xbf16>
    %195 = arith.truncf %190 : vector<4x8x8xf32> to vector<4x8x8xbf16>
    "tpu.trace_start"() <{level = 10 : i32, message = "hqe,hke->hqk"}> : () -> ()
    %cst_106 = arith.constant dense<0.000000e+00> : vector<4x16x8xf32>
    %196 = tpu.matmul %194, %195, %cst_106 {dimension_numbers = #tpu.dot_dimension_numbers<[2], [2], [1], [1], [0, 0, 0, 1, 1, 1], [0], [0]>} : vector<4x16x8xbf16>, vector<4x8x8xbf16>, vector<4x16x8xf32> -> vector<4x16x8xf32>
    "tpu.trace_stop"() : () -> ()
    %cst_107 = arith.constant dense<0xFF800000> : vector<4x16xf32>
    %197 = vector.multi_reduction <maximumf>, %196, %cst_107 [2] : vector<4x16x8xf32> to vector<4x16xf32>
    %198 = vector.shape_cast %197 : vector<4x16xf32> to vector<4x16x1xf32>
    %199 = vector.broadcast %198 : vector<4x16x1xf32> to vector<4x16x8xf32>
    %200 = arith.subf %196, %199 : vector<4x16x8xf32>
    %201 = math.exp %200 : vector<4x16x8xf32>
    %cst_108 = arith.constant dense<0.000000e+00> : vector<4x16xf32>
    %202 = vector.multi_reduction <add>, %201, %cst_108 [2] : vector<4x16x8xf32> to vector<4x16xf32>
    %203 = vector.shape_cast %202 : vector<4x16xf32> to vector<4x16x1xf32>
    %204 = tpu.reciprocal %203 {approx = true} : vector<4x16x1xf32> -> vector<4x16x1xf32>
    %205 = vector.broadcast %204 : vector<4x16x1xf32> to vector<4x16x8xf32>
    %206 = arith.mulf %201, %205 : vector<4x16x8xf32>
    %207 = arith.truncf %206 : vector<4x16x8xf32> to vector<4x16x8xbf16>
    %208 = arith.truncf %193 : vector<4x8x8xf32> to vector<4x8x8xbf16>
    "tpu.trace_start"() <{level = 10 : i32, message = "hqk,hke->hqe"}> : () -> ()
    %cst_109 = arith.constant dense<0.000000e+00> : vector<4x16x8xf32>
    %209 = tpu.matmul %207, %208, %cst_109 {dimension_numbers = #tpu.dot_dimension_numbers<[2], [1], [1], [2], [0, 0, 0, 1, 1, 2], [0], [0]>} : vector<4x16x8xbf16>, vector<4x8x8xbf16>, vector<4x16x8xf32> -> vector<4x16x8xf32>
    "tpu.trace_stop"() : () -> ()
    %210 = tpu.transpose %209, [1, 0, 2] : vector<4x16x8xf32> -> vector<16x4x8xf32>
    %211 = vector.shape_cast %210 : vector<16x4x8xf32> to vector<16x32xf32>
    %212 = arith.truncf %211 : vector<16x32xf32> to vector<16x32xbf16>
    %c3_110 = arith.constant 3 : index
    %c0_111 = arith.constant 0 : index
    %c0_112 = arith.constant 0 : index
    %213 = vector.load %arg10[%c3_110, %c0_111, %c0_112] : memref<4x32x32xbf16, #tpu.memory_space<vmem>>, vector<1x32x32xbf16>
    %214 = vector.shape_cast %213 : vector<1x32x32xbf16> to vector<32x32xbf16>
    %cst_113 = arith.constant dense<0.000000e+00> : vector<16x32xf32>
    %215 = tpu.matmul %212, %214, %cst_113 {dimension_numbers = #tpu.dot_dimension_numbers<[1], [0], [0], [1], [0, 0, 1, 1], [], []>} : vector<16x32xbf16>, vector<32x32xbf16>, vector<16x32xf32> -> vector<16x32xf32>
    %c3_114 = arith.constant 3 : index
    %c0_115 = arith.constant 0 : index
    %c0_116 = arith.constant 0 : index
    %216 = vector.load %arg11[%c3_114, %c0_115, %c0_116] : memref<4x1x32xf32, #tpu.memory_space<vmem>>, vector<1x1x32xf32>
    %217 = vector.shape_cast %216 : vector<1x1x32xf32> to vector<1x32xf32>
    %218 = vector.broadcast %217 : vector<1x32xf32> to vector<16x32xf32>
    %219 = arith.addf %215, %218 : vector<16x32xf32>
    %c0_117 = arith.constant 0 : index
    %c0_118 = arith.constant 0 : index
    %220 = vector.load %arg12[%c0_117, %c0_118] : memref<4x32xbf16, #tpu.memory_space<vmem>>, vector<4x32xbf16>
    %221 = arith.truncf %219 : vector<16x32xf32> to vector<16x32xbf16>
    "tpu.trace_start"() <{level = 10 : i32, message = "od,nd->on"}> : () -> ()
    %cst_119 = arith.constant dense<0.000000e+00> : vector<4x16xf32>
    %222 = tpu.matmul %220, %221, %cst_119 {dimension_numbers = #tpu.dot_dimension_numbers<[1], [1], [0], [0], [0, 0, 1, 0], [], []>} : vector<4x32xbf16>, vector<16x32xbf16>, vector<4x16xf32> -> vector<4x16xf32>
    "tpu.trace_stop"() : () -> ()
    %c0_120 = arith.constant 0 : index
    %c0_121 = arith.constant 0 : index
    %223 = vector.load %arg13[%c0_120, %c0_121] : memref<4x1xf32, #tpu.memory_space<vmem>>, vector<4x1xf32>
    %224 = vector.broadcast %223 : vector<4x1xf32> to vector<4x16xf32>
    %225 = arith.addf %222, %224 : vector<4x16xf32>
    %c0_122 = arith.constant 0 : index
    %c0_123 = arith.constant 0 : index
    %c0_124 = arith.constant 0 : index
    %226 = vector.load %arg14[%c0_122, %c0_123, %c0_124] : memref<1x4x16xf32, #tpu.memory_space<vmem>>, vector<1x4x16xf32>
    %227 = vector.shape_cast %226 : vector<1x4x16xf32> to vector<4x16xf32>
    %228 = vector.shape_cast %225 : vector<4x16xf32> to vector<1x4x16xf32>
    tpu.vector_store %arg14[%c0_122, %c0_123, %c0_124], %228 {strides = array<i32>} : memref<1x4x16xf32, #tpu.memory_space<vmem>>, vector<1x4x16xf32>,
    return
  }
  func.func @transform_0(%arg0: i32) -> (i32, i32, i32) {
    %c0_i32 = arith.constant 0 : i32
    %c0_i32_0 = arith.constant 0 : i32
    %c0_i32_1 = arith.constant 0 : i32
    return %arg0, %c0_i32, %c0_i32_0 : i32, i32, i32
  }
  func.func @transform_1(%arg0: i32) -> (i32, i32, i32) {
    %c0_i32 = arith.constant 0 : i32
    %c0_i32_0 = arith.constant 0 : i32
    %c0_i32_1 = arith.constant 0 : i32
    %c0_i32_2 = arith.constant 0 : i32
    return %c0_i32, %c0_i32_0, %c0_i32_1 : i32, i32, i32
  }
  func.func @transform_2(%arg0: i32) -> (i32, i32) {
    %c0_i32 = arith.constant 0 : i32
    %c0_i32_0 = arith.constant 0 : i32
    %c0_i32_1 = arith.constant 0 : i32
    return %c0_i32, %c0_i32_0 : i32, i32
  }
  func.func @transform_3(%arg0: i32) -> (i32, i32, i32) {
    %c0_i32 = arith.constant 0 : i32
    %c0_i32_0 = arith.constant 0 : i32
    %c0_i32_1 = arith.constant 0 : i32
    %c0_i32_2 = arith.constant 0 : i32
    return %c0_i32, %c0_i32_0, %c0_i32_1 : i32, i32, i32
  }
  func.func @transform_4(%arg0: i32) -> (i32, i32, i32) {
    %c0_i32 = arith.constant 0 : i32
    %c0_i32_0 = arith.constant 0 : i32
    %c0_i32_1 = arith.constant 0 : i32
    %c0_i32_2 = arith.constant 0 : i32
    return %c0_i32, %c0_i32_0, %c0_i32_1 : i32, i32, i32
  }
  func.func @transform_5(%arg0: i32) -> (i32, i32, i32) {
    %c0_i32 = arith.constant 0 : i32
    %c0_i32_0 = arith.constant 0 : i32
    %c0_i32_1 = arith.constant 0 : i32
    %c0_i32_2 = arith.constant 0 : i32
    return %c0_i32, %c0_i32_0, %c0_i32_1 : i32, i32, i32
  }
  func.func @transform_6(%arg0: i32) -> (i32, i32, i32) {
    %c0_i32 = arith.constant 0 : i32
    %c0_i32_0 = arith.constant 0 : i32
    %c0_i32_1 = arith.constant 0 : i32
    %c0_i32_2 = arith.constant 0 : i32
    return %c0_i32, %c0_i32_0, %c0_i32_1 : i32, i32, i32
  }
  func.func @transform_7(%arg0: i32) -> (i32, i32, i32) {
    %c0_i32 = arith.constant 0 : i32
    %c0_i32_0 = arith.constant 0 : i32
    %c0_i32_1 = arith.constant 0 : i32
    %c0_i32_2 = arith.constant 0 : i32
    return %c0_i32, %c0_i32_0, %c0_i32_1 : i32, i32, i32
  }
  func.func @transform_8(%arg0: i32) -> (i32, i32, i32) {
    %c0_i32 = arith.constant 0 : i32
    %c0_i32_0 = arith.constant 0 : i32
    %c0_i32_1 = arith.constant 0 : i32
    %c0_i32_2 = arith.constant 0 : i32
    return %c0_i32, %c0_i32_0, %c0_i32_1 : i32, i32, i32
  }
  func.func @transform_9(%arg0: i32) -> (i32, i32, i32) {
    %c0_i32 = arith.constant 0 : i32
    %c0_i32_0 = arith.constant 0 : i32
    %c0_i32_1 = arith.constant 0 : i32
    %c0_i32_2 = arith.constant 0 : i32
    return %c0_i32, %c0_i32_0, %c0_i32_1 : i32, i32, i32
  }
  func.func @transform_10(%arg0: i32) -> (i32, i32, i32) {
    %c0_i32 = arith.constant 0 : i32
    %c0_i32_0 = arith.constant 0 : i32
    %c0_i32_1 = arith.constant 0 : i32
    %c0_i32_2 = arith.constant 0 : i32
    return %c0_i32, %c0_i32_0, %c0_i32_1 : i32, i32, i32
  }
  func.func @transform_11(%arg0: i32) -> (i32, i32) {
    %c0_i32 = arith.constant 0 : i32
    %c0_i32_0 = arith.constant 0 : i32
    %c0_i32_1 = arith.constant 0 : i32
    return %c0_i32, %c0_i32_0 : i32, i32
  }
  func.func @transform_12(%arg0: i32) -> (i32, i32) {
    %c0_i32 = arith.constant 0 : i32
    %c0_i32_0 = arith.constant 0 : i32
    %c0_i32_1 = arith.constant 0 : i32
    return %c0_i32, %c0_i32_0 : i32, i32
  }
  func.func @transform_13(%arg0: i32) -> (i32, i32, i32) {
    %c0_i32 = arith.constant 0 : i32
    %c0_i32_0 = arith.constant 0 : i32
    %c0_i32_1 = arith.constant 0 : i32
    return %arg0, %c0_i32, %c0_i32_0 : i32, i32, i32
  }
}

</mosaic_0001>

<bundles_post_ra>
// kernel: set_transformer_forward.1
= control target key start
LH: loop header
LB: loop body
LE: loop exit
PB: predicated region body
PF: predicated region fallthrough
CT: control target
= control target key end

     0   :  { %s9737_s0 = inlined_call_operand.vmem [shape: f32[2,4,16], index: 0, kind: input, shape index: {}]   ;;  %s9738_s1 = inlined_call_operand.hbm [shape: bf16[2,8,32], index: 1, kind: input, shape index: {}]   ;;  %s9739_s2 = inlined_call_operand.hbm [shape: bf16[4,32], index: 2, kind: input, shape index: {}]   ;;  %s9740_s3 = inlined_call_operand.vmem [shape: bf16[1,32,32], index: 3, kind: input, shape index: {}]   ;;  %s9741_s4 = inlined_call_operand.hbm [shape: f32[2,1,32], index: 4, kind: input, shape index: {}]   ;;  %s9742_s5 = inlined_call_operand.hbm [shape: bf16[4,32,32], index: 5, kind: input, shape index: {}]   ;;  %s9743_s6 = inlined_call_operand.hbm [shape: f32[4,1,32], index: 6, kind: input, shape index: {}]   ;;  %s9744_s7 = inlined_call_operand.hbm [shape: bf16[4,32,64], index: 7, kind: input, shape index: {}]   ;;  %s9745_s8 = inlined_call_operand.hbm [shape: f32[4,1,64], index: 8, kind: input, shape index: {}]   ;;  %s9746_s9 = inlined_call_operand.hbm [shape: bf16[4,32,32], index: 9, kind: input, shape index: {}]   ;;  %s9747_s10 = inlined_call_operand.hbm [shape: f32[4,1,32], index: 10, kind: input, shape index: {}]   ;;  %s9748_s11 = inlined_call_operand.hbm [shape: bf16[4,32], index: 11, kind: input, shape index: {}]   ;;  %s9749_s12 = inlined_call_operand.vmem [shape: f32[4,1], index: 12, kind: input, shape index: {}]   ;;  %s9750_s13 = inlined_call_operand.hbm [shape: f32[2,4,16], index: 13, kind: output, shape index: {}]  }
   0x1   :  { %9758 = sst [smem:[#allocation31_spill]] %s9739_s2 }
   0x2   :  { %9759 = sst [smem:[#allocation32_spill]] %s9742_s5 }
   0x3   :  { %18 = vsyncpa [#allocation3], 0 }
   0x4   :  { %19 = vsyncpa [#allocation6], 0 }
   0x5   :  { %20 = vsyncpa [#allocation9], 0 }
   0x6   :  { %21 = vsyncpa [#allocation12], 0 }
   0x7   :  { %22 = vsyncpa [#allocation15], 0 }
   0x8   :  { %23 = vsyncpa [#allocation18], 0 }
   0x9   :  { %24 = vsyncpa [#allocation4], 0 }
   0xa   :  { %26 = vsyncpa [#allocation4 + $0x1], 0  ;;  %s8463_s25 = smov 0   ;;  %s8465_s26 = smov 0  }
   0xb   :  { %s8467_s27 = smov 0   ;;  %s8469_s28 = smov 0  }
   0xc LB: > { %9760 = sst [smem:[#allocation27_spill]] %s8360_s27  ;;  %s8484_s29 = sadd.s32 4294967295, %s8364_s28   ;;  %s8364_s28 = sphi %s8469_s28, %s9787_s28   ;;  %s8360_s27 = sphi %s8467_s27, %s9789_s27   ;;  %s8356_s26 = sphi %s8465_s26, %s9791_s26   ;;  %s8352_s25 = sphi %s8463_s25, %s9790_s25  }
   0xd   : > { %s7130_s30 = sadd.s32 4294967294, %s8364_s28   ;;  %s8488_s14 = sadd.s32 1, %s8364_s28  }
   0xe   : > { %9761 = sst [smem:[#allocation28_spill]] %s8488_s14  ;;  %s317_s15 = sadd.s32 1, %s8360_s27 }
   0xf   : > { %s314_s16 = ssub.s32 %s8364_s28, %s8488_s14  ;;  %p327_p0 = scmp.ne.s32.totalorder %s8360_s27, %s8356_s26 }
  0x10   : > { %p315_p1 = scmp.eq.s32.totalorder %s314_s16, 0  ;;  %p328_p2 = scmp.eq.s32.totalorder %s8484_s29, 1 }
  0x11   : > { %p333_p3 = scmp.ne.s32.totalorder %s8356_s26, %s8352_s25  ;;  %p334_p4 = scmp.eq.s32.totalorder %s7130_s30, 1 }
  0x12   : > { %s8499_s17 = scalar_select %p315_p1, %s8360_s27, %s317_s15  }
  0x13   : > { %p8501_p5 = por %p328_p2, %p327_p0  ;;  %p8505_p6 = por %p334_p4, %p333_p3 }
  0x14   : > { %9762 = sst [smem:[#allocation29_spill]] %s8499_s17  ;;  %p7131_p7 = scmp.ge.s32.totalorder %s8364_s28, 1 }
  0x15   : > { %s9763_s18 = scalar_select %p8501_p5, 1, 0 }
  0x16   : > { %s9764_s19 = scalar_select %p8505_p6, 1, 0 }
  0x17   : > { %p341_p8 = scmp.lt.s32.totalorder %s8364_s28, 3  ;;  %p9752_p9 = scmp.eq.s32.totalorder %s8484_s29, 0 }
  0x18   : > { %9765 = sst [smem:[#allocation30_spill]] %s9764_s19  ;;  %s8366_s21 = smov [#allocation5]  }
  0x19   : > { %p8512_p10 = pnand %p7131_p7, %p341_p8  ;;  %s367_s22 = sshll.u32 %s8366_s21, 4  ;;  %s368_s22 = int_to_ptr.vmem [resolvable:$true] %s367_s22 }
  0x1a   : > { %s8367_s24 = smov [#allocation8]   ;;  %s8368_s15 = smov [#allocation11]  }
  0x1b   : > { %s9766_s20 = scalar_select %p8512_p10, 1, 0 }
  0x1c   : > { %p7752_p11 = pneg %p8512_p10  ;;  %s393_s30 = sshll.u32 %s8367_s24, 4  ;;  %s394_s30 = int_to_ptr.vmem [resolvable:$true] %s393_s30 }
  0x1d   : > { %s419_s16 = sshll.u32 %s8368_s15, 4  ;;  %s8031_s21 = scalar_lea.vmem %s368_s22, 32  ;;  %s420_s16 = int_to_ptr.vmem [resolvable:$true] %s419_s16 }
  0x1e   : > { %p8520_p12 = pnand %p9752_p9, %p7752_p11  ;;  %p8032_p0 = scmp.ne.s32.totalorder %s368_s22, %s8031_s21 }
  0x1f   : > { %p8039_p3 = scmp.lt.s32.totalorder %s368_s22, %s368_s22  ;;  %p8040_p4 = scmp.lt.s32.totalorder %s8031_s21, %s8031_s21 }
  0x20   : > { %p8526_p13 = pneg %p8520_p12 }
  0x21   : > { %p8041_p7 = por %p8040_p4, %p8039_p3 }
  0x22   : > { %p8034_p1 = pnand %p8032_p0, %p8526_p13 }
  0x24   : > { %p8035_p2 = pneg %p8034_p1 }
  0x26   : > { %p8042_p8 = pnand %p8041_p7, %p8035_p2 }
  0x28   : > { %8045 = shalt.err (!%p8042_p8)
}
  0x29   : > { %s9769_s2 = sld [smem:[#allocation31_spill]]  ;;  %s8057_s27 = scalar_lea.vmem %s394_s30, 1024 }
  0x2a   : > { %p8058_p11 = scmp.ne.s32.totalorder %s394_s30, %s8057_s27  ;;  %p8065_p5 = scmp.lt.s32.totalorder %s394_s30, %s394_s30 }
  0x2b   : > { %p8066_p0 = scmp.lt.s32.totalorder %s8057_s27, %s8057_s27 }
  0x2c   : > { %p8060_p9 = pnand %p8058_p11, %p8526_p13 }
  0x2d   : > { %p8067_p1 = por %p8066_p0, %p8065_p5 }
  0x2e   : > { %p8061_p6 = pneg %p8060_p9 }
  0x2f   : > { %7758 = dma.hbm_to_vmem [thread:$0]  (!%p8520_p12), %s9769_s2, 32, %s368_s22, [#allocation6]  }
  0x30   : > { %p8068_p10 = pnand %p8067_p1, %p8061_p6 }
  0x32   : > { %8071 = shalt.err (!%p8068_p10)
}
  0x33   : > { %s8369_s21 = smov 64   ;;  %s8370_s14 = smov 4  }
  0x34   : > { %s9770_s5 = sld [smem:[#allocation32_spill]]  ;;  %s8083_s15 = scalar_lea.vmem %s420_s16, 1024 }
  0x35   : > { %p8084_p9 = scmp.ne.s32.totalorder %s420_s16, %s8083_s15  ;;  %p8091_p6 = scmp.lt.s32.totalorder %s420_s16, %s420_s16 }
  0x36   : > { %p8092_p10 = scmp.lt.s32.totalorder %s8083_s15, %s8083_s15 }
  0x37   : > { %p8086_p2 = pnand %p8084_p9, %p8526_p13 }
  0x38   : > { %p8093_p3 = por %p8092_p10, %p8091_p6 }
  0x39   : > { %p8087_p5 = pneg %p8086_p2 }
  0x3a   : > { %7764 = dma.hbm_to_vmem [thread:$0]  (!%p8520_p12), %s9770_s5, 1024, %s394_s30, [#allocation9], %s8369_s21, %s8369_s21, %s8370_s14  }
  0x3b   : > { %p8094_p4 = pnand %p8093_p3, %p8087_p5 }
  0x3d   : > { %8097 = shalt.err (!%p8094_p4)
}
  0x3e   : > { %7770 = dma.hbm_to_vmem [thread:$0]  (!%p8520_p12), %s9744_s7, 1024, %s420_s16, [#allocation12], %s8369_s21, %s8369_s21, %s8370_s14  }
  0x3f   : > { %s8371_s30 = smov [#allocation14]   ;;  %s8372_s22 = smov [#allocation2]  }
  0x40   : > { %s445_s24 = sshll.u32 %s8371_s30, 4  ;;  %s353_s5 = sshll.u32 %s8372_s22, 4  ;;  %s446_s24 = int_to_ptr.vmem [resolvable:$true] %s445_s24  ;;  %s354_s5 = int_to_ptr.vmem [resolvable:$true] %s353_s5 }
  0x41   : > { %s8109_s19 = scalar_lea.vmem %s446_s24, 1024  ;;  %p8117_p0 = scmp.lt.s32.totalorder %s446_s24, %s446_s24 }
  0x42   : > { %p8110_p7 = scmp.ne.s32.totalorder %s446_s24, %s8109_s19  ;;  %p8118_p1 = scmp.lt.s32.totalorder %s8109_s19, %s8109_s19 }
  0x44   : > { %p8112_p8 = pnand %p8110_p7, %p8526_p13  ;;  %p8119_p9 = por %p8118_p1, %p8117_p0 }
  0x46   : > { %p8113_p11 = pneg %p8112_p8 }
  0x48   : > { %p8120_p2 = pnand %p8119_p9, %p8113_p11 }
  0x4a   : > { %8123 = shalt.err (!%p8120_p2)
}
  0x4b   : > { %7776 = dma.hbm_to_vmem [thread:$0]  (!%p8520_p12), %s9746_s9, 1024, %s446_s24, [#allocation15], %s8369_s21, %s8369_s21, %s8370_s14  }
  0x4c   : > { %s8135_s15 = scalar_lea.vmem %s354_s5, 128  ;;  %p8143_p3 = scmp.lt.s32.totalorder %s354_s5, %s354_s5 }
  0x4d   : > { %p8136_p5 = scmp.ne.s32.totalorder %s354_s5, %s8135_s15  ;;  %p8144_p4 = scmp.lt.s32.totalorder %s8135_s15, %s8135_s15 }
  0x4f   : > { %p8138_p6 = pnand %p8136_p5, %p8526_p13  ;;  %p8145_p7 = por %p8144_p4, %p8143_p3 }
  0x51   : > { %p8139_p10 = pneg %p8138_p6 }
  0x53   : > { %p8146_p8 = pnand %p8145_p7, %p8139_p10 }
  0x55   : > { %8149 = shalt.err (!%p8146_p8)
}
  0x56   : > { %7755 = dma.hbm_to_vmem [thread:$0]  (!%p8520_p12), %s9738_s1, 128, %s354_s5, [#allocation3], %s8369_s21, %s8369_s21, %s8370_s14  }
  0x57   : > { %s8373_s30 = smov [#allocation7]  }
  0x58   : > { %s380_s24 = sshll.u32 %s8373_s30, 4  ;;  %s381_s24 = int_to_ptr.vmem [resolvable:$true] %s380_s24 }
  0x59   : > { %s8161_s22 = scalar_lea.vmem %s381_s24, 32  ;;  %p8169_p9 = scmp.lt.s32.totalorder %s381_s24, %s381_s24 }
  0x5a   : > { %p8162_p11 = scmp.ne.s32.totalorder %s381_s24, %s8161_s22  ;;  %p8170_p2 = scmp.lt.s32.totalorder %s8161_s22, %s8161_s22 }
  0x5c   : > { %p8164_p0 = pnand %p8162_p11, %p8526_p13  ;;  %p8171_p5 = por %p8170_p2, %p8169_p9 }
  0x5e   : > { %p8165_p1 = pneg %p8164_p0 }
  0x60   : > { %p8172_p6 = pnand %p8171_p5, %p8165_p1 }
  0x62   : > { %8175 = shalt.err (!%p8172_p6)
}
  0x63   : > { %s8374_s2 = smov 16   ;;  %s8375_s16 = smov 1  }
  0x64   : > { %7761 = dma.hbm_to_vmem [thread:$0]  (!%p8520_p12), %s9741_s4, 32, %s381_s24, [#allocation6], %s8374_s2, %s8374_s2, %s8375_s16  }
  0x65   : > { %s8376_s21 = smov [#allocation10]   ;;  %s8377_s19 = smov [#allocation13]  }
  0x66   : > { %s406_s15 = sshll.u32 %s8376_s21, 4  ;;  %s432_s27 = sshll.u32 %s8377_s19, 4  ;;  %s407_s15 = int_to_ptr.vmem [resolvable:$true] %s406_s15  ;;  %s433_s27 = int_to_ptr.vmem [resolvable:$true] %s432_s27 }
  0x67   : > { %s8187_s30 = scalar_lea.vmem %s407_s15, 64  ;;  %p8195_p7 = scmp.lt.s32.totalorder %s407_s15, %s407_s15 }
  0x68   : > { %p8188_p10 = scmp.ne.s32.totalorder %s407_s15, %s8187_s30  ;;  %p8196_p8 = scmp.lt.s32.totalorder %s8187_s30, %s8187_s30 }
  0x6a   : > { %p8190_p3 = pnand %p8188_p10, %p8526_p13  ;;  %p8197_p11 = por %p8196_p8, %p8195_p7 }
  0x6c   : > { %p8191_p4 = pneg %p8190_p3 }
  0x6e   : > { %p8198_p0 = pnand %p8197_p11, %p8191_p4 }
  0x70   : > { %8201 = shalt.err (!%p8198_p0)
}
  0x71   : > { %7767 = dma.hbm_to_vmem [thread:$0]  (!%p8520_p12), %s9743_s6, 64, %s407_s15, [#allocation9], %s8374_s2, %s8374_s2, %s8375_s16  }
  0x72   : > { %s8213_s5 = scalar_lea.vmem %s433_s27, 64  ;;  %p8221_p5 = scmp.lt.s32.totalorder %s433_s27, %s433_s27 }
  0x73   : > { %p8214_p1 = scmp.ne.s32.totalorder %s433_s27, %s8213_s5  ;;  %p8222_p6 = scmp.lt.s32.totalorder %s8213_s5, %s8213_s5 }
  0x75   : > { %p8216_p9 = pnand %p8214_p1, %p8526_p13  ;;  %p8223_p10 = por %p8222_p6, %p8221_p5 }
  0x77   : > { %p8217_p2 = pneg %p8216_p9 }
  0x79   : > { %p8224_p3 = pnand %p8223_p10, %p8217_p2 }
  0x7b   : > { %8227 = shalt.err (!%p8224_p3)
}
  0x7c   : > { %7773 = dma.hbm_to_vmem [thread:$0]  (!%p8520_p12), %s9745_s8, 64, %s433_s27, [#allocation12], %s8374_s2, %s8374_s2, %s8375_s16  }
  0x7d   : > { %s8378_s15 = smov [#allocation16]   ;;  %s8379_s30 = smov [#allocation17]  }
  0x7e   : > { %s458_s19 = sshll.u32 %s8378_s15, 4  ;;  %s472_s24 = sshll.u32 %s8379_s30, 4  ;;  %s459_s19 = int_to_ptr.vmem [resolvable:$true] %s458_s19  ;;  %s473_s24 = int_to_ptr.vmem [resolvable:$true] %s472_s24 }
  0x7f   : > { %s8239_s22 = scalar_lea.vmem %s459_s19, 64  ;;  %p8247_p11 = scmp.lt.s32.totalorder %s459_s19, %s459_s19 }
  0x80   : > { %p8240_p4 = scmp.ne.s32.totalorder %s459_s19, %s8239_s22  ;;  %p8248_p0 = scmp.lt.s32.totalorder %s8239_s22, %s8239_s22 }
  0x82   : > { %p8242_p7 = pnand %p8240_p4, %p8526_p13  ;;  %p8249_p1 = por %p8248_p0, %p8247_p11 }
  0x84   : > { %p8243_p8 = pneg %p8242_p7 }
  0x86   : > { %p8250_p9 = pnand %p8249_p1, %p8243_p8 }
  0x88   : > { %8253 = shalt.err (!%p8250_p9)
}
  0x89   : > { %7779 = dma.hbm_to_vmem [thread:$0]  (!%p8520_p12), %s9747_s10, 64, %s459_s19, [#allocation15], %s8374_s2, %s8374_s2, %s8375_s16  }
  0x8a   : > { %s8265_s14 = scalar_lea.vmem %s473_s24, 32  ;;  %p8273_p10 = scmp.lt.s32.totalorder %s473_s24, %s473_s24 }
  0x8b   : > { %p8266_p2 = scmp.ne.s32.totalorder %s473_s24, %s8265_s14  ;;  %p8274_p3 = scmp.lt.s32.totalorder %s8265_s14, %s8265_s14 }
  0x8d   : > { %p8268_p5 = pnand %p8266_p2, %p8526_p13  ;;  %p8275_p4 = por %p8274_p3, %p8273_p10 }
  0x8f   : > { %p8269_p6 = pneg %p8268_p5 }
  0x91   : > { %p8276_p7 = pnand %p8275_p4, %p8269_p6 }
  0x93   : > { %8279 = shalt.err (!%p8276_p7)
}
  0x94   : > { %7782 = dma.hbm_to_vmem [thread:$0]  (!%p8520_p12), %s9748_s11, 32, %s473_s24, [#allocation18]  }
  0x95   : > { %p9771_p8 = scmp.ne.s32.totalorder %s9766_s20, 0 }
  0x96   : > { %p9772_p11 = scmp.eq.s32.totalorder (!%p9771_p8), %s8484_s29, 0 }
  0x97   : > { %495 = sbr.rel (%p9771_p8) target bundleno = 6725 (0x1a45), region = 72 }
  0x9c   : > { %8323 = dma.done.wait (%p9772_p11), [#allocation3], 128   ;;  %p9773_p13 = pmov %p9772_p11 }
  0x9d   : > { %p9774_p0 = pmov %p9772_p11 }
  0x9e   : > { %8325 = vsyncadd (%p9773_p13), [#allocation3], 4294967168 }
  0x9f   : > { %8327 = dma.done.wait (%p9774_p0), [#allocation6], 64   ;;  %p9775_p1 = pmov %p9774_p0 }
  0xa0   : > { %p9776_p9 = pmov %p9774_p0 }
  0xa1   : > { %8329 = vsyncadd (%p9775_p1), [#allocation6], 4294967232 }
  0xa2   : > { %8331 = dma.done.wait (%p9776_p9), [#allocation9], 1088   ;;  %p9777_p12 = pmov %p9774_p0 }
  0xa3   : > { %p9778_p2 = pmov %p9774_p0 }
  0xa4   : > { %8333 = vsyncadd (%p9777_p12), [#allocation9], 4294966208 }
  0xa5   : > { %8335 = dma.done.wait (%p9778_p2), [#allocation12], 1088   ;;  %p9779_p5 = pmov %p9774_p0 }
  0xa6   : > { %p9780_p6 = pmov %p9774_p0 }
  0xa7   : > { %8337 = vsyncadd (%p9779_p5), [#allocation12], 4294966208 }
  0xa8   : > { %8339 = dma.done.wait (%p9780_p6), [#allocation15], 1088   ;;  %p9781_p10 = pmov %p9774_p0 }
  0xa9   : > { %p9782_p3 = pmov %p9774_p0 }
  0xaa   : > { %8341 = vsyncadd (%p9781_p10), [#allocation15], 4294966208 }
  0xab   : > { %8343 = dma.done.wait (%p9782_p3), [#allocation18], 32   ;;  %p9783_p4 = pmov %p9774_p0 }
  0xac   : > { %p574_p7 = scmp.lt.s32.totalorder %s8484_s29, 1  ;;  %v8380_v0 = vmov 0.0   ;;  %vm625_vm0 = vcmask 1041408   ;;  %v612_v2 = vld [vmem:[#allocation5] sm:$0x3]  ;;  %vm8381_vm1 = vmmov 0   ;;  %v821_v36 = vlaneseq }
  0xad   : > { %8345 = vsyncadd (%p9783_p4), [#allocation18], 4294967264  ;;  %7402 = vmatprep.subr.bf16.mxu0 %v8380_v0  ;;  %7408 = vmatprep.subr.bf16.mxu1 %v8380_v0  ;;  %v627_v3 = vsel %vm625_vm0, %v612_v2, 0  ;;  %v7898_v4 = vld [vmem:[#allocation8 + $0x8] sm:$0xff]   ;;  %v7899_v5 = vld [vmem:[#allocation8] sm:$0xff]   ;;  %vm694_vm2 = vcmask 261120  }
  0xae   : > { %s575_s17 = scalar_select %p574_p7, %s8484_s29, 1  ;;  %7403 = vmatpush3.bf16.msra.mxu0 %v627_v3  ;;  %7404 = vmatprep.mubr.msk.bf16.mxu0 %vm8381_vm1, %v8380_v0  ;;  %v670_v6 = vld [vmem:[#allocation2] sm:$0xf]  ;;  %vm621_vm3 = vcmask 31744   ;;  %v7900_v10 = vld [vmem:[#allocation11 + $0x8] sm:$0xff]   ;;  %v7901_v11 = vld [vmem:[#allocation11] sm:$0xff]  }
  0xaf   : > { %7412 = vmatprep.mubr.msk.bf16.mxu1 %vm8381_vm1, %v8380_v0  ;;  %7416 = vmatprep.subr.bf16.mxu0 %v8380_v0  ;;  %v7158_v12 = vld [vmem:[#allocation10] ss:$0 sm:$0xff]  ;;  %s8382_s19 = smov 120   ;;  %v7156_v19 = vld [vmem:[#allocation7] ss:$0 sm:$0xff]  ;;  %s8383_s30 = smov 112  }
  0xb0   : > { %s7155_s20 = sshll.u32 %s575_s17, 2  ;;  %7409 = vmatpush3.bf16.msra.mxu1 %v7898_v4  ;;  %v7162_v26 = vld [vmem:[#allocation13] ss:$0 sm:$0xff]  ;;  %s8384_s24 = smov 104   ;;  %v8386_v34 = vmov 1983009808  }
  0xb1   : > { %s577_s16 = scalar_lea.vmem %s9737_s0, %s7155_s20  ;;  %7410 = vmatprep.subr.bf16.mxu1 %v8380_v0  ;;  %s8385_s22 = smov 96   ;;  %v819_v35 = vunpack.c.l.s4 %v8386_v34  ;;  %v8387_v37 = vmov 1934713408   ;;  %v822_v40 = vshrl.u32 %v821_v36, 7  ;;  %vm1548_vm4 = vcmask 64512  }
  0xb2   : > { %v579_v1 = vld [vmem:[%s577_s16] sm:$0xf]  ;;  %v851_v38 = vunpack.c.l.s4 %v8387_v37  ;;  %vm1733_vm5 = vcmask 130048   ;;  %s8388_s27 = smov 16   ;;  %s8389_s5 = smov 8   ;;  %vm2108_vm6 = vcmask 195584  }
  0xb3   : > { %580 = vxpose.xlu0.b32.start.end [1/1] (short) (narrow) %v579_v1, 16  ;;  %v820_v39 = vunpack.c.0.s8 %v819_v35  ;;  %s8390_s14 = smov 24   ;;  %vm3193_vm7 = vcmask 1043456   ;;  %s571_s16 = sand.u32 1, %s8356_s26   ;;  %vm6957_vm8 = vcmask 125952  }
  0xb4   : > { %7411 = vmatpush3.bf16.msra.mxu1 %v7899_v5  ;;  %v852_v43 = vunpack.c.0.s8 %v851_v38  ;;  %s6960_s21 = scalar_lea.sflag [#allocation4], %s571_s16  ;;  %p9784_p11 = scmp.ne.s32.totalorder %s9763_s18, 0 }
  0xb5   : > { %7424 = vmatprep.subr.bf16.mxu1 %v8380_v0  ;;  %v8698_v44 = vsub.s32 %v820_v39, %v822_v40  ;;  %s8392_s15 = smov [#allocation19]  }
  0xb6   : > { %v8706_v50 = vsub.s32 %v852_v43, %v822_v40  ;;  %s8284_s17 = sshll.u32 %s8392_s15, 4  ;;  %s8285_s17 = int_to_ptr.vmem [resolvable:$false] %s8284_s17 }
  0xb7   : > { %7413 = vmatmul.mubr.msk.bf16.vlgmr.msra.gmra.mxu1 %vm694_vm2, %v670_v6  ;;  %s8286_s20 = scalar_lea.vmem %s8285_s17, 128 }
  0xb8   : > { %7426 = vmatprep.mubr.msk.bf16.mxu1 %vm8381_vm1, %v8380_v0 }
 0x12f   : > { %v596_v7 = vpop.trf.xlu0 }
 0x133   : > { %v597_v8 = vpop.trf.xlu0 }
 0x134   : > { %v613_v9 = vpack.c.bf16 %v597_v8, %v596_v7 }
 0x136   : > { %7405 = vmatmul.mubr.msk.bf16.vlgmr.msra.gmra.mxu0 %vm621_vm3, %v613_v9 }
 0x137   : > { %7420 = vmatprep.mubr.msk.bf16.mxu0 %vm8381_vm1, %v8380_v0  ;;  %7417 = vmatpush3.bf16.msra.mxu0 %v7900_v10 }
 0x138   : > { %7418 = vmatprep.subr.bf16.mxu0 %v8380_v0 }
 0x13b   : > { %7419 = vmatpush3.bf16.msra.mxu0 %v7901_v11 }
 0x13c   : > { %7430 = vmatprep.subr.bf16.mxu0 %v8380_v0 }
 0x177   : > { %v732_v13 = vpop.f32.mrf.mxu1 }
 0x178   : > { %v8671_v14 = vadd.f32 %v7158_v12, %v732_v13 }
 0x179   : > { %v7414_v15 = vpop.f32.mrf.mxu1 }
 0x17a   : > { %807 = vrot.lane.b32.xlu1 %v8671_v14, %s8382_s19 }
 0x17b   : > { %v735_v16 = vpop.f32.mrf.mxu1 }
 0x17d   : > { %v7415_v17 = vpop.f32.mrf.mxu1 }
 0x1ec   : > { %v8693_v33 = vpop.permute.xlu1 %807 }
 0x1f6   : > { %v663_v18 = vpop.f32.mrf.mxu0 }
 0x1f7   : > { %v664_v22 = vadd.f32 %v7156_v19, %v663_v18 }
 0x1f8   : > { %v7406_v20 = vpop.f32.mrf.mxu0 }
 0x1fa   : > { %v666_v21 = vpop.f32.mrf.mxu0 }
 0x1fb   : > { %v667_v23 = vadd.f32 %v7156_v19, %v666_v21 }
 0x1fc   : > { %v7407_v24 = vpop.f32.mrf.mxu0 }
 0x1fd   : > { %v8675_v25 = vpack.c.bf16 %v667_v23, %v664_v22 }
 0x1ff   : > { %7421 = vmatmul.mubr.msk.bf16.vlgmr.msra.gmra.mxu0 %vm694_vm2, %v8675_v25 }
 0x200   : > { %7432 = vmatprep.mubr.msk.bf16.mxu0 %vm8381_vm1, %v8380_v0 }
 0x2bf   : > { %v799_v27 = vpop.f32.mrf.mxu0 }
 0x2c0   : > { %v800_v28 = vadd.f32 %v7162_v26, %v799_v27 }
 0x2c1   : > { %v7422_v29 = vpop.f32.mrf.mxu0 }
 0x2c2   : > { %960 = vrot.lane.b32.xlu1 %v800_v28, %s8383_s30  ;;  %954 = vrot.lane.b32.xlu0 %v800_v28, %s8382_s19 }
 0x2c3   : > { %v802_v30 = vpop.f32.mrf.mxu0 }
 0x2c4   : > { %v803_v31 = vadd.f32 %v7162_v26, %v802_v30 }
 0x2c5   : > { %v7423_v32 = vpop.f32.mrf.mxu0 }
 0x2c6   : > { %966 = vrot.lane.b32.xlu1 %v800_v28, %s8384_s24  ;;  %1246 = vrot.lane.b32.xlu0 %v803_v31, %s8385_s22 }
 0x2ca   : > { %956 = vrot.lane.b32.xlu1 %v803_v31, %s8382_s19 }
 0x2ce   : > { %962 = vrot.lane.b32.xlu1 %v803_v31, %s8383_s30 }
 0x2d2   : > { %968 = vrot.lane.b32.xlu1 %v803_v31, %s8384_s24 }
 0x2d6   : > { %810 = vrot.lane.b32.xlu1 %v8671_v14, %s8383_s30 }
 0x2da   : > { %813 = vrot.lane.b32.xlu1 %v8671_v14, %s8384_s24 }
 0x2de   : > { %1244 = vrot.lane.b32.xlu1 %v800_v28, %s8385_s22 }
 0x334   : > { %v8695_v41 = vpop.permute.xlu1 %960  ;;  %v955_v42 = vpop.permute.xlu0 %954 }
 0x335   : > { %1248 = vrot.lane.b32.xlu1 %v955_v42, %s8385_s22  ;;  %v972_v45 = vcombine.low %v800_v28, %v8695_v41  ;;  %v973_v46 = vcombine.high %v800_v28, %v8695_v41 }
 0x337   : > { %v980_v51 = vrot.slane %v972_v45, %v8698_v44  ;;  %v987_v52 = vrot.slane %v973_v46, %v8698_v44 }
 0x338   : > { %v8702_v47 = vpop.permute.xlu1 %966 }
 0x339   : > { %v988_v48 = vcombine.low %v955_v42, %v8702_v47  ;;  %v989_v49 = vcombine.high %v955_v42, %v8702_v47 }
 0x33b   : > { %v996_v53 = vrot.slane %v988_v48, %v8698_v44  ;;  %v1003_v54 = vrot.slane %v989_v49, %v8698_v44 }
 0x33c   : > { %v957_v55 = vpop.permute.xlu1 %956 }
 0x33d   : > { %v1004_v56 = vcombine.low %v980_v51, %v996_v53  ;;  %v1005_v57 = vcombine.high %v980_v51, %v996_v53  ;;  %v1020_v58 = vcombine.low %v987_v52, %v1003_v54  ;;  %v1021_v59 = vcombine.high %v987_v52, %v1003_v54  ;;  %1250 = vrot.lane.b32.xlu1 %v957_v55, %s8385_s22 }
 0x33f   : > { %v1012_v60 = vrot.slane %v1004_v56, %v8706_v50  ;;  %v1019_v61 = vrot.slane %v1005_v57, %v8706_v50  ;;  %v1028_v62 = vrot.slane %v1020_v58, %v8706_v50  ;;  %v1035_v63 = vrot.slane %v1021_v59, %v8706_v50 }
 0x340   : > { %v8717_v1 = vpop.permute.xlu1 %962 }
 0x341   : > { %v1108_v2 = vcombine.low %v1012_v60, %v1019_v61  ;;  %v7168_v3 = vcombine.high %v1012_v60, %v1019_v61  ;;  %v1124_v4 = vcombine.low %v1028_v62, %v1035_v63  ;;  %v7169_v5 = vcombine.high %v1028_v62, %v1035_v63 }
 0x342   : > { %v1040_v6 = vcombine.low %v803_v31, %v8717_v1  ;;  %v1041_v7 = vcombine.high %v803_v31, %v8717_v1 }
 0x343   : > { %v8726_v11 = vrot.slane %v1108_v2, %v8698_v44  ;;  %v8729_v12 = vrot.slane %v7168_v3, %v8698_v44  ;;  %v8732_v13 = vrot.slane %v1124_v4, %v8698_v44  ;;  %v8735_v15 = vrot.slane %v7169_v5, %v8698_v44 }
 0x344   : > { %v8721_v8 = vpop.permute.xlu1 %968  ;;  %v1048_v16 = vrot.slane %v1040_v6, %v8698_v44  ;;  %v1055_v17 = vrot.slane %v1041_v7, %v8698_v44 }
 0x345   : > { %v1056_v9 = vcombine.low %v957_v55, %v8721_v8  ;;  %v1057_v10 = vcombine.high %v957_v55, %v8721_v8  ;;  %v1140_v26 = vcombine.low %v8726_v11, %v8729_v12  ;;  %v1156_v27 = vcombine.low %v8732_v13, %v8735_v15 }
 0x346   : > { %v1141_v36 = vcombine.high %v8726_v11, %v8729_v12  ;;  %v1157_v37 = vcombine.high %v8732_v13, %v8735_v15 }
 0x347   : > { %v1064_v18 = vrot.slane %v1056_v9, %v8698_v44  ;;  %v1071_v19 = vrot.slane %v1057_v10, %v8698_v44  ;;  %v1148_v46 = vrot.slane %v1140_v26, %v8706_v50  ;;  %v1164_v48 = vrot.slane %v1156_v27, %v8706_v50 }
 0x348   : > { %v811_v20 = vpop.permute.xlu1 %810 }
 0x349   : > { %v1072_v21 = vcombine.low %v1048_v16, %v1064_v18  ;;  %v1073_v22 = vcombine.high %v1048_v16, %v1064_v18  ;;  %v1088_v23 = vcombine.low %v1055_v17, %v1071_v19  ;;  %v1089_v24 = vcombine.high %v1055_v17, %v1071_v19 }
 0x34a   : > { %v816_v32 = vcombine.low %v8671_v14, %v811_v20  ;;  %v817_v34 = vcombine.high %v8671_v14, %v811_v20  ;;  %v1172_v2 = vcombine.low %v1148_v46, %v1164_v48  ;;  %v1173_v5 = vcombine.high %v1148_v46, %v1164_v48 }
 0x34b   : > { %v1080_v28 = vrot.slane %v1072_v21, %v8706_v50  ;;  %v1087_v29 = vrot.slane %v1073_v22, %v8706_v50  ;;  %v1096_v30 = vrot.slane %v1088_v23, %v8706_v50  ;;  %v1103_v31 = vrot.slane %v1089_v24, %v8706_v50 }
 0x34c   : > { %v814_v35 = vpop.permute.xlu1 %813  ;;  %v824_v53 = vrot.slane %v816_v32, %v8698_v44  ;;  %v831_v54 = vrot.slane %v817_v34, %v8698_v44  ;;  %v1155_v22 = vrot.slane %v1141_v36, %v8706_v50  ;;  %v1171_v23 = vrot.slane %v1157_v37, %v8706_v50 }
 0x34d   : > { %v1176_v38 = vcombine.low %v1080_v28, %v1087_v29  ;;  %v7170_v39 = vcombine.high %v1080_v28, %v1087_v29  ;;  %v1192_v40 = vcombine.low %v1096_v30, %v1103_v31  ;;  %v7171_v42 = vcombine.high %v1096_v30, %v1103_v31 }
 0x34e   : > { %v832_v43 = vcombine.low %v8693_v33, %v814_v35  ;;  %v833_v45 = vcombine.high %v8693_v33, %v814_v35  ;;  %v1174_v36 = vcombine.low %v1155_v22, %v1171_v23  ;;  %v1175_v37 = vcombine.high %v1155_v22, %v1171_v23 }
 0x34f   : > { %v1183_v14 = vrot.slane %v1176_v38, %v8698_v44  ;;  %v1191_v49 = vrot.slane %v7170_v39, %v8698_v44  ;;  %v1199_v51 = vrot.slane %v1192_v40, %v8698_v44  ;;  %v1207_v52 = vrot.slane %v7171_v42, %v8698_v44 }
 0x350   : > { %v840_v55 = vrot.slane %v832_v43, %v8698_v44  ;;  %v847_v33 = vrot.slane %v833_v45, %v8698_v44 }
 0x351   : > { %v1208_v56 = vcombine.low %v1183_v14, %v1191_v49  ;;  %v1224_v57 = vcombine.low %v1199_v51, %v1207_v52  ;;  %v1209_v58 = vcombine.high %v1183_v14, %v1191_v49  ;;  %v1225_v59 = vcombine.high %v1199_v51, %v1207_v52 }
 0x352   : > { %v848_v60 = vcombine.low %v824_v53, %v840_v55  ;;  %v849_v61 = vcombine.high %v824_v53, %v840_v55  ;;  %v864_v62 = vcombine.low %v831_v54, %v847_v33  ;;  %v865_v63 = vcombine.high %v831_v54, %v847_v33 }
 0x353   : > { %v1216_v3 = vrot.slane %v1208_v56, %v8706_v50  ;;  %v1232_v4 = vrot.slane %v1224_v57, %v8706_v50  ;;  %v1223_v13 = vrot.slane %v1209_v58, %v8706_v50  ;;  %v1239_v15 = vrot.slane %v1225_v59, %v8706_v50 }
 0x354   : > { %v856_v6 = vrot.slane %v848_v60, %v8706_v50  ;;  %v863_v7 = vrot.slane %v849_v61, %v8706_v50  ;;  %v872_v9 = vrot.slane %v864_v62, %v8706_v50  ;;  %v879_v10 = vrot.slane %v865_v63, %v8706_v50 }
 0x355   : > { %v1240_v11 = vcombine.low %v1216_v3, %v1232_v4  ;;  %v1241_v12 = vcombine.high %v1216_v3, %v1232_v4  ;;  %v1242_v34 = vcombine.low %v1223_v13, %v1239_v15  ;;  %v1243_v35 = vcombine.high %v1223_v13, %v1239_v15 }
 0x356   : > { %v884_v16 = vcombine.low %v856_v6, %v863_v7  ;;  %v7166_v17 = vcombine.high %v856_v6, %v863_v7  ;;  %v900_v18 = vcombine.low %v872_v9, %v879_v10  ;;  %v7167_v19 = vcombine.high %v872_v9, %v879_v10 }
 0x357   : > { %v1544_v20 = vpack.c.bf16 %v1240_v11, %v1172_v2  ;;  %v1545_v21 = vpack.c.bf16 %v1241_v12, %v1173_v5  ;;  %v1546_v46 = vpack.c.bf16 %v1242_v34, %v1174_v36  ;;  %v1547_v48 = vpack.c.bf16 %v1243_v35, %v1175_v37 }
 0x358   : > { %v891_v24 = vrot.slane %v884_v16, %v8698_v44  ;;  %v899_v26 = vrot.slane %v7166_v17, %v8698_v44  ;;  %v907_v27 = vrot.slane %v900_v18, %v8698_v44  ;;  %v915_v28 = vrot.slane %v7167_v19, %v8698_v44  ;;  %v1245_v18 = vpop.permute.xlu1 %1244 }
 0x359   : > { %v1553_v29 = vsel %vm1548_vm4, %v1544_v20, 0  ;;  %v1599_v30 = vsel %vm1548_vm4, %v1545_v21, 0  ;;  %v1645_v53 = vsel %vm1548_vm4, %v1546_v46, 0  ;;  %v1691_v54 = vsel %vm1548_vm4, %v1547_v48, 0  ;;  %v1247_v20 = vpop.permute.xlu0 %1246 }
 0x35a   : > { %v916_v31 = vcombine.low %v891_v24, %v899_v26  ;;  %v932_v32 = vcombine.low %v907_v27, %v915_v28  ;;  %7425 = vmatpush3.bf16.xpose.msra.mxu1 %v1553_v29  ;;  %7431 = vmatpush3.bf16.xpose.msra.mxu0 %v1599_v30  ;;  %v917_v38 = vcombine.high %v891_v24, %v899_v26 }
 0x35b   : > { %7436 = vmatprep.subr.bf16.mxu1 %v8380_v0  ;;  %v933_v39 = vcombine.high %v907_v27, %v915_v28  ;;  %7442 = vmatprep.subr.bf16.mxu0 %v8380_v0 }
 0x35c   : > { %v924_v40 = vrot.slane %v916_v31, %v8706_v50  ;;  %v940_v42 = vrot.slane %v932_v32, %v8706_v50  ;;  %v931_v51 = vrot.slane %v917_v38, %v8706_v50 }
 0x35d   : > { %v947_v52 = vrot.slane %v933_v39, %v8706_v50 }
 0x35e   : > { %v948_v43 = vcombine.low %v924_v40, %v940_v42  ;;  %v949_v45 = vcombine.high %v924_v40, %v940_v42 }
 0x35f   : > { %v950_v55 = vcombine.low %v931_v51, %v947_v52  ;;  %v951_v33 = vcombine.high %v931_v51, %v947_v52 }
 0x360   : > { %v1540_v14 = vpack.c.bf16 %v948_v43, %v948_v43  ;;  %v1541_v49 = vpack.c.bf16 %v949_v45, %v949_v45 }
 0x361   : > { %v1542_v56 = vpack.c.bf16 %v950_v55, %v950_v55  ;;  %v1543_v57 = vpack.c.bf16 %v951_v33, %v951_v33 }
 0x362   : > { %7427 = vmatmul.mubr.msk.bf16.vlgmr.msra.gmra.mxu1 %vm1548_vm4, %v1540_v14  ;;  %7433 = vmatmul.mubr.msk.bf16.vlgmr.msra.gmra.mxu0 %vm1548_vm4, %v1541_v49 }
 0x363   : > { %7437 = vmatpush3.bf16.xpose.msra.mxu1 %v1645_v53  ;;  %7443 = vmatpush3.bf16.xpose.msra.mxu0 %v1691_v54 }
 0x364   : > { %7438 = vmatprep.mubr.msk.bf16.mxu1 %vm8381_vm1, %v8380_v0  ;;  %7444 = vmatprep.mubr.msk.bf16.mxu0 %vm8381_vm1, %v8380_v0 }
 0x365   : > { %7448 = vmatprep.subr.bf16.mxu1 %v8380_v0  ;;  %7454 = vmatprep.subr.bf16.mxu0 %v8380_v0 }
 0x36a   : > { %7439 = vmatmul.mubr.msk.bf16.vlgmr.msra.gmra.mxu1 %vm1548_vm4, %v1542_v56  ;;  %7445 = vmatmul.mubr.msk.bf16.vlgmr.msra.gmra.mxu0 %vm1548_vm4, %v1543_v57 }
 0x36b   : > { %7450 = vmatprep.mubr.msk.bf16.mxu1 %vm8381_vm1, %v8380_v0  ;;  %7456 = vmatprep.mubr.msk.bf16.mxu0 %vm8381_vm1, %v8380_v0 }
 0x3a7   : > { %v1249_v19 = vpop.permute.xlu1 %1248 }
 0x3af   : > { %v1251_v21 = vpop.permute.xlu1 %1250 }
 0x422   : > { %v1589_v58 = vpop.f32.mrf.mxu1  ;;  %v1635_v59 = vpop.f32.mrf.mxu0 }
 0x423   : > { %v1734_v60 = vsel %vm1733_vm5, %v1589_v58, -inf  ;;  %v1737_v61 = vsel %vm1733_vm5, %v1635_v59, -inf }
 0x424   : > { %1735 = vmax.xlane.f32.xlu1 %v1734_v60  ;;  %v7428_v62 = vpop.f32.mrf.mxu1  ;;  %1738 = vmax.xlane.f32.xlu0 %v1737_v61  ;;  %v7434_v63 = vpop.f32.mrf.mxu0 }
 0x426   : > { %v1592_v2 = vpop.f32.mrf.mxu1  ;;  %v1638_v3 = vpop.f32.mrf.mxu0 }
 0x428   : > { %v7429_v4 = vpop.f32.mrf.mxu1  ;;  %v7435_v5 = vpop.f32.mrf.mxu0 }
 0x42a   : > { %v1681_v6 = vpop.f32.mrf.mxu1  ;;  %v1727_v7 = vpop.f32.mrf.mxu0 }
 0x42b   : > { %v1740_v9 = vsel %vm1733_vm5, %v1681_v6, -inf  ;;  %v1743_v15 = vsel %vm1733_vm5, %v1727_v7, -inf }
 0x42c   : > { %1741 = vmax.xlane.f32.xlu1 %v1740_v9  ;;  %v7440_v10 = vpop.f32.mrf.mxu1  ;;  %v7446_v11 = vpop.f32.mrf.mxu0 }
 0x42e   : > { %v1684_v12 = vpop.f32.mrf.mxu1  ;;  %v1730_v13 = vpop.f32.mrf.mxu0 }
 0x430   : > { %v7441_v16 = vpop.f32.mrf.mxu1  ;;  %1744 = vmax.xlane.f32.xlu1 %v1743_v15  ;;  %v7447_v17 = vpop.f32.mrf.mxu0 }
 0x43a   : > { %1254 = vrot.lane.b32.xlu0 %v8717_v1, %s8385_s22 }
 0x441   : > { %1252 = vrot.lane.b32.xlu1 %v8695_v41, %s8385_s22 }
 0x4ad   : > { %v1736_v22 = vpop.xlane.xlu1 %1735  ;;  %v1739_v23 = vpop.xlane.xlu0 %1738 }
 0x4ae   : > { %v1746_v24 = vsub.f32 %v1589_v58, %v1736_v22  ;;  %v1747_v26 = vsub.f32 %v1635_v59, %v1739_v23 }
 0x4b0   : > { %v1750_v27 = vmul.f32 1.442695, %v1746_v24  ;;  %v1752_v28 = vmul.f32 1.442695, %v1747_v26 }
 0x4b1   : > { %v1255_v42 = vpop.permute.xlu0 %1254 }
 0x4b2   : > { %7924 = vpow2.f32 %v1750_v27  ;;  %v1336_v14 = vcombine.low %v1247_v20, %v1255_v42  ;;  %v1337_v49 = vcombine.high %v1247_v20, %v1255_v42 }
 0x4b3   : > { %7926 = vpow2.f32 %v1752_v28 }
 0x4b4   : > { %v1344_v60 = vrot.slane %v1336_v14, %v8698_v44  ;;  %v1351_v61 = vrot.slane %v1337_v49, %v8698_v44 }
 0x4b5   : > { %v1742_v31 = vpop.xlane.xlu1 %1741 }
 0x4b6   : > { %v1748_v34 = vsub.f32 %v1681_v6, %v1742_v31 }
 0x4b8   : > { %v1754_v36 = vmul.f32 1.442695, %v1748_v34 }
 0x4b9   : > { %v1745_v32 = vpop.xlane.xlu1 %1744 }
 0x4ba   : > { %v1749_v35 = vsub.f32 %v1727_v7, %v1745_v32  ;;  %7928 = vpow2.f32 %v1754_v36 }
 0x4bc   : > { %v1756_v37 = vmul.f32 1.442695, %v1749_v35 }
 0x4be   : > { %7930 = vpow2.f32 %v1756_v37 }
 0x4bf   : > { %v8813_v29 = vpop.eup %7924 }
 0x4c0   : > { %v8815_v30 = vpop.eup %7926  ;;  %v1758_v1 = vsel %vm1733_vm5, %v8813_v29, 0.0 }
 0x4c1   : > { %v1761_v41 = vsel %vm1733_vm5, %v8815_v30, 0.0  ;;  %1759 = vadd.xlane.f32.xlu1 %v1758_v1 }
 0x4c2   : > { %1762 = vadd.xlane.f32.xlu0 %v1761_v41 }
 0x4c7   : > { %v8825_v38 = vpop.eup %7928 }
 0x4c8   : > { %v1764_v40 = vsel %vm1733_vm5, %v8825_v38, 0.0 }
 0x4cb   : > { %v8827_v39 = vpop.eup %7930 }
 0x4d2   : > { %1256 = vrot.lane.b32.xlu1 %v8702_v47, %s8385_s22  ;;  %v1767_v47 = vsel %vm1733_vm5, %v8827_v39, 0.0 }
 0x4d8   : > { %1258 = vrot.lane.b32.xlu0 %v8721_v8, %s8385_s22  ;;  %v1253_v8 = vpop.permute.xlu1 %1252 }
 0x4d9   : > { %v1268_v46 = vcombine.low %v1245_v18, %v1253_v8  ;;  %v1269_v48 = vcombine.high %v1245_v18, %v1253_v8 }
 0x4db   : > { %v1276_v55 = vrot.slane %v1268_v46, %v8698_v44  ;;  %v1283_v57 = vrot.slane %v1269_v48, %v8698_v44 }
 0x4f6   : > { %1765 = vadd.xlane.f32.xlu1 %v1764_v40 }
 0x4f7   : > { %1768 = vadd.xlane.f32.xlu0 %v1767_v47 }
 0x54a   : > { %v1760_v43 = vpop.xlane.xlu1 %1759 }
 0x54b   : > { %v1763_v45 = vpop.xlane.xlu0 %1762  ;;  %7932 = vrcp.f32 %v1760_v43 }
 0x54c   : > { %7934 = vrcp.f32 %v1763_v45 }
 0x54e   : > { %v1257_v51 = vpop.permute.xlu1 %1256 }
 0x54f   : > { %v1259_v52 = vpop.permute.xlu0 %1258  ;;  %v1284_v53 = vcombine.low %v1249_v19, %v1257_v51  ;;  %v1285_v54 = vcombine.high %v1249_v19, %v1257_v51 }
 0x550   : > { %v1352_v33 = vcombine.low %v1251_v21, %v1259_v52  ;;  %v1353_v56 = vcombine.high %v1251_v21, %v1259_v52 }
 0x551   : > { %v1292_v58 = vrot.slane %v1284_v53, %v8698_v44  ;;  %v1299_v59 = vrot.slane %v1285_v54, %v8698_v44 }
 0x552   : > { %v1360_v62 = vrot.slane %v1352_v33, %v8698_v44  ;;  %v1367_v63 = vrot.slane %v1353_v56, %v8698_v44 }
 0x553   : > { %v1300_v2 = vcombine.low %v1276_v55, %v1292_v58  ;;  %v1301_v3 = vcombine.high %v1276_v55, %v1292_v58  ;;  %v1316_v4 = vcombine.low %v1283_v57, %v1299_v59  ;;  %v1317_v5 = vcombine.high %v1283_v57, %v1299_v59 }
 0x554   : > { %v1368_v6 = vcombine.low %v1344_v60, %v1360_v62  ;;  %v1369_v7 = vcombine.high %v1344_v60, %v1360_v62  ;;  %v1384_v9 = vcombine.low %v1351_v61, %v1367_v63  ;;  %v1385_v10 = vcombine.high %v1351_v61, %v1367_v63 }
 0x555   : > { %v1308_v11 = vrot.slane %v1300_v2, %v8706_v50  ;;  %v1315_v12 = vrot.slane %v1301_v3, %v8706_v50  ;;  %v1324_v13 = vrot.slane %v1316_v4, %v8706_v50  ;;  %v1331_v15 = vrot.slane %v1317_v5, %v8706_v50 }
 0x556   : > { %v1376_v16 = vrot.slane %v1368_v6, %v8706_v50  ;;  %v1383_v17 = vrot.slane %v1369_v7, %v8706_v50  ;;  %v1392_v18 = vrot.slane %v1384_v9, %v8706_v50  ;;  %v1399_v19 = vrot.slane %v1385_v10, %v8706_v50 }
 0x557   : > { %v1404_v20 = vcombine.low %v1308_v11, %v1315_v12  ;;  %v7172_v21 = vcombine.high %v1308_v11, %v1315_v12  ;;  %v1420_v22 = vcombine.low %v1324_v13, %v1331_v15  ;;  %v7173_v23 = vcombine.high %v1324_v13, %v1331_v15 }
 0x558   : > { %v1472_v24 = vcombine.low %v1376_v16, %v1383_v17  ;;  %v7174_v26 = vcombine.high %v1376_v16, %v1383_v17  ;;  %v1488_v27 = vcombine.low %v1392_v18, %v1399_v19  ;;  %v7175_v28 = vcombine.high %v1392_v18, %v1399_v19  ;;  %v7933_v46 = vpop.eup %7932  ;;  %v7902_v19 = vld [vmem:[#allocation8 + $0x18] sm:$0xff]  }
 0x559   : > { %v1411_v1 = vrot.slane %v1404_v20, %v8698_v44  ;;  %v1419_v41 = vrot.slane %v7172_v21, %v8698_v44  ;;  %v1427_v31 = vrot.slane %v1420_v22, %v8698_v44  ;;  %v1435_v32 = vrot.slane %v7173_v23, %v8698_v44  ;;  %v7935_v49 = vpop.eup %7934  ;;  %v7903_v21 = vld [vmem:[#allocation8 + $0x10] sm:$0xff]  }
 0x55a   : > { %v1479_v34 = vrot.slane %v1472_v24, %v8698_v44  ;;  %v1487_v35 = vrot.slane %v7174_v26, %v8698_v44  ;;  %v1495_v36 = vrot.slane %v1488_v27, %v8698_v44  ;;  %v1503_v37 = vrot.slane %v7175_v28, %v8698_v44 }
 0x55b   : > { %v1436_v40 = vcombine.low %v1411_v1, %v1419_v41  ;;  %v1452_v47 = vcombine.low %v1427_v31, %v1435_v32  ;;  %v1437_v43 = vcombine.high %v1411_v1, %v1419_v41  ;;  %v1453_v45 = vcombine.high %v1427_v31, %v1435_v32 }
 0x55c   : > { %v1504_v8 = vcombine.low %v1479_v34, %v1487_v35  ;;  %v1520_v42 = vcombine.low %v1495_v36, %v1503_v37  ;;  %v1505_v56 = vcombine.high %v1479_v34, %v1487_v35  ;;  %v1521_v57 = vcombine.high %v1495_v36, %v1503_v37 }
 0x55d   : > { %v1444_v48 = vrot.slane %v1436_v40, %v8706_v50  ;;  %v1460_v14 = vrot.slane %v1452_v47, %v8706_v50  ;;  %v1451_v53 = vrot.slane %v1437_v43, %v8706_v50  ;;  %v1467_v54 = vrot.slane %v1453_v45, %v8706_v50 }
 0x55e   : > { %v1512_v51 = vrot.slane %v1504_v8, %v8706_v50  ;;  %v1528_v52 = vrot.slane %v1520_v42, %v8706_v50  ;;  %v1774_v60 = vmul.f32 %v7933_v46, %v8813_v29  ;;  %v1775_v61 = vmul.f32 %v7935_v49, %v8815_v30 }
 0x55f   : > { %v1468_v55 = vcombine.low %v1444_v48, %v1460_v14  ;;  %v1469_v33 = vcombine.high %v1444_v48, %v1460_v14  ;;  %v1519_v62 = vrot.slane %v1505_v56, %v8706_v50  ;;  %v1535_v63 = vrot.slane %v1521_v57, %v8706_v50 }
 0x560   : > { %v1536_v58 = vcombine.low %v1512_v51, %v1528_v52  ;;  %v1537_v59 = vcombine.high %v1512_v51, %v1528_v52  ;;  %v1470_v4 = vcombine.low %v1451_v53, %v1467_v54  ;;  %v1471_v5 = vcombine.high %v1451_v53, %v1467_v54 }
 0x561   : > { %v1538_v6 = vcombine.low %v1519_v62, %v1535_v63  ;;  %v1539_v7 = vcombine.high %v1519_v62, %v1535_v63  ;;  %v1778_v9 = vpack.c.bf16 %v1774_v60, %v1774_v60  ;;  %v1779_v10 = vpack.c.bf16 %v1775_v61, %v1775_v61 }
 0x562   : > { %v1782_v2 = vpack.c.bf16 %v1536_v58, %v1468_v55  ;;  %v1783_v3 = vpack.c.bf16 %v1537_v59, %v1469_v33  ;;  %v7904_v33 = vld [vmem:[#allocation14 + $0x8] sm:$0xff]  }
 0x563   : > { %v1784_v29 = vpack.c.bf16 %v1538_v6, %v1470_v4  ;;  %v1785_v30 = vpack.c.bf16 %v1539_v7, %v1471_v5  ;;  %v7905_v4 = vld [vmem:[#allocation14] sm:$0xff]  }
 0x564   : > { %7449 = vmatpush3.bf16.msra.mxu1 %v1782_v2  ;;  %7455 = vmatpush3.bf16.msra.mxu0 %v1783_v3 }
 0x565   : > { %7460 = vmatprep.subr.bf16.mxu1 %v8380_v0  ;;  %7466 = vmatprep.subr.bf16.mxu0 %v8380_v0 }
 0x567   : > { %7451 = vmatmul.mubr.msk.bf16.vlgmr.msra.gmra.mxu1 %vm1733_vm5, %v1778_v9  ;;  %7457 = vmatmul.mubr.msk.bf16.vlgmr.msra.gmra.mxu0 %vm1733_vm5, %v1779_v10 }
 0x568   : > { %7461 = vmatpush3.bf16.msra.mxu1 %v1784_v29  ;;  %7467 = vmatpush3.bf16.msra.mxu0 %v1785_v30 }
 0x569   : > { %7462 = vmatprep.mubr.msk.bf16.mxu1 %vm8381_vm1, %v8380_v0  ;;  %7468 = vmatprep.mubr.msk.bf16.mxu0 %vm8381_vm1, %v8380_v0 }
 0x56a   : > { %7480 = vmatprep.subr.bf16.mxu0 %v8380_v0  ;;  %7472 = vmatprep.subr.bf16.mxu1 %v8380_v0 }
 0x57f   : > { %v1766_v11 = vpop.xlane.xlu1 %1765 }
 0x580   : > { %v1769_v12 = vpop.xlane.xlu0 %1768  ;;  %7936 = vrcp.f32 %v1766_v11 }
 0x581   : > { %7938 = vrcp.f32 %v1769_v12 }
 0x58d   : > { %v7937_v13 = vpop.eup %7936 }
 0x58e   : > { %v7939_v15 = vpop.eup %7938  ;;  %v1776_v16 = vmul.f32 %v7937_v13, %v8825_v38 }
 0x58f   : > { %v1777_v17 = vmul.f32 %v7939_v15, %v8827_v39 }
 0x590   : > { %v1780_v18 = vpack.c.bf16 %v1776_v16, %v1776_v16 }
 0x591   : > { %v1781_v20 = vpack.c.bf16 %v1777_v17, %v1777_v17 }
 0x592   : > { %7463 = vmatmul.mubr.msk.bf16.vlgmr.msra.gmra.mxu1 %vm1733_vm5, %v1780_v18  ;;  %v7190_v18 = vld [vmem:[#allocation10 + $0x1] ss:$0 sm:$0xff] }
 0x593   : > { %7469 = vmatmul.mubr.msk.bf16.vlgmr.msra.gmra.mxu0 %vm1733_vm5, %v1781_v20  ;;  %7476 = vmatprep.mubr.msk.bf16.mxu1 %vm8381_vm1, %v8380_v0 }
 0x594   : > { %7481 = vmatpush3.bf16.msra.mxu0 %v7902_v19  ;;  %7484 = vmatprep.mubr.msk.bf16.mxu0 %vm8381_vm1, %v8380_v0 }
 0x595   : > { %7482 = vmatprep.subr.bf16.mxu0 %v8380_v0  ;;  %7473 = vmatpush3.bf16.msra.mxu1 %v7904_v33 }
 0x596   : > { %7474 = vmatprep.subr.bf16.mxu1 %v8380_v0 }
 0x598   : > { %7483 = vmatpush3.bf16.msra.mxu0 %v7903_v21 }
 0x599   : > { %7496 = vmatprep.subr.bf16.mxu0 %v8380_v0  ;;  %7475 = vmatpush3.bf16.msra.mxu1 %v7905_v4 }
 0x59a   : > { %7488 = vmatprep.subr.bf16.mxu1 %v8380_v0 }
 0x59b   : > { %7485 = vmatmul.mubr.msk.bf16.vlgmr.msra.gmra.mxu0 %vm694_vm2, %v8675_v25 }
 0x59c   : > { %7498 = vmatprep.mubr.msk.bf16.mxu0 %vm8381_vm1, %v8380_v0 }
 0x627   : > { %v1823_v38 = vpop.f32.mrf.mxu1  ;;  %v1866_v39 = vpop.f32.mrf.mxu0 }
 0x629   : > { %v7452_v22 = vpop.f32.mrf.mxu1  ;;  %v7458_v23 = vpop.f32.mrf.mxu0 }
 0x62b   : > { %v1826_v24 = vpop.f32.mrf.mxu1  ;;  %v1869_v26 = vpop.f32.mrf.mxu0 }
 0x62d   : > { %v7453_v27 = vpop.f32.mrf.mxu1  ;;  %v7459_v28 = vpop.f32.mrf.mxu0 }
 0x62e   : > { %v7906_v27 = vld [vmem:[#allocation11 + $0x18] sm:$0xff]  }
 0x652   : > { %v1909_v1 = vpop.f32.mrf.mxu1 }
 0x653   : > { %v1958_v41 = vcombine.low %v1823_v38, %v1909_v1  ;;  %v1959_v31 = vcombine.high %v1823_v38, %v1909_v1  ;;  %v1952_v32 = vpop.f32.mrf.mxu0  ;;  %v7907_v1 = vld [vmem:[#allocation11 + $0x10] sm:$0xff]  }
 0x654   : > { %v1974_v34 = vcombine.low %v1866_v39, %v1952_v32  ;;  %v1975_v35 = vcombine.high %v1866_v39, %v1952_v32  ;;  %v7464_v36 = vpop.f32.mrf.mxu1 }
 0x655   : > { %v1966_v25 = vrot.slane %v1958_v41, %v8698_v44  ;;  %v1973_v37 = vrot.slane %v1959_v31, %v8698_v44  ;;  %v7470_v40 = vpop.f32.mrf.mxu0  ;;  %v7186_v41 = vld [vmem:[#allocation16] ss:$0 sm:$0xff] }
 0x656   : > { %v1982_v47 = vrot.slane %v1974_v34, %v8698_v44  ;;  %v1989_v8 = vrot.slane %v1975_v35, %v8698_v44  ;;  %v1912_v42 = vpop.f32.mrf.mxu1 }
 0x657   : > { %v1955_v43 = vpop.f32.mrf.mxu0 }
 0x658   : > { %v1990_v45 = vcombine.low %v1966_v25, %v1982_v47  ;;  %v1991_v46 = vcombine.high %v1966_v25, %v1982_v47  ;;  %v2006_v48 = vcombine.low %v1973_v37, %v1989_v8  ;;  %v2007_v14 = vcombine.high %v1973_v37, %v1989_v8  ;;  %v7465_v49 = vpop.f32.mrf.mxu1  ;;  %v7194_v37 = vld [vmem:[#allocation13 + $0x1] ss:$0 sm:$0xff] }
 0x659   : > { %v7471_v51 = vpop.f32.mrf.mxu0 }
 0x65a   : > { %v1998_v52 = vrot.slane %v1990_v45, %v8706_v50  ;;  %v2005_v53 = vrot.slane %v1991_v46, %v8706_v50  ;;  %v2014_v54 = vrot.slane %v2006_v48, %v8706_v50  ;;  %v2021_v55 = vrot.slane %v2007_v14, %v8706_v50 }
 0x65b   : > { %v2236_v56 = vpop.f32.mrf.mxu0 }
 0x65c   : > { %v2026_v57 = vcombine.low %v1998_v52, %v2005_v53  ;;  %v7184_v58 = vcombine.high %v1998_v52, %v2005_v53  ;;  %v2042_v59 = vcombine.low %v2014_v54, %v2021_v55  ;;  %v7185_v60 = vcombine.high %v2014_v54, %v2021_v55 }
 0x65d   : > { %v7486_v61 = vpop.f32.mrf.mxu0  ;;  %v8916_v21 = vadd.f32 %v7190_v18, %v2236_v56 }
 0x65e   : > { %v2033_v62 = vrot.slane %v2026_v57, %v8698_v44  ;;  %v2041_v63 = vrot.slane %v7184_v58, %v8698_v44  ;;  %v2049_v2 = vrot.slane %v2042_v59, %v8698_v44  ;;  %v2057_v3 = vrot.slane %v7185_v60, %v8698_v44 }
 0x65f   : > { %v2239_v5 = vpop.f32.mrf.mxu0 }
 0x660   : > { %v2059_v6 = vcombine.high %v2033_v62, %v2041_v63  ;;  %v2075_v7 = vcombine.high %v2049_v2, %v2057_v3  ;;  %v2058_v9 = vcombine.low %v2033_v62, %v2041_v63  ;;  %v2074_v29 = vcombine.low %v2049_v2, %v2057_v3 }
 0x661   : > { %v7487_v10 = vpop.f32.mrf.mxu0  ;;  %v8911_v20 = vadd.f32 %v7190_v18, %v2239_v5 }
 0x662   : > { %v2073_v30 = vrot.slane %v2059_v6, %v8706_v50  ;;  %v2089_v11 = vrot.slane %v2075_v7, %v8706_v50  ;;  %v2066_v12 = vrot.slane %v2058_v9, %v8706_v50  ;;  %v2082_v13 = vrot.slane %v2074_v29, %v8706_v50 }
 0x664   : > { %v2092_v15 = vcombine.low %v2073_v30, %v2089_v11  ;;  %v2091_v16 = vcombine.high %v2066_v12, %v2082_v13  ;;  %v2090_v17 = vcombine.low %v2066_v12, %v2082_v13  ;;  %v2093_v19 = vcombine.high %v2073_v30, %v2089_v11 }
 0x666   : > { %2099 = vrot.lane.b32.xlu1 %v2092_v15, %s8388_s27  ;;  %2095 = vrot.lane.b32.xlu0 %v2091_v16, %s8389_s5 }
 0x66a   : > { %2103 = vrot.lane.b32.xlu1 %v2093_v19, %s8390_s14  ;;  %2316 = vrot.lane.b32.xlu0 %v8911_v20, %s8382_s19 }
 0x66e   : > { %2314 = vrot.lane.b32.xlu1 %v8916_v21, %s8382_s19 }
 0x6d8   : > { %v2100_v38 = vpop.permute.xlu1 %2099  ;;  %v2096_v39 = vpop.permute.xlu0 %2095 }
 0x6d9   : > { %v2106_v22 = vsel %vm1548_vm4, %v2090_v17, %v2096_v39 }
 0x6da   : > { %v2107_v24 = vsel %vm1733_vm5, %v2106_v22, %v2100_v38 }
 0x6dc   : > { %v2104_v23 = vpop.permute.xlu1 %2103  ;;  %v2317_v45 = vpop.permute.xlu0 %2316 }
 0x6dd   : > { %v2109_v26 = vsel %vm2108_vm6, %v2107_v24, %v2104_v23 }
 0x6de   : > { %v2110_v28 = vpack.c.bf16 %v2109_v26, %v2109_v26 }
 0x6e0   : > { %7477 = vmatmul.mubr.msk.bf16.vlgmr.msra.gmra.mxu1 %vm694_vm2, %v2110_v28  ;;  %v2315_v46 = vpop.permute.xlu1 %2314 }
 0x6e1   : > { %7489 = vmatpush3.bf16.msra.mxu1 %v7906_v27  ;;  %7492 = vmatprep.mubr.msk.bf16.mxu1 %vm8381_vm1, %v8380_v0 }
 0x6e2   : > { %7490 = vmatprep.subr.bf16.mxu1 %v8380_v0 }
 0x6e5   : > { %7491 = vmatpush3.bf16.msra.mxu1 %v7907_v1 }
 0x6e6   : > { %7502 = vmatprep.subr.bf16.mxu1 %v8380_v0 }
 0x7a0   : > { %v2171_v31 = vpop.f32.mrf.mxu1 }
 0x7a1   : > { %v2172_v32 = vadd.f32 %v7186_v41, %v2171_v31 }
 0x7a2   : > { %v7478_v34 = vpop.f32.mrf.mxu1 }
 0x7a3   : > { %v2243_v35 = vpack.c.bf16 %v2172_v32, %v2172_v32 }
 0x7a4   : > { %v2174_v36 = vpop.f32.mrf.mxu1 }
 0x7a5   : > { %7493 = vmatmul.mubr.msk.bf16.vlgmr.msra.gmra.mxu1 %vm694_vm2, %v2243_v35 }
 0x7a6   : > { %v7479_v25 = vpop.f32.mrf.mxu1  ;;  %7504 = vmatprep.mubr.msk.bf16.mxu1 %vm8381_vm1, %v8380_v0 }
 0x865   : > { %v2306_v40 = vpop.f32.mrf.mxu1 }
 0x866   : > { %v8931_v47 = vadd.f32 %v7194_v37, %v2306_v40 }
 0x867   : > { %v7494_v8 = vpop.f32.mrf.mxu1 }
 0x868   : > { %2608 = vrot.lane.b32.xlu1 %v8931_v47, %s8383_s30  ;;  %2605 = vrot.lane.b32.xlu0 %v8931_v47, %s8382_s19 }
 0x869   : > { %v2309_v42 = vpop.f32.mrf.mxu1 }
 0x86b   : > { %v7495_v43 = vpop.f32.mrf.mxu1 }
 0x86c   : > { %2320 = vrot.lane.b32.xlu1 %v8916_v21, %s8383_s30  ;;  %2611 = vrot.lane.b32.xlu0 %v8931_v47, %s8384_s24 }
 0x870   : > { %2326 = vrot.lane.b32.xlu1 %v8916_v21, %s8384_s24  ;;  %2322 = vrot.lane.b32.xlu0 %v8911_v20, %s8383_s30 }
 0x874   : > { %2328 = vrot.lane.b32.xlu0 %v8911_v20, %s8384_s24 }
 0x8da   : > { %v8947_v48 = vpop.permute.xlu1 %2608  ;;  %v8949_v14 = vpop.permute.xlu0 %2605 }
 0x8db   : > { %v2614_v49 = vcombine.low %v8931_v47, %v8947_v48  ;;  %v2615_v51 = vcombine.high %v8931_v47, %v8947_v48 }
 0x8dd   : > { %v2622_v33 = vrot.slane %v2614_v49, %v8698_v44  ;;  %v2629_v56 = vrot.slane %v2615_v51, %v8698_v44 }
 0x8de   : > { %v2321_v52 = vpop.permute.xlu1 %2320  ;;  %v8955_v53 = vpop.permute.xlu0 %2611 }
 0x8df   : > { %v2630_v54 = vcombine.low %v8949_v14, %v8955_v53  ;;  %v2631_v55 = vcombine.high %v8949_v14, %v8955_v53  ;;  %v2332_v59 = vcombine.low %v8916_v21, %v2321_v52  ;;  %v2333_v60 = vcombine.high %v8916_v21, %v2321_v52 }
 0x8e1   : > { %v2638_v57 = vrot.slane %v2630_v54, %v8698_v44  ;;  %v2645_v58 = vrot.slane %v2631_v55, %v8698_v44  ;;  %v2340_v30 = vrot.slane %v2332_v59, %v8698_v44  ;;  %v2347_v11 = vrot.slane %v2333_v60, %v8698_v44 }
 0x8e2   : > { %v2327_v61 = vpop.permute.xlu1 %2326  ;;  %v2323_v62 = vpop.permute.xlu0 %2322 }
 0x8e3   : > { %v2646_v63 = vcombine.low %v2622_v33, %v2638_v57  ;;  %v2647_v2 = vcombine.high %v2622_v33, %v2638_v57  ;;  %v2662_v3 = vcombine.low %v2629_v56, %v2645_v58  ;;  %v2663_v4 = vcombine.high %v2629_v56, %v2645_v58 }
 0x8e4   : > { %v2348_v5 = vcombine.low %v2315_v46, %v2327_v61  ;;  %v2349_v6 = vcombine.high %v2315_v46, %v2327_v61  ;;  %v2400_v18 = vcombine.low %v8911_v20, %v2323_v62  ;;  %v2401_v19 = vcombine.high %v8911_v20, %v2323_v62 }
 0x8e5   : > { %v2654_v7 = vrot.slane %v2646_v63, %v8706_v50  ;;  %v2661_v9 = vrot.slane %v2647_v2, %v8706_v50  ;;  %v2670_v10 = vrot.slane %v2662_v3, %v8706_v50  ;;  %v2677_v29 = vrot.slane %v2663_v4, %v8706_v50 }
 0x8e6   : > { %v2356_v12 = vrot.slane %v2348_v5, %v8698_v44  ;;  %v2363_v13 = vrot.slane %v2349_v6, %v8698_v44  ;;  %v2329_v15 = vpop.permute.xlu0 %2328  ;;  %v2408_v32 = vrot.slane %v2400_v18, %v8698_v44  ;;  %v2415_v20 = vrot.slane %v2401_v19, %v8698_v44 }
 0x8e7   : > { %v2682_v16 = vcombine.low %v2654_v7, %v2661_v9  ;;  %v7202_v17 = vcombine.high %v2654_v7, %v2661_v9  ;;  %v2698_v23 = vcombine.low %v2670_v10, %v2677_v29  ;;  %v7203_v24 = vcombine.high %v2670_v10, %v2677_v29 }
 0x8e8   : > { %v2364_v21 = vcombine.low %v2340_v30, %v2356_v12  ;;  %v2365_v38 = vcombine.high %v2340_v30, %v2356_v12  ;;  %v2380_v39 = vcombine.low %v2347_v11, %v2363_v13  ;;  %v2381_v22 = vcombine.high %v2347_v11, %v2363_v13 }
 0x8e9   : > { %v2416_v26 = vcombine.low %v2317_v45, %v2329_v15  ;;  %v2417_v27 = vcombine.high %v2317_v45, %v2329_v15  ;;  %v2689_v46 = vrot.slane %v2682_v16, %v8698_v44  ;;  %v2697_v49 = vrot.slane %v7202_v17, %v8698_v44 }
 0x8ea   : > { %v2372_v28 = vrot.slane %v2364_v21, %v8706_v50  ;;  %v2379_v1 = vrot.slane %v2365_v38, %v8706_v50  ;;  %v2388_v41 = vrot.slane %v2380_v39, %v8706_v50  ;;  %v2395_v31 = vrot.slane %v2381_v22, %v8706_v50 }
 0x8eb   : > { %v2424_v34 = vrot.slane %v2416_v26, %v8698_v44  ;;  %v2431_v35 = vrot.slane %v2417_v27, %v8698_v44  ;;  %v2705_v51 = vrot.slane %v2698_v23, %v8698_v44  ;;  %v2713_v52 = vrot.slane %v7203_v24, %v8698_v44 }
 0x8ec   : > { %v2468_v36 = vcombine.low %v2372_v28, %v2379_v1  ;;  %v7198_v25 = vcombine.high %v2372_v28, %v2379_v1  ;;  %v2484_v37 = vcombine.low %v2388_v41, %v2395_v31  ;;  %v7199_v40 = vcombine.high %v2388_v41, %v2395_v31 }
 0x8ed   : > { %v2432_v8 = vcombine.low %v2408_v32, %v2424_v34  ;;  %v2433_v42 = vcombine.high %v2408_v32, %v2424_v34  ;;  %v2448_v43 = vcombine.low %v2415_v20, %v2431_v35  ;;  %v2449_v45 = vcombine.high %v2415_v20, %v2431_v35 }
 0x8ee   : > { %v2475_v57 = vrot.slane %v2468_v36, %v8698_v44  ;;  %v2483_v58 = vrot.slane %v7198_v25, %v8698_v44  ;;  %v2491_v59 = vrot.slane %v2484_v37, %v8698_v44  ;;  %v2499_v60 = vrot.slane %v7199_v40, %v8698_v44 }
 0x8ef   : > { %v2440_v54 = vrot.slane %v2432_v8, %v8706_v50  ;;  %v2447_v55 = vrot.slane %v2433_v42, %v8706_v50  ;;  %v2456_v33 = vrot.slane %v2448_v43, %v8706_v50  ;;  %v2463_v56 = vrot.slane %v2449_v45, %v8706_v50 }
 0x8f0   : > { %v2714_v7 = vcombine.low %v2689_v46, %v2697_v49  ;;  %v2730_v9 = vcombine.low %v2705_v51, %v2713_v52  ;;  %v2500_v10 = vcombine.low %v2475_v57, %v2483_v58  ;;  %v2516_v29 = vcombine.low %v2491_v59, %v2499_v60 }
 0x8f1   : > { %v2536_v61 = vcombine.low %v2440_v54, %v2447_v55  ;;  %v7200_v62 = vcombine.high %v2440_v54, %v2447_v55  ;;  %v2552_v63 = vcombine.low %v2456_v33, %v2463_v56  ;;  %v7201_v2 = vcombine.high %v2456_v33, %v2463_v56 }
 0x8f2   : > { %v2722_v12 = vrot.slane %v2714_v7, %v8706_v50  ;;  %v2738_v13 = vrot.slane %v2730_v9, %v8706_v50  ;;  %v2715_v15 = vcombine.high %v2689_v46, %v2697_v49  ;;  %v2731_v16 = vcombine.high %v2705_v51, %v2713_v52 }
 0x8f3   : > { %v2543_v3 = vrot.slane %v2536_v61, %v8698_v44  ;;  %v2551_v4 = vrot.slane %v7200_v62, %v8698_v44  ;;  %v2559_v5 = vrot.slane %v2552_v63, %v8698_v44  ;;  %v2567_v6 = vrot.slane %v7201_v2, %v8698_v44 }
 0x8f4   : > { %v2746_v19 = vcombine.low %v2722_v12, %v2738_v13  ;;  %v2747_v21 = vcombine.high %v2722_v12, %v2738_v13  ;;  %v2729_v38 = vrot.slane %v2715_v15, %v8706_v50  ;;  %v2745_v39 = vrot.slane %v2731_v16, %v8706_v50 }
 0x8f5   : > { %v2568_v30 = vcombine.low %v2543_v3, %v2551_v4  ;;  %v2584_v11 = vcombine.low %v2559_v5, %v2567_v6  ;;  %v2508_v22 = vrot.slane %v2500_v10, %v8706_v50  ;;  %v2524_v23 = vrot.slane %v2516_v29, %v8706_v50 }
 0x8f6   : > { %v2902_v24 = vpack.c.bf16 %v2746_v19, %v2746_v19  ;;  %v2903_v26 = vpack.c.bf16 %v2747_v21, %v2747_v21  ;;  %v2748_v31 = vcombine.low %v2729_v38, %v2745_v39  ;;  %v2749_v32 = vcombine.high %v2729_v38, %v2745_v39 }
 0x8f7   : > { %v2576_v17 = vrot.slane %v2568_v30, %v8706_v50  ;;  %v2592_v18 = vrot.slane %v2584_v11, %v8706_v50  ;;  %v2532_v20 = vcombine.low %v2508_v22, %v2524_v23  ;;  %v2569_v34 = vcombine.high %v2543_v3, %v2551_v4 }
 0x8f8   : > { %v2910_v1 = vsel %vm1548_vm4, %v2902_v24, 0  ;;  %v2957_v41 = vsel %vm1548_vm4, %v2903_v26, 0  ;;  %v2585_v35 = vcombine.high %v2559_v5, %v2567_v6  ;;  %v2533_v36 = vcombine.high %v2508_v22, %v2524_v23 }
 0x8f9   : > { %v2600_v27 = vcombine.low %v2576_v17, %v2592_v18  ;;  %v2601_v28 = vcombine.high %v2576_v17, %v2592_v18  ;;  %7497 = vmatpush3.bf16.xpose.msra.mxu0 %v2910_v1  ;;  %7503 = vmatpush3.bf16.xpose.msra.mxu1 %v2957_v41  ;;  %v2501_v25 = vcombine.high %v2475_v57, %v2483_v58 }
 0x8fa   : > { %7508 = vmatprep.subr.bf16.mxu0 %v8380_v0  ;;  %7514 = vmatprep.subr.bf16.mxu1 %v8380_v0  ;;  %v2517_v37 = vcombine.high %v2491_v59, %v2499_v60  ;;  %v2904_v42 = vpack.c.bf16 %v2748_v31, %v2748_v31  ;;  %v2905_v43 = vpack.c.bf16 %v2749_v32, %v2749_v32 }
 0x8fb   : > { %v2898_v40 = vpack.c.bf16 %v2600_v27, %v2532_v20  ;;  %v2899_v8 = vpack.c.bf16 %v2601_v28, %v2533_v36  ;;  %v2583_v45 = vrot.slane %v2569_v34, %v8706_v50  ;;  %v2599_v46 = vrot.slane %v2585_v35, %v8706_v50 }
 0x8fc   : > { %v2515_v49 = vrot.slane %v2501_v25, %v8706_v50  ;;  %v2531_v51 = vrot.slane %v2517_v37, %v8706_v50  ;;  %v3004_v52 = vsel %vm1548_vm4, %v2904_v42, 0  ;;  %v3051_v54 = vsel %vm1548_vm4, %v2905_v43, 0 }
 0x8fd   : > { %v2602_v55 = vcombine.low %v2583_v45, %v2599_v46  ;;  %v2603_v33 = vcombine.high %v2583_v45, %v2599_v46 }
 0x8fe   : > { %v2534_v56 = vcombine.low %v2515_v49, %v2531_v51  ;;  %v2535_v57 = vcombine.high %v2515_v49, %v2531_v51 }
 0x900   : > { %7499 = vmatmul.mubr.msk.bf16.vlgmr.msra.gmra.mxu0 %vm1548_vm4, %v2898_v40  ;;  %7505 = vmatmul.mubr.msk.bf16.vlgmr.msra.gmra.mxu1 %vm1548_vm4, %v2899_v8  ;;  %v2900_v58 = vpack.c.bf16 %v2602_v55, %v2534_v56  ;;  %v2901_v59 = vpack.c.bf16 %v2603_v33, %v2535_v57 }
 0x901   : > { %7509 = vmatpush3.bf16.xpose.msra.mxu0 %v3004_v52  ;;  %7515 = vmatpush3.bf16.xpose.msra.mxu1 %v3051_v54 }
 0x902   : > { %7510 = vmatprep.mubr.msk.bf16.mxu0 %vm8381_vm1, %v8380_v0  ;;  %7516 = vmatprep.mubr.msk.bf16.mxu1 %vm8381_vm1, %v8380_v0 }
 0x903   : > { %7520 = vmatprep.subr.bf16.mxu0 %v8380_v0  ;;  %7526 = vmatprep.subr.bf16.mxu1 %v8380_v0 }
 0x908   : > { %7511 = vmatmul.mubr.msk.bf16.vlgmr.msra.gmra.mxu0 %vm1548_vm4, %v2900_v58  ;;  %7517 = vmatmul.mubr.msk.bf16.vlgmr.msra.gmra.mxu1 %vm1548_vm4, %v2901_v59 }
 0x909   : > { %7522 = vmatprep.mubr.msk.bf16.mxu0 %vm8381_vm1, %v8380_v0  ;;  %7528 = vmatprep.mubr.msk.bf16.mxu1 %vm8381_vm1, %v8380_v0 }
 0x9c0   : > { %v2946_v60 = vpop.f32.mrf.mxu0  ;;  %v2993_v61 = vpop.f32.mrf.mxu1 }
 0x9c1   : > { %v3100_v62 = vsel %vm1548_vm4, %v2993_v61, -inf  ;;  %v3094_v63 = vsel %vm1548_vm4, %v2946_v60, -inf }
 0x9c2   : > { %3101 = vmax.xlane.f32.xlu0 %v3100_v62  ;;  %v7506_v2 = vpop.f32.mrf.mxu1  ;;  %3095 = vmax.xlane.f32.xlu1 %v3094_v63  ;;  %v7500_v3 = vpop.f32.mrf.mxu0 }
 0x9c4   : > { %v2949_v4 = vpop.f32.mrf.mxu0  ;;  %v2996_v5 = vpop.f32.mrf.mxu1 }
 0x9c5   : > { %v3097_v6 = vsel %vm1548_vm4, %v2949_v4, -inf  ;;  %v3103_v30 = vsel %vm1548_vm4, %v2996_v5, -inf }
 0x9c6   : > { %v7507_v7 = vpop.f32.mrf.mxu1  ;;  %3098 = vmax.xlane.f32.xlu0 %v3097_v6  ;;  %v7501_v9 = vpop.f32.mrf.mxu0 }
 0x9c8   : > { %v9036_v10 = vpop.f32.mrf.mxu0  ;;  %v3087_v29 = vpop.f32.mrf.mxu1 }
 0x9c9   : > { %v3106_v11 = vsel %vm1548_vm4, %v9036_v10, -inf  ;;  %v3112_v17 = vsel %vm1548_vm4, %v3087_v29, -inf }
 0x9ca   : > { %v7518_v12 = vpop.f32.mrf.mxu1  ;;  %3104 = vmax.xlane.f32.xlu0 %v3103_v30  ;;  %3107 = vmax.xlane.f32.xlu1 %v3106_v11  ;;  %v7512_v13 = vpop.f32.mrf.mxu0 }
 0x9cc   : > { %v3043_v15 = vpop.f32.mrf.mxu0  ;;  %v3090_v16 = vpop.f32.mrf.mxu1 }
 0x9cd   : > { %v3109_v18 = vsel %vm1548_vm4, %v3043_v15, -inf  ;;  %v3115_v38 = vsel %vm1548_vm4, %v3090_v16, -inf }
 0x9ce   : > { %v7519_v19 = vpop.f32.mrf.mxu1  ;;  %3113 = vmax.xlane.f32.xlu1 %v3112_v17  ;;  %3110 = vmax.xlane.f32.xlu0 %v3109_v18  ;;  %v7513_v21 = vpop.f32.mrf.mxu0 }
 0x9d2   : > { %3116 = vmax.xlane.f32.xlu0 %v3115_v38 }
 0x9df   : > { %2750 = vrot.lane.b32.xlu1 %v8931_v47, %s8385_s22 }
 0x9e3   : > { %2754 = vrot.lane.b32.xlu1 %v8947_v48, %s8385_s22 }
 0x9e8   : > { %2752 = vrot.lane.b32.xlu0 %v8949_v14, %s8385_s22 }
 0xa4b   : > { %v3102_v39 = vpop.xlane.xlu0 %3101  ;;  %v3096_v22 = vpop.xlane.xlu1 %3095 }
 0xa4c   : > { %v3120_v23 = vsub.f32 %v2993_v61, %v3102_v39  ;;  %v3118_v24 = vsub.f32 %v2946_v60, %v3096_v22 }
 0xa4e   : > { %v3126_v26 = vmul.f32 1.442695, %v3118_v24  ;;  %v3130_v27 = vmul.f32 1.442695, %v3120_v23 }
 0xa4f   : > { %v3099_v28 = vpop.xlane.xlu0 %3098 }
 0xa50   : > { %v3119_v1 = vsub.f32 %v2949_v4, %v3099_v28  ;;  %7940 = vpow2.f32 %v3126_v26 }
 0xa51   : > { %7942 = vpow2.f32 %v3130_v27 }
 0xa52   : > { %v3128_v41 = vmul.f32 1.442695, %v3119_v1 }
 0xa53   : > { %v3105_v31 = vpop.xlane.xlu0 %3104  ;;  %v3108_v32 = vpop.xlane.xlu1 %3107 }
 0xa54   : > { %7944 = vpow2.f32 %v3128_v41  ;;  %v3121_v47 = vsub.f32 %v2996_v5, %v3105_v31  ;;  %v3122_v60 = vsub.f32 %v9036_v10, %v3108_v32 }
 0xa56   : > { %v3132_v20 = vmul.f32 1.442695, %v3121_v47  ;;  %v3134_v61 = vmul.f32 1.442695, %v3122_v60 }
 0xa57   : > { %v3114_v48 = vpop.xlane.xlu1 %3113  ;;  %v3111_v34 = vpop.xlane.xlu0 %3110 }
 0xa58   : > { %7946 = vpow2.f32 %v3132_v20  ;;  %v3124_v14 = vsub.f32 %v3087_v29, %v3114_v48  ;;  %v3123_v35 = vsub.f32 %v3043_v15, %v3111_v34 }
 0xa5a   : > { %v3138_v36 = vmul.f32 1.442695, %v3124_v14  ;;  %v3136_v25 = vmul.f32 1.442695, %v3123_v35 }
 0xa5b   : > { %v3117_v37 = vpop.xlane.xlu0 %3116  ;;  %v2751_v2 = vpop.permute.xlu1 %2750 }
 0xa5c   : > { %7948 = vpow2.f32 %v3138_v36  ;;  %v3125_v40 = vsub.f32 %v3090_v16, %v3117_v37 }
 0xa5d   : > { %v9050_v8 = vpop.eup %7940  ;;  %7950 = vpow2.f32 %v3136_v25 }
 0xa5e   : > { %v3140_v42 = vmul.f32 1.442695, %v3125_v40  ;;  %v3142_v43 = vsel %vm1548_vm4, %v9050_v8, 0.0  ;;  %v9054_v45 = vpop.eup %7942 }
 0xa5f   : > { %3143 = vadd.xlane.f32.xlu1 %v3142_v43  ;;  %v3148_v51 = vsel %vm1548_vm4, %v9054_v45, 0.0  ;;  %v2755_v3 = vpop.permute.xlu1 %2754  ;;  %v2753_v4 = vpop.permute.xlu0 %2752 }
 0xa60   : > { %7952 = vpow2.f32 %v3140_v42  ;;  %v2762_v9 = vcombine.low %v2751_v2, %v2755_v3  ;;  %v2763_v29 = vcombine.high %v2751_v2, %v2755_v3 }
 0xa61   : > { %v9056_v46 = vpop.eup %7944  ;;  %7954 = vpow2.f32 %v3134_v61 }
 0xa62   : > { %v3145_v49 = vsel %vm1548_vm4, %v9056_v46, 0.0  ;;  %v2770_v12 = vrot.slane %v2762_v9, %v8698_v44  ;;  %v2777_v13 = vrot.slane %v2763_v29, %v8698_v44 }
 0xa63   : > { %3146 = vadd.xlane.f32.xlu0 %v3145_v49  ;;  %3149 = vadd.xlane.f32.xlu1 %v3148_v51 }
 0xa65   : > { %v9062_v52 = vpop.eup %7946 }
 0xa66   : > { %v3151_v54 = vsel %vm1548_vm4, %v9062_v52, 0.0 }
 0xa67   : > { %3152 = vadd.xlane.f32.xlu0 %v3151_v54 }
 0xa69   : > { %v9066_v55 = vpop.eup %7948 }
 0xa6a   : > { %v3160_v33 = vsel %vm1548_vm4, %v9066_v55, 0.0  ;;  %v9070_v56 = vpop.eup %7950 }
 0xa6b   : > { %3161 = vadd.xlane.f32.xlu0 %v3160_v33  ;;  %v3157_v57 = vsel %vm1548_vm4, %v9070_v56, 0.0 }
 0xa6d   : > { %v9074_v58 = vpop.eup %7952 }
 0xa6e   : > { %v3163_v59 = vsel %vm1548_vm4, %v9074_v58, 0.0  ;;  %v9081_v62 = vpop.eup %7954 }
 0xa6f   : > { %3158 = vadd.xlane.f32.xlu0 %v3157_v57  ;;  %v3154_v63 = vsel %vm1548_vm4, %v9081_v62, 0.0 }
 0xa73   : > { %3164 = vadd.xlane.f32.xlu0 %v3163_v59 }
 0xa74   : > { %2756 = vrot.lane.b32.xlu1 %v8955_v53, %s8385_s22 }
 0xa98   : > { %3155 = vadd.xlane.f32.xlu1 %v3154_v63 }
 0xae8   : > { %v3144_v5 = vpop.xlane.xlu1 %3143 }
 0xae9   : > { %7956 = vrcp.f32 %v3144_v5 }
 0xaec   : > { %v3147_v6 = vpop.xlane.xlu0 %3146  ;;  %v3150_v7 = vpop.xlane.xlu1 %3149 }
 0xaed   : > { %7958 = vrcp.f32 %v3147_v6 }
 0xaf0   : > { %v3153_v30 = vpop.xlane.xlu0 %3152  ;;  %v2757_v53 = vpop.permute.xlu1 %2756 }
 0xaf1   : > { %v2778_v10 = vcombine.low %v2753_v4, %v2757_v53  ;;  %v2779_v11 = vcombine.high %v2753_v4, %v2757_v53  ;;  %7960 = vrcp.f32 %v3153_v30 }
 0xaf2   : > { %7962 = vrcp.f32 %v3150_v7 }
 0xaf3   : > { %v2786_v15 = vrot.slane %v2778_v10, %v8698_v44  ;;  %v2793_v16 = vrot.slane %v2779_v11, %v8698_v44 }
 0xaf4   : > { %v3162_v17 = vpop.xlane.xlu0 %3161 }
 0xaf5   : > { %v2794_v18 = vcombine.low %v2770_v12, %v2786_v15  ;;  %v2795_v19 = vcombine.high %v2770_v12, %v2786_v15  ;;  %v2810_v21 = vcombine.low %v2777_v13, %v2793_v16  ;;  %v2811_v38 = vcombine.high %v2777_v13, %v2793_v16 }
 0xaf6   : > { %7964 = vrcp.f32 %v3162_v17  ;;  %v7957_v25 = vpop.eup %7956 }
 0xaf7   : > { %v2802_v39 = vrot.slane %v2794_v18, %v8706_v50  ;;  %v2809_v22 = vrot.slane %v2795_v19, %v8706_v50  ;;  %v2818_v23 = vrot.slane %v2810_v21, %v8706_v50  ;;  %v2825_v24 = vrot.slane %v2811_v38, %v8706_v50 }
 0xaf8   : > { %v3159_v26 = vpop.xlane.xlu0 %3158  ;;  %v3174_v4 = vmul.f32 %v7957_v25, %v9050_v8 }
 0xaf9   : > { %v2830_v27 = vcombine.low %v2802_v39, %v2809_v22  ;;  %v7204_v28 = vcombine.high %v2802_v39, %v2809_v22  ;;  %v2846_v1 = vcombine.low %v2818_v23, %v2825_v24  ;;  %v7205_v41 = vcombine.high %v2818_v23, %v2825_v24 }
 0xafa   : > { %v7959_v37 = vpop.eup %7958 }
 0xafb   : > { %v2837_v31 = vrot.slane %v2830_v27, %v8698_v44  ;;  %v2845_v32 = vrot.slane %v7204_v28, %v8698_v44  ;;  %v2853_v47 = vrot.slane %v2846_v1, %v8698_v44  ;;  %v2861_v20 = vrot.slane %v7205_v41, %v8698_v44 }
 0xafc   : > { %v3165_v48 = vpop.xlane.xlu0 %3164  ;;  %v3175_v2 = vmul.f32 %v7959_v37, %v9056_v46 }
 0xafd   : > { %7966 = vrcp.f32 %v3165_v48  ;;  %v2862_v34 = vcombine.low %v2837_v31, %v2845_v32  ;;  %v2878_v14 = vcombine.low %v2853_v47, %v2861_v20  ;;  %v2863_v35 = vcombine.high %v2837_v31, %v2845_v32 }
 0xafe   : > { %v2879_v36 = vcombine.high %v2853_v47, %v2861_v20  ;;  %v7961_v51 = vpop.eup %7960  ;;  %v3182_v53 = vpack.c.bf16 %v3175_v2, %v3174_v4  ;;  %7968 = vrcp.f32 %v3159_v26 }
 0xaff   : > { %v2870_v40 = vrot.slane %v2862_v34, %v8706_v50  ;;  %v2886_v42 = vrot.slane %v2878_v14, %v8706_v50  ;;  %v2877_v43 = vrot.slane %v2863_v35, %v8706_v50  ;;  %v7963_v54 = vpop.eup %7962  ;;  %v3177_v3 = vmul.f32 %v7961_v51, %v9062_v52 }
 0xb00   : > { %v2893_v49 = vrot.slane %v2879_v36, %v8706_v50  ;;  %v3176_v5 = vmul.f32 %v7963_v54, %v9054_v45 }
 0xb01   : > { %v2894_v33 = vcombine.low %v2870_v40, %v2886_v42  ;;  %v2895_v57 = vcombine.high %v2870_v40, %v2886_v42 }
 0xb02   : > { %v2896_v59 = vcombine.low %v2877_v43, %v2893_v49  ;;  %v2897_v60 = vcombine.high %v2877_v43, %v2893_v49  ;;  %v3183_v10 = vpack.c.bf16 %v3177_v3, %v3176_v5 }
 0xb03   : > { %v3186_v61 = vpack.c.bf16 %v2894_v33, %v2894_v33  ;;  %v3187_v63 = vpack.c.bf16 %v2895_v57, %v2895_v57  ;;  %v7965_v30 = vpop.eup %7964 }
 0xb04   : > { %v3188_v9 = vpack.c.bf16 %v2896_v59, %v2896_v59  ;;  %v3189_v29 = vpack.c.bf16 %v2897_v60, %v2897_v60  ;;  %v3180_v11 = vmul.f32 %v7965_v30, %v9066_v55 }
 0xb05   : > { %v3195_v6 = vsel %vm3193_vm7, %v3186_v61, 0  ;;  %v3242_v7 = vsel %vm3193_vm7, %v3187_v63, 0 }
 0xb06   : > { %7521 = vmatpush3.bf16.msra.mxu0 %v3195_v6  ;;  %7527 = vmatpush3.bf16.msra.mxu1 %v3242_v7  ;;  %v3289_v8 = vsel %vm3193_vm7, %v3188_v9, 0  ;;  %v3336_v45 = vsel %vm3193_vm7, %v3189_v29, 0 }
 0xb07   : > { %7532 = vmatprep.subr.bf16.mxu0 %v8380_v0  ;;  %7538 = vmatprep.subr.bf16.mxu1 %v8380_v0 }
 0xb09   : > { %7523 = vmatmul.mubr.msk.bf16.vlgmr.msra.gmra.mxu0 %vm1548_vm4, %v3182_v53  ;;  %7529 = vmatmul.mubr.msk.bf16.vlgmr.msra.gmra.mxu1 %vm1548_vm4, %v3183_v10 }
 0xb0a   : > { %v7967_v46 = vpop.eup %7966  ;;  %7533 = vmatpush3.bf16.msra.mxu0 %v3289_v8  ;;  %7539 = vmatpush3.bf16.msra.mxu1 %v3336_v45 }
 0xb0b   : > { %7540 = vmatprep.mubr.msk.bf16.mxu1 %vm8381_vm1, %v8380_v0  ;;  %v3181_v52 = vmul.f32 %v7967_v46, %v9074_v58  ;;  %7534 = vmatprep.mubr.msk.bf16.mxu0 %vm8381_vm1, %v8380_v0  ;;  %v7969_v15 = vpop.eup %7968 }
 0xb0c   : > { %7544 = vmatprep.subr.bf16.mxu0 %v8380_v0  ;;  %7552 = vmatprep.subr.bf16.mxu1 %v8380_v0  ;;  %v3179_v17 = vmul.f32 %v7969_v15, %v9070_v56 }
 0xb0d   : > { %v3185_v12 = vpack.c.bf16 %v3181_v52, %v3180_v11 }
 0xb11   : > { %7541 = vmatmul.mubr.msk.bf16.vlgmr.msra.gmra.mxu1 %vm1548_vm4, %v3185_v12 }
 0xb12   : > { %7556 = vmatprep.mubr.msk.bf16.mxu1 %vm8381_vm1, %v8380_v0 }
 0xb21   : > { %v3156_v13 = vpop.xlane.xlu1 %3155 }
 0xb22   : > { %7970 = vrcp.f32 %v3156_v13 }
 0xb2f   : > { %v7971_v58 = vpop.eup %7970 }
 0xb30   : > { %v3178_v16 = vmul.f32 %v7971_v58, %v9081_v62 }
 0xb32   : > { %v3184_v18 = vpack.c.bf16 %v3179_v17, %v3178_v16 }
 0xb34   : > { %7535 = vmatmul.mubr.msk.bf16.vlgmr.msra.gmra.mxu0 %vm1548_vm4, %v3184_v18  ;;  %v7908_v18 = vld [vmem:[#allocation14 + $0x18] sm:$0xff]  }
 0xb35   : > { %7548 = vmatprep.mubr.msk.bf16.mxu0 %vm8381_vm1, %v8380_v0  ;;  %7545 = vmatpush3.bf16.msra.mxu0 %v7908_v18  ;;  %v7914_v18 = vld [vmem:[#allocation8 + $0x28] sm:$0xff]  }
 0xb36   : > { %7546 = vmatprep.subr.bf16.mxu0 %v8380_v0 }
 0xbc9   : > { %v3231_v55 = vpop.f32.mrf.mxu0  ;;  %v3278_v19 = vpop.f32.mrf.mxu1 }
 0xbcb   : > { %v7524_v21 = vpop.f32.mrf.mxu0  ;;  %v7530_v38 = vpop.f32.mrf.mxu1 }
 0xbcd   : > { %v3234_v39 = vpop.f32.mrf.mxu0  ;;  %v3281_v22 = vpop.f32.mrf.mxu1 }
 0xbcf   : > { %v7525_v23 = vpop.f32.mrf.mxu0  ;;  %v7531_v24 = vpop.f32.mrf.mxu1 }
 0xbd1   : > { %v3372_v26 = vpop.f32.mrf.mxu1 }
 0xbd2   : > { %v3395_v1 = vcombine.low %v3278_v19, %v3372_v26  ;;  %v3396_v56 = vcombine.high %v3278_v19, %v3372_v26 }
 0xbd3   : > { %v7542_v27 = vpop.f32.mrf.mxu1 }
 0xbd4   : > { %v3403_v20 = vrot.slane %v3395_v1, %v8698_v44  ;;  %v3410_v48 = vrot.slane %v3396_v56, %v8698_v44  ;;  %v7909_v56 = vld [vmem:[#allocation14 + $0x10] sm:$0xff]  }
 0xbd5   : > { %v3375_v28 = vpop.f32.mrf.mxu1  ;;  %7547 = vmatpush3.bf16.msra.mxu0 %v7909_v56 }
 0xbd6   : > { %v3463_v35 = vcombine.low %v3281_v22, %v3375_v28  ;;  %v3464_v36 = vcombine.high %v3281_v22, %v3375_v28  ;;  %7560 = vmatprep.subr.bf16.mxu0 %v8380_v0 }
 0xbd7   : > { %v7543_v62 = vpop.f32.mrf.mxu1 }
 0xbd8   : > { %v3471_v61 = vrot.slane %v3463_v35, %v8698_v44  ;;  %v3478_v63 = vrot.slane %v3464_v36, %v8698_v44 }
 0xbf4   : > { %v3325_v41 = vpop.f32.mrf.mxu0 }
 0xbf5   : > { %v3379_v31 = vcombine.low %v3231_v55, %v3325_v41  ;;  %v3380_v32 = vcombine.high %v3231_v55, %v3325_v41 }
 0xbf6   : > { %v7536_v47 = vpop.f32.mrf.mxu0 }
 0xbf7   : > { %v3387_v34 = vrot.slane %v3379_v31, %v8698_v44  ;;  %v3394_v14 = vrot.slane %v3380_v32, %v8698_v44 }
 0xbf8   : > { %v3328_v25 = vpop.f32.mrf.mxu0 }
 0xbf9   : > { %v3411_v37 = vcombine.low %v3387_v34, %v3403_v20  ;;  %v3412_v40 = vcombine.high %v3387_v34, %v3403_v20  ;;  %v3427_v42 = vcombine.low %v3394_v14, %v3410_v48  ;;  %v3428_v43 = vcombine.high %v3394_v14, %v3410_v48 }
 0xbfa   : > { %v3447_v49 = vcombine.low %v3234_v39, %v3328_v25  ;;  %v3448_v51 = vcombine.high %v3234_v39, %v3328_v25  ;;  %v7537_v54 = vpop.f32.mrf.mxu0 }
 0xbfb   : > { %v3419_v33 = vrot.slane %v3411_v37, %v8706_v50  ;;  %v3426_v57 = vrot.slane %v3412_v40, %v8706_v50  ;;  %v3435_v59 = vrot.slane %v3427_v42, %v8706_v50  ;;  %v3442_v60 = vrot.slane %v3428_v43, %v8706_v50 }
 0xbfc   : > { %v3455_v2 = vrot.slane %v3447_v49, %v8698_v44  ;;  %v3462_v3 = vrot.slane %v3448_v51, %v8698_v44 }
 0xbfd   : > { %v3515_v4 = vcombine.low %v3419_v33, %v3426_v57  ;;  %v7214_v5 = vcombine.high %v3419_v33, %v3426_v57  ;;  %v3531_v6 = vcombine.low %v3435_v59, %v3442_v60  ;;  %v7215_v7 = vcombine.high %v3435_v59, %v3442_v60 }
 0xbfe   : > { %v3479_v9 = vcombine.low %v3455_v2, %v3471_v61  ;;  %v3480_v29 = vcombine.high %v3455_v2, %v3471_v61  ;;  %v3495_v30 = vcombine.low %v3462_v3, %v3478_v63  ;;  %v3496_v53 = vcombine.high %v3462_v3, %v3478_v63 }
 0xbff   : > { %v3522_v10 = vrot.slane %v3515_v4, %v8698_v44  ;;  %v3530_v46 = vrot.slane %v7214_v5, %v8698_v44  ;;  %v3538_v8 = vrot.slane %v3531_v6, %v8698_v44  ;;  %v3546_v45 = vrot.slane %v7215_v7, %v8698_v44 }
 0xc00   : > { %v3487_v52 = vrot.slane %v3479_v9, %v8706_v50  ;;  %v3494_v11 = vrot.slane %v3480_v29, %v8706_v50  ;;  %v3503_v12 = vrot.slane %v3495_v30, %v8706_v50  ;;  %v3510_v13 = vrot.slane %v3496_v53, %v8706_v50 }
 0xc01   : > { %v3548_v15 = vcombine.high %v3522_v10, %v3530_v46  ;;  %v3564_v58 = vcombine.high %v3538_v8, %v3546_v45  ;;  %v3547_v16 = vcombine.low %v3522_v10, %v3530_v46  ;;  %v3563_v17 = vcombine.low %v3538_v8, %v3546_v45  ;;  %v7910_v10 = vld [vmem:[%s9740_s3 + $0x8] sm:$0xff]   ;;  %v7911_v46 = vld [vmem:[%s9740_s3] sm:$0xff]   ;;  %v7218_v45 = vld [vmem:[#allocation16 + $0x1] ss:$0 sm:$0xff] }
 0xc02   : > { %v3583_v55 = vcombine.low %v3487_v52, %v3494_v11  ;;  %v7216_v19 = vcombine.high %v3487_v52, %v3494_v11  ;;  %v3599_v21 = vcombine.low %v3503_v12, %v3510_v13  ;;  %v7217_v38 = vcombine.high %v3503_v12, %v3510_v13  ;;  %7553 = vmatpush3.bf16.msra.mxu1 %v7910_v10 }
 0xc03   : > { %v3555_v39 = vrot.slane %v3547_v16, %v8706_v50  ;;  %v3571_v22 = vrot.slane %v3563_v17, %v8706_v50  ;;  %v3562_v28 = vrot.slane %v3548_v15, %v8706_v50  ;;  %v3578_v62 = vrot.slane %v3564_v58, %v8706_v50  ;;  %7554 = vmatprep.subr.bf16.mxu1 %v8380_v0  ;;  %v7912_v16 = vld [vmem:[#allocation11 + $0x28] sm:$0xff]   ;;  %v7913_v17 = vld [vmem:[#allocation11 + $0x20] sm:$0xff]  }
 0xc04   : > { %v3590_v23 = vrot.slane %v3583_v55, %v8698_v44  ;;  %v3598_v24 = vrot.slane %v7216_v19, %v8698_v44  ;;  %v3606_v26 = vrot.slane %v3599_v21, %v8698_v44  ;;  %v3614_v27 = vrot.slane %v7217_v38, %v8698_v44  ;;  %v7915_v55 = vld [vmem:[#allocation8 + $0x20] sm:$0xff]   ;;  %v3821_v19 = vld [vmem:[#allocation2 + $0x4] sm:$0xf]  ;;  %v7222_v38 = vld [vmem:[#allocation7 + $0x1] ss:$0 sm:$0xff] }
 0xc05   : > { %v3579_v1 = vcombine.low %v3555_v39, %v3571_v22  ;;  %v3581_v35 = vcombine.low %v3562_v28, %v3578_v62  ;;  %v3580_v25 = vcombine.high %v3555_v39, %v3571_v22  ;;  %v3582_v51 = vcombine.high %v3562_v28, %v3578_v62 }
 0xc06   : > { %v3616_v41 = vcombine.high %v3590_v23, %v3598_v24  ;;  %v3632_v31 = vcombine.high %v3606_v26, %v3614_v27  ;;  %v3615_v32 = vcombine.low %v3590_v23, %v3598_v24  ;;  %v3631_v47 = vcombine.low %v3606_v26, %v3614_v27  ;;  %7555 = vmatpush3.bf16.msra.mxu1 %v7911_v46 }
 0xc07   : > { %7568 = vmatprep.subr.bf16.mxu1 %v8380_v0 }
 0xc08   : > { %v3630_v20 = vrot.slane %v3616_v41, %v8706_v50  ;;  %v3646_v48 = vrot.slane %v3632_v31, %v8706_v50  ;;  %v3623_v34 = vrot.slane %v3615_v32, %v8706_v50  ;;  %v3639_v14 = vrot.slane %v3631_v47, %v8706_v50  ;;  %v7230_v41 = vld [vmem:[#allocation13 + $0x2] ss:$0 sm:$0xff] }
 0xc0a   : > { %v3649_v36 = vcombine.low %v3630_v20, %v3646_v48  ;;  %v3648_v37 = vcombine.high %v3623_v34, %v3639_v14  ;;  %v3647_v40 = vcombine.low %v3623_v34, %v3639_v14  ;;  %v3650_v49 = vcombine.high %v3630_v20, %v3646_v48  ;;  %v7226_v48 = vld [vmem:[#allocation10 + $0x2] ss:$0 sm:$0xff] }
 0xc0c   : > { %v7871_v42 = vpack.i.bf16 %v3649_v36, %v3581_v35  ;;  %v7866_v43 = vpack.i.bf16 %v3648_v37, %v3580_v25  ;;  %v7876_v54 = vpack.i.bf16 %v3650_v49, %v3582_v51 }
 0xc0e   : > { %7872 = vrot.lane.b32.xlu0 %v7871_v42, %s8388_s27  ;;  %7867 = vrot.lane.b32.xlu1 %v7866_v43, %s8389_s5 }
 0xc12   : > { %7877 = vrot.lane.b32.xlu1 %v7876_v54, %s8390_s14 }
 0xc80   : > { %v7873_v33 = vpop.permute.xlu0 %7872  ;;  %v7868_v57 = vpop.permute.xlu1 %7867 }
 0xc81   : > { %v7870_v59 = vunpack.i.h.bf16 %v7868_v57  ;;  %v7869_v60 = vunpack.i.l.bf16 %v7868_v57  ;;  %v7875_v61 = vunpack.i.h.bf16 %v7873_v33  ;;  %v7874_v63 = vunpack.i.l.bf16 %v7873_v33 }
 0xc83   : > { %v3675_v2 = vsel %vm1548_vm4, %v3579_v1, %v7869_v60  ;;  %v3676_v3 = vsel %vm1548_vm4, %v3647_v40, %v7870_v59 }
 0xc84   : > { %v7878_v4 = vpop.permute.xlu1 %7877  ;;  %v3677_v7 = vsel %vm1733_vm5, %v3675_v2, %v7874_v63  ;;  %v3678_v9 = vsel %vm1733_vm5, %v3676_v3, %v7875_v61 }
 0xc85   : > { %v7880_v5 = vunpack.i.h.bf16 %v7878_v4  ;;  %v7879_v6 = vunpack.i.l.bf16 %v7878_v4 }
 0xc87   : > { %v3679_v29 = vsel %vm2108_vm6, %v3677_v7, %v7879_v6  ;;  %v3680_v30 = vsel %vm2108_vm6, %v3678_v9, %v7880_v5 }
 0xc88   : > { %v3681_v53 = vpack.c.bf16 %v3680_v30, %v3679_v29 }
 0xc8a   : > { %7549 = vmatmul.mubr.msk.bf16.vlgmr.msra.gmra.mxu0 %vm694_vm2, %v3681_v53 }
 0xc8b   : > { %7564 = vmatprep.mubr.msk.bf16.mxu0 %vm8381_vm1, %v8380_v0  ;;  %7561 = vmatpush3.bf16.msra.mxu0 %v7914_v18 }
 0xc8c   : > { %7562 = vmatprep.subr.bf16.mxu0 %v8380_v0 }
 0xc8f   : > { %7563 = vmatpush3.bf16.msra.mxu0 %v7915_v55 }
 0xc90   : > { %7576 = vmatprep.subr.bf16.mxu0 %v8380_v0 }
 0xc92   : > { %7565 = vmatmul.mubr.msk.bf16.vlgmr.msra.gmra.mxu0 %vm694_vm2, %v3821_v19 }
 0xc93   : > { %7578 = vmatprep.mubr.msk.bf16.mxu0 %vm8381_vm1, %v8380_v0 }
 0xd4a   : > { %v3744_v8 = vpop.f32.mrf.mxu0 }
 0xd4b   : > { %v3745_v12 = vadd.f32 %v7218_v45, %v3744_v8 }
 0xd4c   : > { %v7550_v52 = vpop.f32.mrf.mxu0 }
 0xd4e   : > { %v3747_v11 = vpop.f32.mrf.mxu0 }
 0xd4f   : > { %v3748_v13 = vadd.f32 %v7218_v45, %v3747_v11 }
 0xd50   : > { %v7551_v15 = vpop.f32.mrf.mxu0 }
 0xd51   : > { %v3755_v58 = vpack.c.bf16 %v3748_v13, %v3745_v12 }
 0xd52   : > { %v3884_v28 = vpop.f32.mrf.mxu0 }
 0xd53   : > { %7557 = vmatmul.mubr.msk.bf16.vlgmr.msra.gmra.mxu1 %vm694_vm2, %v3755_v58  ;;  %v9203_v35 = vadd.f32 %v7226_v48, %v3884_v28 }
 0xd54   : > { %7572 = vmatprep.mubr.msk.bf16.mxu1 %vm8381_vm1, %v8380_v0  ;;  %7569 = vmatpush3.bf16.msra.mxu1 %v7912_v16  ;;  %v7566_v62 = vpop.f32.mrf.mxu0 }
 0xd55   : > { %7570 = vmatprep.subr.bf16.mxu1 %v8380_v0 }
 0xd56   : > { %v3887_v1 = vpop.f32.mrf.mxu0 }
 0xd58   : > { %7571 = vmatpush3.bf16.msra.mxu1 %v7913_v17  ;;  %v7567_v56 = vpop.f32.mrf.mxu0 }
 0xd59   : > { %7582 = vmatprep.subr.bf16.mxu1 %v8380_v0 }
 0xe13   : > { %v3813_v21 = vpop.f32.mrf.mxu1 }
 0xe14   : > { %v3814_v23 = vadd.f32 %v7222_v38, %v3813_v21 }
 0xe15   : > { %v7558_v39 = vpop.f32.mrf.mxu1 }
 0xe17   : > { %v3816_v22 = vpop.f32.mrf.mxu1 }
 0xe18   : > { %v3817_v24 = vadd.f32 %v7222_v38, %v3816_v22 }
 0xe19   : > { %v7559_v26 = vpop.f32.mrf.mxu1 }
 0xe1a   : > { %v9193_v27 = vpack.c.bf16 %v3817_v24, %v3814_v23 }
 0xe1c   : > { %7573 = vmatmul.mubr.msk.bf16.vlgmr.msra.gmra.mxu1 %vm694_vm2, %v9193_v27 }
 0xe1d   : > { %7584 = vmatprep.mubr.msk.bf16.mxu1 %vm8381_vm1, %v8380_v0 }
 0xedc   : > { %v3953_v31 = vpop.f32.mrf.mxu1 }
 0xedd   : > { %v3954_v32 = vadd.f32 %v7230_v41, %v3953_v31 }
 0xede   : > { %v7574_v47 = vpop.f32.mrf.mxu1 }
 0xedf   : > { %4114 = vrot.lane.b32.xlu0 %v3954_v32, %s8383_s30  ;;  %4108 = vrot.lane.b32.xlu1 %v3954_v32, %s8382_s19 }
 0xee0   : > { %v3956_v20 = vpop.f32.mrf.mxu1 }
 0xee1   : > { %v3957_v34 = vadd.f32 %v7230_v41, %v3956_v20 }
 0xee2   : > { %v7575_v14 = vpop.f32.mrf.mxu1 }
 0xee3   : > { %4120 = vrot.lane.b32.xlu0 %v3954_v32, %s8384_s24  ;;  %4110 = vrot.lane.b32.xlu1 %v3957_v34, %s8382_s19 }
 0xee7   : > { %4116 = vrot.lane.b32.xlu1 %v3957_v34, %s8383_s30  ;;  %3961 = vrot.lane.b32.xlu0 %v9203_v35, %s8382_s19 }
 0xeeb   : > { %4122 = vrot.lane.b32.xlu1 %v3957_v34, %s8384_s24  ;;  %3967 = vrot.lane.b32.xlu0 %v9203_v35, %s8384_s24 }
 0xeef   : > { %3964 = vrot.lane.b32.xlu1 %v9203_v35, %s8383_s30  ;;  %4400 = vrot.lane.b32.xlu0 %v3957_v34, %s8385_s22 }
 0xef3   : > { %4398 = vrot.lane.b32.xlu1 %v3954_v32, %s8385_s22 }
 0xf51   : > { %v9215_v36 = vpop.permute.xlu0 %4114  ;;  %v4109_v25 = vpop.permute.xlu1 %4108 }
 0xf52   : > { %4402 = vrot.lane.b32.xlu1 %v4109_v25, %s8385_s22  ;;  %v4126_v37 = vcombine.low %v3954_v32, %v9215_v36  ;;  %v4127_v40 = vcombine.high %v3954_v32, %v9215_v36 }
 0xf54   : > { %v4134_v54 = vrot.slane %v4126_v37, %v8698_v44  ;;  %v4141_v33 = vrot.slane %v4127_v40, %v8698_v44 }
 0xf55   : > { %v9220_v42 = vpop.permute.xlu0 %4120  ;;  %v4111_v43 = vpop.permute.xlu1 %4110 }
 0xf56   : > { %v4142_v49 = vcombine.low %v4109_v25, %v9220_v42  ;;  %v4143_v51 = vcombine.high %v4109_v25, %v9220_v42  ;;  %4404 = vrot.lane.b32.xlu1 %v4111_v43, %s8385_s22 }
 0xf58   : > { %v4150_v57 = vrot.slane %v4142_v49, %v8698_v44  ;;  %v4157_v59 = vrot.slane %v4143_v51, %v8698_v44 }
 0xf59   : > { %v9229_v60 = vpop.permute.xlu1 %4116  ;;  %v3962_v61 = vpop.permute.xlu0 %3961 }
 0xf5a   : > { %v4158_v63 = vcombine.low %v4134_v54, %v4150_v57  ;;  %v4159_v2 = vcombine.high %v4134_v54, %v4150_v57  ;;  %v4174_v3 = vcombine.low %v4141_v33, %v4157_v59  ;;  %v4175_v4 = vcombine.high %v4141_v33, %v4157_v59 }
 0xf5b   : > { %v4194_v29 = vcombine.low %v3957_v34, %v9229_v60  ;;  %v4195_v30 = vcombine.high %v3957_v34, %v9229_v60 }
 0xf5c   : > { %v4166_v5 = vrot.slane %v4158_v63, %v8706_v50  ;;  %v4173_v6 = vrot.slane %v4159_v2, %v8706_v50  ;;  %v4182_v7 = vrot.slane %v4174_v3, %v8706_v50  ;;  %v4189_v9 = vrot.slane %v4175_v4, %v8706_v50 }
 0xf5d   : > { %v9237_v53 = vpop.permute.xlu1 %4122  ;;  %v3968_v52 = vpop.permute.xlu0 %3967  ;;  %v4202_v55 = vrot.slane %v4194_v29, %v8698_v44  ;;  %v4209_v19 = vrot.slane %v4195_v30, %v8698_v44 }
 0xf5e   : > { %v4262_v10 = vcombine.low %v4166_v5, %v4173_v6  ;;  %v7236_v46 = vcombine.high %v4166_v5, %v4173_v6  ;;  %v4278_v8 = vcombine.low %v4182_v7, %v4189_v9  ;;  %v7237_v45 = vcombine.high %v4182_v7, %v4189_v9 }
 0xf5f   : > { %v4210_v11 = vcombine.low %v4111_v43, %v9237_v53  ;;  %v4211_v12 = vcombine.high %v4111_v43, %v9237_v53  ;;  %v3986_v13 = vcombine.low %v3962_v61, %v3968_v52  ;;  %v3987_v15 = vcombine.high %v3962_v61, %v3968_v52 }
 0xf60   : > { %v9242_v58 = vrot.slane %v4262_v10, %v8698_v44  ;;  %v9245_v16 = vrot.slane %v7236_v46, %v8698_v44  ;;  %v9248_v17 = vrot.slane %v4278_v8, %v8698_v44  ;;  %v9251_v18 = vrot.slane %v7237_v45, %v8698_v44 }
 0xf61   : > { %v4218_v21 = vrot.slane %v4210_v11, %v8698_v44  ;;  %v4225_v38 = vrot.slane %v4211_v12, %v8698_v44  ;;  %v3965_v39 = vpop.permute.xlu1 %3964  ;;  %v3994_v22 = vrot.slane %v3986_v13, %v8698_v44  ;;  %v4001_v23 = vrot.slane %v3987_v15, %v8698_v44 }
 0xf62   : > { %v3970_v24 = vcombine.low %v9203_v35, %v3965_v39  ;;  %v3971_v26 = vcombine.high %v9203_v35, %v3965_v39  ;;  %v4294_v32 = vcombine.low %v9242_v58, %v9245_v16  ;;  %v4310_v47 = vcombine.low %v9248_v17, %v9251_v18 }
 0xf63   : > { %v4226_v28 = vcombine.low %v4202_v55, %v4218_v21  ;;  %v4227_v62 = vcombine.high %v4202_v55, %v4218_v21  ;;  %v4242_v1 = vcombine.low %v4209_v19, %v4225_v38  ;;  %v4243_v56 = vcombine.high %v4209_v19, %v4225_v38 }
 0xf64   : > { %v3978_v41 = vrot.slane %v3970_v24, %v8698_v44  ;;  %v3985_v31 = vrot.slane %v3971_v26, %v8698_v44  ;;  %v4302_v9 = vrot.slane %v4294_v32, %v8706_v50  ;;  %v4318_v29 = vrot.slane %v4310_v47, %v8706_v50 }
 0xf65   : > { %v4234_v20 = vrot.slane %v4226_v28, %v8706_v50  ;;  %v4241_v48 = vrot.slane %v4227_v62, %v8706_v50  ;;  %v4250_v34 = vrot.slane %v4242_v1, %v8706_v50  ;;  %v4257_v14 = vrot.slane %v4243_v56, %v8706_v50 }
 0xf66   : > { %v4002_v35 = vcombine.low %v3978_v41, %v3994_v22  ;;  %v4003_v25 = vcombine.high %v3978_v41, %v3994_v22  ;;  %v4018_v37 = vcombine.low %v3985_v31, %v4001_v23  ;;  %v4019_v40 = vcombine.high %v3985_v31, %v4001_v23 }
 0xf67   : > { %v4330_v43 = vcombine.low %v4234_v20, %v4241_v48  ;;  %v7238_v49 = vcombine.high %v4234_v20, %v4241_v48  ;;  %v4346_v51 = vcombine.low %v4250_v34, %v4257_v14  ;;  %v7239_v54 = vcombine.high %v4250_v34, %v4257_v14 }
 0xf68   : > { %v4010_v33 = vrot.slane %v4002_v35, %v8706_v50  ;;  %v4017_v57 = vrot.slane %v4003_v25, %v8706_v50  ;;  %v4026_v59 = vrot.slane %v4018_v37, %v8706_v50  ;;  %v4033_v61 = vrot.slane %v4019_v40, %v8706_v50 }
 0xf69   : > { %v4337_v63 = vrot.slane %v4330_v43, %v8698_v44  ;;  %v4345_v2 = vrot.slane %v7238_v49, %v8698_v44  ;;  %v4353_v3 = vrot.slane %v4346_v51, %v8698_v44  ;;  %v4361_v30 = vrot.slane %v7239_v54, %v8698_v44 }
 0xf6a   : > { %v4038_v4 = vcombine.low %v4010_v33, %v4017_v57  ;;  %v7234_v5 = vcombine.high %v4010_v33, %v4017_v57  ;;  %v4054_v6 = vcombine.low %v4026_v59, %v4033_v61  ;;  %v7235_v7 = vcombine.high %v4026_v59, %v4033_v61 }
 0xf6b   : > { %v4362_v10 = vcombine.low %v4337_v63, %v4345_v2  ;;  %v4378_v12 = vcombine.low %v4353_v3, %v4361_v30  ;;  %v4295_v15 = vcombine.high %v9242_v58, %v9245_v16  ;;  %v4311_v55 = vcombine.high %v9248_v17, %v9251_v18 }
 0xf6c   : > { %v4045_v46 = vrot.slane %v4038_v4, %v8698_v44  ;;  %v4053_v8 = vrot.slane %v7234_v5, %v8698_v44  ;;  %v4061_v45 = vrot.slane %v4054_v6, %v8698_v44  ;;  %v4069_v52 = vrot.slane %v7235_v7, %v8698_v44 }
 0xf6d   : > { %v4370_v11 = vrot.slane %v4362_v10, %v8706_v50  ;;  %v4386_v21 = vrot.slane %v4378_v12, %v8706_v50  ;;  %v4363_v38 = vcombine.high %v4337_v63, %v4345_v2  ;;  %v4379_v39 = vcombine.high %v4353_v3, %v4361_v30 }
 0xf6e   : > { %v4070_v13 = vcombine.low %v4045_v46, %v4053_v8  ;;  %v4086_v19 = vcombine.low %v4061_v45, %v4069_v52  ;;  %v4326_v22 = vcombine.low %v4302_v9, %v4318_v29  ;;  %v4327_v24 = vcombine.high %v4302_v9, %v4318_v29 }
 0xf6f   : > { %v4394_v23 = vcombine.low %v4370_v11, %v4386_v21  ;;  %v4395_v26 = vcombine.high %v4370_v11, %v4386_v21  ;;  %v4377_v28 = vrot.slane %v4363_v38, %v8706_v50  ;;  %v4309_v62 = vrot.slane %v4295_v15, %v8706_v50  ;;  %v4399_v38 = vpop.permute.xlu1 %4398 }
 0xf70   : > { %v4325_v1 = vrot.slane %v4311_v55, %v8706_v50  ;;  %v4393_v58 = vrot.slane %v4379_v39, %v8706_v50  ;;  %v4078_v17 = vrot.slane %v4070_v13, %v8706_v50  ;;  %v4094_v18 = vrot.slane %v4086_v19, %v8706_v50 }
 0xf71   : > { %v4698_v16 = vpack.c.bf16 %v4394_v23, %v4326_v22  ;;  %v4699_v56 = vpack.c.bf16 %v4395_v26, %v4327_v24  ;;  %v4071_v20 = vcombine.high %v4045_v46, %v4053_v8  ;;  %v4087_v48 = vcombine.high %v4061_v45, %v4069_v52  ;;  %v4401_v22 = vpop.permute.xlu0 %4400 }
 0xf72   : > { %v4396_v32 = vcombine.low %v4377_v28, %v4393_v58  ;;  %v4397_v47 = vcombine.high %v4377_v28, %v4393_v58  ;;  %v4328_v34 = vcombine.low %v4309_v62, %v4325_v1  ;;  %v4102_v14 = vcombine.low %v4078_v17, %v4094_v18 }
 0xf73   : > { %v4706_v41 = vsel %vm1548_vm4, %v4698_v16, 0  ;;  %v4752_v31 = vsel %vm1548_vm4, %v4699_v56, 0  ;;  %v4103_v35 = vcombine.high %v4078_v17, %v4094_v18  ;;  %v4329_v25 = vcombine.high %v4309_v62, %v4325_v1 }
 0xf74   : > { %7577 = vmatpush3.bf16.xpose.msra.mxu0 %v4706_v41  ;;  %7583 = vmatpush3.bf16.xpose.msra.mxu1 %v4752_v31  ;;  %v4700_v37 = vpack.c.bf16 %v4396_v32, %v4328_v34  ;;  %v4694_v43 = vpack.c.bf16 %v4102_v14, %v4102_v14  ;;  %v4085_v51 = vrot.slane %v4071_v20, %v8706_v50 }
 0xf75   : > { %7588 = vmatprep.subr.bf16.mxu0 %v8380_v0  ;;  %7594 = vmatprep.subr.bf16.mxu1 %v8380_v0  ;;  %v4701_v40 = vpack.c.bf16 %v4397_v47, %v4329_v25  ;;  %v4695_v49 = vpack.c.bf16 %v4103_v35, %v4103_v35  ;;  %v4101_v54 = vrot.slane %v4087_v48, %v8706_v50 }
 0xf76   : > { %v4798_v33 = vsel %vm1548_vm4, %v4700_v37, 0 }
 0xf77   : > { %v4844_v57 = vsel %vm1548_vm4, %v4701_v40, 0  ;;  %v4104_v59 = vcombine.low %v4085_v51, %v4101_v54  ;;  %v4105_v61 = vcombine.high %v4085_v51, %v4101_v54 }
 0xf79   : > { %v4696_v63 = vpack.c.bf16 %v4104_v59, %v4104_v59  ;;  %v4697_v2 = vpack.c.bf16 %v4105_v61, %v4105_v61 }
 0xf7b   : > { %7579 = vmatmul.mubr.msk.bf16.vlgmr.msra.gmra.mxu0 %vm1548_vm4, %v4694_v43  ;;  %7585 = vmatmul.mubr.msk.bf16.vlgmr.msra.gmra.mxu1 %vm1548_vm4, %v4695_v49 }
 0xf7c   : > { %7589 = vmatpush3.bf16.xpose.msra.mxu0 %v4798_v33  ;;  %7595 = vmatpush3.bf16.xpose.msra.mxu1 %v4844_v57 }
 0xf7d   : > { %7590 = vmatprep.mubr.msk.bf16.mxu0 %vm8381_vm1, %v8380_v0  ;;  %7596 = vmatprep.mubr.msk.bf16.mxu1 %vm8381_vm1, %v8380_v0 }
 0xf7e   : > { %7600 = vmatprep.subr.bf16.mxu0 %v8380_v0  ;;  %7606 = vmatprep.subr.bf16.mxu1 %v8380_v0 }
 0xf83   : > { %7591 = vmatmul.mubr.msk.bf16.vlgmr.msra.gmra.mxu0 %vm1548_vm4, %v4696_v63  ;;  %7597 = vmatmul.mubr.msk.bf16.vlgmr.msra.gmra.mxu1 %vm1548_vm4, %v4697_v2 }
 0xf84   : > { %7602 = vmatprep.mubr.msk.bf16.mxu0 %vm8381_vm1, %v8380_v0  ;;  %7608 = vmatprep.mubr.msk.bf16.mxu1 %vm8381_vm1, %v8380_v0 }
 0xfc4   : > { %v4403_v39 = vpop.permute.xlu1 %4402 }
 0xfc8   : > { %v4405_v23 = vpop.permute.xlu1 %4404 }
0x103b   : > { %v4742_v3 = vpop.f32.mrf.mxu0  ;;  %v4788_v4 = vpop.f32.mrf.mxu1 }
0x103c   : > { %v4889_v5 = vsel %vm1733_vm5, %v4788_v4, -inf  ;;  %v4886_v6 = vsel %vm1733_vm5, %v4742_v3, -inf }
0x103d   : > { %4890 = vmax.xlane.f32.xlu0 %v4889_v5  ;;  %v7586_v7 = vpop.f32.mrf.mxu1  ;;  %4887 = vmax.xlane.f32.xlu1 %v4886_v6  ;;  %v7580_v9 = vpop.f32.mrf.mxu0 }
0x103f   : > { %v4745_v29 = vpop.f32.mrf.mxu0  ;;  %v4791_v30 = vpop.f32.mrf.mxu1 }
0x1041   : > { %v7581_v10 = vpop.f32.mrf.mxu0  ;;  %v7587_v46 = vpop.f32.mrf.mxu1 }
0x1043   : > { %v4834_v8 = vpop.f32.mrf.mxu0  ;;  %v4880_v45 = vpop.f32.mrf.mxu1 }
0x1044   : > { %v4892_v52 = vsel %vm1733_vm5, %v4834_v8, -inf  ;;  %v4895_v55 = vsel %vm1733_vm5, %v4880_v45, -inf }
0x1045   : > { %v7598_v11 = vpop.f32.mrf.mxu1  ;;  %4893 = vmax.xlane.f32.xlu0 %v4892_v52  ;;  %v7592_v12 = vpop.f32.mrf.mxu0 }
0x1047   : > { %v4837_v13 = vpop.f32.mrf.mxu0  ;;  %v4883_v15 = vpop.f32.mrf.mxu1 }
0x1049   : > { %v7599_v19 = vpop.f32.mrf.mxu1  ;;  %4896 = vmax.xlane.f32.xlu0 %v4895_v55  ;;  %v7593_v21 = vpop.f32.mrf.mxu0 }
0x104e   : > { %4406 = vrot.lane.b32.xlu1 %v9215_v36, %s8385_s22 }
0x105f   : > { %4408 = vrot.lane.b32.xlu0 %v9229_v60, %s8385_s22 }
0x10c6   : > { %v4891_v24 = vpop.xlane.xlu0 %4890  ;;  %v4888_v26 = vpop.xlane.xlu1 %4887 }
0x10c7   : > { %v4899_v28 = vsub.f32 %v4788_v4, %v4891_v24  ;;  %v4898_v62 = vsub.f32 %v4742_v3, %v4888_v26 }
0x10c9   : > { %v4904_v1 = vmul.f32 1.442695, %v4899_v28  ;;  %v4902_v58 = vmul.f32 1.442695, %v4898_v62 }
0x10ca   : > { %v4407_v14 = vpop.permute.xlu1 %4406 }
0x10cb   : > { %7972 = vpow2.f32 %v4904_v1  ;;  %v4422_v43 = vcombine.low %v4399_v38, %v4407_v14  ;;  %v4423_v49 = vcombine.high %v4399_v38, %v4407_v14 }
0x10cc   : > { %7974 = vpow2.f32 %v4902_v58 }
0x10cd   : > { %v4430_v5 = vrot.slane %v4422_v43, %v8698_v44  ;;  %v4437_v6 = vrot.slane %v4423_v49, %v8698_v44 }
0x10ce   : > { %v4894_v17 = vpop.xlane.xlu0 %4893 }
0x10cf   : > { %v4900_v31 = vsub.f32 %v4834_v8, %v4894_v17 }
0x10d1   : > { %v4906_v47 = vmul.f32 1.442695, %v4900_v31 }
0x10d2   : > { %v4897_v18 = vpop.xlane.xlu0 %4896 }
0x10d3   : > { %v4901_v41 = vsub.f32 %v4880_v45, %v4897_v18 }
0x10d5   : > { %v4908_v32 = vmul.f32 1.442695, %v4901_v41 }
0x10d7   : > { %7976 = vpow2.f32 %v4908_v32 }
0x10d8   : > { %v9327_v16 = vpop.eup %7972  ;;  %7978 = vpow2.f32 %v4906_v47 }
0x10d9   : > { %v9329_v56 = vpop.eup %7974  ;;  %v4913_v36 = vsel %vm1733_vm5, %v9327_v16, 0.0 }
0x10da   : > { %v4910_v60 = vsel %vm1733_vm5, %v9329_v56, 0.0  ;;  %4914 = vadd.xlane.f32.xlu0 %v4913_v36 }
0x10db   : > { %4911 = vadd.xlane.f32.xlu1 %v4910_v60 }
0x10e4   : > { %v9339_v20 = vpop.eup %7976 }
0x10e5   : > { %v9341_v48 = vpop.eup %7978  ;;  %v4919_v34 = vsel %vm1733_vm5, %v9339_v20, 0.0 }
0x10ec   : > { %4410 = vrot.lane.b32.xlu1 %v9220_v42, %s8385_s22  ;;  %v4916_v42 = vsel %vm1733_vm5, %v9341_v48, 0.0 }
0x10f0   : > { %4412 = vrot.lane.b32.xlu0 %v9237_v53, %s8385_s22  ;;  %v4409_v53 = vpop.permute.xlu0 %4408 }
0x10f1   : > { %v4490_v37 = vcombine.low %v4401_v22, %v4409_v53  ;;  %v4491_v40 = vcombine.high %v4401_v22, %v4409_v53 }
0x10f3   : > { %v4498_v59 = vrot.slane %v4490_v37, %v8698_v44  ;;  %v4505_v2 = vrot.slane %v4491_v40, %v8698_v44 }
0x110f   : > { %4920 = vadd.xlane.f32.xlu0 %v4919_v34 }
0x1110   : > { %4917 = vadd.xlane.f32.xlu1 %v4916_v42 }
0x1163   : > { %v4915_v35 = vpop.xlane.xlu0 %4914 }
0x1164   : > { %v4912_v25 = vpop.xlane.xlu1 %4911  ;;  %7980 = vrcp.f32 %v4915_v35 }
0x1165   : > { %7982 = vrcp.f32 %v4912_v25 }
0x1167   : > { %v4413_v51 = vpop.permute.xlu0 %4412 }
0x1168   : > { %v4411_v54 = vpop.permute.xlu1 %4410  ;;  %v4506_v33 = vcombine.low %v4405_v23, %v4413_v51  ;;  %v4507_v57 = vcombine.high %v4405_v23, %v4413_v51 }
0x1169   : > { %v4438_v61 = vcombine.low %v4403_v39, %v4411_v54  ;;  %v4439_v63 = vcombine.high %v4403_v39, %v4411_v54 }
0x116a   : > { %v4514_v3 = vrot.slane %v4506_v33, %v8698_v44  ;;  %v4521_v4 = vrot.slane %v4507_v57, %v8698_v44 }
0x116b   : > { %v4446_v7 = vrot.slane %v4438_v61, %v8698_v44  ;;  %v4453_v9 = vrot.slane %v4439_v63, %v8698_v44 }
0x116c   : > { %v4522_v29 = vcombine.low %v4498_v59, %v4514_v3  ;;  %v4523_v30 = vcombine.high %v4498_v59, %v4514_v3  ;;  %v4538_v10 = vcombine.low %v4505_v2, %v4521_v4  ;;  %v4539_v46 = vcombine.high %v4505_v2, %v4521_v4 }
0x116d   : > { %v4454_v8 = vcombine.low %v4430_v5, %v4446_v7  ;;  %v4455_v45 = vcombine.high %v4430_v5, %v4446_v7  ;;  %v4470_v52 = vcombine.low %v4437_v6, %v4453_v9  ;;  %v4471_v11 = vcombine.high %v4437_v6, %v4453_v9 }
0x116e   : > { %v4530_v12 = vrot.slane %v4522_v29, %v8706_v50  ;;  %v4537_v13 = vrot.slane %v4523_v30, %v8706_v50  ;;  %v4546_v15 = vrot.slane %v4538_v10, %v8706_v50  ;;  %v4553_v55 = vrot.slane %v4539_v46, %v8706_v50 }
0x116f   : > { %v4462_v19 = vrot.slane %v4454_v8, %v8706_v50  ;;  %v4469_v21 = vrot.slane %v4455_v45, %v8706_v50  ;;  %v4478_v38 = vrot.slane %v4470_v52, %v8706_v50  ;;  %v4485_v39 = vrot.slane %v4471_v11, %v8706_v50 }
0x1170   : > { %v4626_v22 = vcombine.low %v4530_v12, %v4537_v13  ;;  %v7242_v23 = vcombine.high %v4530_v12, %v4537_v13  ;;  %v4642_v24 = vcombine.low %v4546_v15, %v4553_v55  ;;  %v7243_v26 = vcombine.high %v4546_v15, %v4553_v55 }
0x1171   : > { %v4558_v28 = vcombine.low %v4462_v19, %v4469_v21  ;;  %v7240_v62 = vcombine.high %v4462_v19, %v4469_v21  ;;  %v4574_v1 = vcombine.low %v4478_v38, %v4485_v39  ;;  %v7241_v58 = vcombine.high %v4478_v38, %v4485_v39  ;;  %v7981_v37 = vpop.eup %7980  ;;  %v7916_v38 = vld [vmem:[#allocation8 + $0x38] sm:$0xff]  }
0x1172   : > { %v4633_v36 = vrot.slane %v4626_v22, %v8698_v44  ;;  %v4641_v60 = vrot.slane %v7242_v23, %v8698_v44  ;;  %v4649_v17 = vrot.slane %v4642_v24, %v8698_v44  ;;  %v4657_v18 = vrot.slane %v7243_v26, %v8698_v44  ;;  %v7983_v49 = vpop.eup %7982  ;;  %v7917_v23 = vld [vmem:[#allocation8 + $0x30] sm:$0xff]  }
0x1173   : > { %v4565_v41 = vrot.slane %v4558_v28, %v8698_v44  ;;  %v4573_v31 = vrot.slane %v7240_v62, %v8698_v44  ;;  %v4581_v32 = vrot.slane %v4574_v1, %v8698_v44  ;;  %v4589_v47 = vrot.slane %v7241_v58, %v8698_v44 }
0x1174   : > { %v4658_v34 = vcombine.low %v4633_v36, %v4641_v60  ;;  %v4674_v42 = vcombine.low %v4649_v17, %v4657_v18  ;;  %v4659_v63 = vcombine.high %v4633_v36, %v4641_v60  ;;  %v4675_v2 = vcombine.high %v4649_v17, %v4657_v18 }
0x1175   : > { %v4590_v53 = vcombine.low %v4565_v41, %v4573_v31  ;;  %v4606_v14 = vcombine.low %v4581_v32, %v4589_v47  ;;  %v4591_v35 = vcombine.high %v4565_v41, %v4573_v31  ;;  %v4607_v25 = vcombine.high %v4581_v32, %v4589_v47 }
0x1176   : > { %v4666_v40 = vrot.slane %v4658_v34, %v8706_v50  ;;  %v4682_v43 = vrot.slane %v4674_v42, %v8706_v50  ;;  %v4926_v5 = vmul.f32 %v7983_v49, %v9329_v56  ;;  %v4927_v6 = vmul.f32 %v7981_v37, %v9327_v16 }
0x1177   : > { %v4598_v51 = vrot.slane %v4590_v53, %v8706_v50  ;;  %v4614_v54 = vrot.slane %v4606_v14, %v8706_v50  ;;  %v4605_v33 = vrot.slane %v4591_v35, %v8706_v50  ;;  %v4621_v57 = vrot.slane %v4607_v25, %v8706_v50 }
0x1178   : > { %v4690_v59 = vcombine.low %v4666_v40, %v4682_v43  ;;  %v4691_v61 = vcombine.high %v4666_v40, %v4682_v43  ;;  %v4673_v7 = vrot.slane %v4659_v63, %v8706_v50  ;;  %v4689_v9 = vrot.slane %v4675_v2, %v8706_v50 }
0x1179   : > { %v4622_v3 = vcombine.low %v4598_v51, %v4614_v54  ;;  %v4623_v4 = vcombine.high %v4598_v51, %v4614_v54  ;;  %v4624_v10 = vcombine.low %v4605_v33, %v4621_v57  ;;  %v4625_v46 = vcombine.high %v4605_v33, %v4621_v57  ;;  %v7918_v54 = vld [vmem:[#allocation14 + $0x28] sm:$0xff]  }
0x117a   : > { %v4692_v8 = vcombine.low %v4673_v7, %v4689_v9  ;;  %v4693_v45 = vcombine.high %v4673_v7, %v4689_v9  ;;  %v4930_v52 = vpack.c.bf16 %v4926_v5, %v4926_v5  ;;  %v4931_v11 = vpack.c.bf16 %v4927_v6, %v4927_v6 }
0x117b   : > { %v4934_v29 = vpack.c.bf16 %v4690_v59, %v4622_v3  ;;  %v4935_v30 = vpack.c.bf16 %v4691_v61, %v4623_v4 }
0x117c   : > { %v4936_v56 = vpack.c.bf16 %v4692_v8, %v4624_v10  ;;  %v4937_v16 = vpack.c.bf16 %v4693_v45, %v4625_v46  ;;  %v7919_v46 = vld [vmem:[#allocation14 + $0x20] sm:$0xff]  }
0x117d   : > { %7601 = vmatpush3.bf16.msra.mxu0 %v4934_v29  ;;  %7607 = vmatpush3.bf16.msra.mxu1 %v4935_v30 }
0x117e   : > { %7612 = vmatprep.subr.bf16.mxu0 %v8380_v0  ;;  %7618 = vmatprep.subr.bf16.mxu1 %v8380_v0 }
0x1180   : > { %7603 = vmatmul.mubr.msk.bf16.vlgmr.msra.gmra.mxu0 %vm1733_vm5, %v4930_v52  ;;  %7609 = vmatmul.mubr.msk.bf16.vlgmr.msra.gmra.mxu1 %vm1733_vm5, %v4931_v11 }
0x1181   : > { %7613 = vmatpush3.bf16.msra.mxu0 %v4936_v56  ;;  %7619 = vmatpush3.bf16.msra.mxu1 %v4937_v16 }
0x1182   : > { %7614 = vmatprep.mubr.msk.bf16.mxu0 %vm8381_vm1, %v8380_v0  ;;  %7620 = vmatprep.mubr.msk.bf16.mxu1 %vm8381_vm1, %v8380_v0 }
0x1183   : > { %7632 = vmatprep.subr.bf16.mxu1 %v8380_v0  ;;  %7624 = vmatprep.subr.bf16.mxu0 %v8380_v0 }
0x1198   : > { %v4921_v12 = vpop.xlane.xlu0 %4920 }
0x1199   : > { %v4918_v13 = vpop.xlane.xlu1 %4917  ;;  %7984 = vrcp.f32 %v4921_v12 }
0x119a   : > { %7986 = vrcp.f32 %v4918_v13 }
0x11a6   : > { %v7985_v15 = vpop.eup %7984 }
0x11a7   : > { %v7987_v55 = vpop.eup %7986  ;;  %v4929_v19 = vmul.f32 %v7985_v15, %v9339_v20 }
0x11a8   : > { %v4928_v21 = vmul.f32 %v7987_v55, %v9341_v48 }
0x11a9   : > { %v4933_v39 = vpack.c.bf16 %v4929_v19, %v4929_v19 }
0x11aa   : > { %v4932_v22 = vpack.c.bf16 %v4928_v21, %v4928_v21 }
0x11ab   : > { %7621 = vmatmul.mubr.msk.bf16.vlgmr.msra.gmra.mxu1 %vm1733_vm5, %v4933_v39 }
0x11ac   : > { %7615 = vmatmul.mubr.msk.bf16.vlgmr.msra.gmra.mxu0 %vm1733_vm5, %v4932_v22  ;;  %7633 = vmatpush3.bf16.msra.mxu1 %v7916_v38  ;;  %v7258_v38 = vld [vmem:[#allocation10 + $0x3] ss:$0 sm:$0xff] }
0x11ad   : > { %7634 = vmatprep.subr.bf16.mxu1 %v8380_v0  ;;  %7636 = vmatprep.mubr.msk.bf16.mxu1 %vm8381_vm1, %v8380_v0 }
0x11ae   : > { %7628 = vmatprep.mubr.msk.bf16.mxu0 %vm8381_vm1, %v8380_v0  ;;  %7625 = vmatpush3.bf16.msra.mxu0 %v7918_v54 }
0x11af   : > { %7626 = vmatprep.subr.bf16.mxu0 %v8380_v0 }
0x11b0   : > { %7635 = vmatpush3.bf16.msra.mxu1 %v7917_v23 }
0x11b1   : > { %7648 = vmatprep.subr.bf16.mxu1 %v8380_v0 }
0x11b2   : > { %7627 = vmatpush3.bf16.msra.mxu0 %v7919_v46 }
0x11b3   : > { %7637 = vmatmul.mubr.msk.bf16.vlgmr.msra.gmra.mxu1 %vm694_vm2, %v9193_v27  ;;  %7640 = vmatprep.subr.bf16.mxu0 %v8380_v0 }
0x11b4   : > { %7650 = vmatprep.mubr.msk.bf16.mxu1 %vm8381_vm1, %v8380_v0 }
0x1240   : > { %v4975_v20 = vpop.f32.mrf.mxu0  ;;  %v5018_v48 = vpop.f32.mrf.mxu1 }
0x1242   : > { %v7604_v24 = vpop.f32.mrf.mxu0  ;;  %v7610_v26 = vpop.f32.mrf.mxu1 }
0x1244   : > { %v4978_v28 = vpop.f32.mrf.mxu0  ;;  %v5021_v62 = vpop.f32.mrf.mxu1 }
0x1246   : > { %v7605_v1 = vpop.f32.mrf.mxu0  ;;  %v7611_v58 = vpop.f32.mrf.mxu1 }
0x1247   : > { %v7920_v1 = vld [vmem:[#allocation11 + $0x38] sm:$0xff]  }
0x126b   : > { %v5104_v36 = vpop.f32.mrf.mxu1 }
0x126c   : > { %v5061_v60 = vpop.f32.mrf.mxu0  ;;  %v5126_v17 = vcombine.low %v5018_v48, %v5104_v36  ;;  %v5127_v18 = vcombine.high %v5018_v48, %v5104_v36  ;;  %v7921_v36 = vld [vmem:[#allocation11 + $0x30] sm:$0xff]  }
0x126d   : > { %v5110_v41 = vcombine.low %v4975_v20, %v5061_v60  ;;  %v5111_v31 = vcombine.high %v4975_v20, %v5061_v60  ;;  %v7622_v32 = vpop.f32.mrf.mxu1  ;;  %v7254_v60 = vld [vmem:[#allocation16 + $0x2] ss:$0 sm:$0xff] }
0x126e   : > { %v5134_v27 = vrot.slane %v5126_v17, %v8698_v44  ;;  %v5141_v47 = vrot.slane %v5127_v18, %v8698_v44  ;;  %v7616_v34 = vpop.f32.mrf.mxu0 }
0x126f   : > { %v5118_v42 = vrot.slane %v5110_v41, %v8698_v44  ;;  %v5125_v53 = vrot.slane %v5111_v31, %v8698_v44  ;;  %v5107_v14 = vpop.f32.mrf.mxu1 }
0x1270   : > { %v5064_v35 = vpop.f32.mrf.mxu0 }
0x1271   : > { %v5142_v25 = vcombine.low %v5118_v42, %v5134_v27  ;;  %v5143_v37 = vcombine.high %v5118_v42, %v5134_v27  ;;  %v5158_v40 = vcombine.low %v5125_v53, %v5141_v47  ;;  %v5159_v43 = vcombine.high %v5125_v53, %v5141_v47  ;;  %v7623_v49 = vpop.f32.mrf.mxu1  ;;  %v7262_v47 = vld [vmem:[#allocation13 + $0x3] ss:$0 sm:$0xff] }
0x1272   : > { %v7617_v51 = vpop.f32.mrf.mxu0 }
0x1273   : > { %v5150_v33 = vrot.slane %v5142_v25, %v8706_v50  ;;  %v5157_v57 = vrot.slane %v5143_v37, %v8706_v50  ;;  %v5166_v59 = vrot.slane %v5158_v40, %v8706_v50  ;;  %v5173_v61 = vrot.slane %v5159_v43, %v8706_v50  ;;  %v5389_v63 = vpop.f32.mrf.mxu1 }
0x1274   : > { %v9430_v23 = vadd.f32 %v7258_v38, %v5389_v63 }
0x1275   : > { %v5178_v2 = vcombine.low %v5150_v33, %v5157_v57  ;;  %v7252_v3 = vcombine.high %v5150_v33, %v5157_v57  ;;  %v5194_v4 = vcombine.low %v5166_v59, %v5173_v61  ;;  %v7253_v5 = vcombine.high %v5166_v59, %v5173_v61  ;;  %v7638_v6 = vpop.f32.mrf.mxu1 }
0x1277   : > { %v5392_v7 = vpop.f32.mrf.mxu1  ;;  %v5185_v9 = vrot.slane %v5178_v2, %v8698_v44  ;;  %v5193_v29 = vrot.slane %v7252_v3, %v8698_v44  ;;  %v5201_v30 = vrot.slane %v5194_v4, %v8698_v44  ;;  %v5209_v10 = vrot.slane %v7253_v5, %v8698_v44 }
0x1278   : > { %v9425_v39 = vadd.f32 %v7258_v38, %v5392_v7 }
0x1279   : > { %v7639_v8 = vpop.f32.mrf.mxu1  ;;  %v5211_v45 = vcombine.high %v5185_v9, %v5193_v29  ;;  %v5227_v52 = vcombine.high %v5201_v30, %v5209_v10  ;;  %v5210_v11 = vcombine.low %v5185_v9, %v5193_v29  ;;  %v5226_v56 = vcombine.low %v5201_v30, %v5209_v10 }
0x127b   : > { %v5225_v16 = vrot.slane %v5211_v45, %v8706_v50  ;;  %v5241_v12 = vrot.slane %v5227_v52, %v8706_v50  ;;  %v5218_v13 = vrot.slane %v5210_v11, %v8706_v50  ;;  %v5234_v15 = vrot.slane %v5226_v56, %v8706_v50 }
0x127d   : > { %v5244_v55 = vcombine.low %v5225_v16, %v5241_v12  ;;  %v5243_v19 = vcombine.high %v5218_v13, %v5234_v15  ;;  %v5242_v21 = vcombine.low %v5218_v13, %v5234_v15  ;;  %v5245_v22 = vcombine.high %v5225_v16, %v5241_v12 }
0x127f   : > { %5251 = vrot.lane.b32.xlu1 %v5244_v55, %s8388_s27  ;;  %5247 = vrot.lane.b32.xlu0 %v5243_v19, %s8389_s5 }
0x1283   : > { %5255 = vrot.lane.b32.xlu1 %v5245_v22, %s8390_s14  ;;  %5469 = vrot.lane.b32.xlu0 %v9425_v39, %s8382_s19 }
0x1287   : > { %5467 = vrot.lane.b32.xlu1 %v9430_v23, %s8382_s19 }
0x12f1   : > { %v5252_v20 = vpop.permute.xlu1 %5251  ;;  %v5248_v48 = vpop.permute.xlu0 %5247 }
0x12f2   : > { %v5258_v24 = vsel %vm1548_vm4, %v5242_v21, %v5248_v48 }
0x12f3   : > { %v5259_v28 = vsel %vm1733_vm5, %v5258_v24, %v5252_v20 }
0x12f5   : > { %v5256_v26 = vpop.permute.xlu1 %5255  ;;  %v5470_v25 = vpop.permute.xlu0 %5469 }
0x12f6   : > { %v5260_v62 = vsel %vm2108_vm6, %v5259_v28, %v5256_v26 }
0x12f7   : > { %v5261_v58 = vpack.c.bf16 %v5260_v62, %v5260_v62 }
0x12f9   : > { %7629 = vmatmul.mubr.msk.bf16.vlgmr.msra.gmra.mxu0 %vm694_vm2, %v5261_v58  ;;  %v5468_v37 = vpop.permute.xlu1 %5467 }
0x12fa   : > { %7641 = vmatpush3.bf16.msra.mxu0 %v7920_v1  ;;  %7644 = vmatprep.mubr.msk.bf16.mxu0 %vm8381_vm1, %v8380_v0 }
0x12fb   : > { %7642 = vmatprep.subr.bf16.mxu0 %v8380_v0 }
0x12fe   : > { %7643 = vmatpush3.bf16.msra.mxu0 %v7921_v36 }
0x12ff   : > { %7654 = vmatprep.subr.bf16.mxu0 %v8380_v0 }
0x13b9   : > { %v5324_v17 = vpop.f32.mrf.mxu0 }
0x13ba   : > { %v5325_v18 = vadd.f32 %v7254_v60, %v5324_v17 }
0x13bb   : > { %v7630_v41 = vpop.f32.mrf.mxu0 }
0x13bc   : > { %v5396_v31 = vpack.c.bf16 %v5325_v18, %v5325_v18 }
0x13bd   : > { %v5327_v32 = vpop.f32.mrf.mxu0 }
0x13be   : > { %7645 = vmatmul.mubr.msk.bf16.vlgmr.msra.gmra.mxu0 %vm694_vm2, %v5396_v31 }
0x13bf   : > { %v7631_v27 = vpop.f32.mrf.mxu0  ;;  %7656 = vmatprep.mubr.msk.bf16.mxu0 %vm8381_vm1, %v8380_v0 }
0x147e   : > { %v5459_v34 = vpop.f32.mrf.mxu0 }
0x147f   : > { %v9445_v42 = vadd.f32 %v7262_v47, %v5459_v34 }
0x1480   : > { %v7646_v53 = vpop.f32.mrf.mxu0 }
0x1481   : > { %5761 = vrot.lane.b32.xlu1 %v9445_v42, %s8383_s30  ;;  %5758 = vrot.lane.b32.xlu0 %v9445_v42, %s8382_s19  ;;  %s7154_s19 = sshll.u32 %s571_s16, 2 }
0x1482   : > { %v5462_v14 = vpop.f32.mrf.mxu0 }
0x1484   : > { %v7647_v35 = vpop.f32.mrf.mxu0 }
0x1485   : > { %5473 = vrot.lane.b32.xlu1 %v9430_v23, %s8383_s30  ;;  %5764 = vrot.lane.b32.xlu0 %v9445_v42, %s8384_s24 }
0x1489   : > { %5479 = vrot.lane.b32.xlu1 %v9430_v23, %s8384_s24  ;;  %5475 = vrot.lane.b32.xlu0 %v9425_v39, %s8383_s30  ;;  %s7292_s30 = sshll.u32 %s8484_s29, 6 }
0x148d   : > { %5481 = vrot.lane.b32.xlu0 %v9425_v39, %s8384_s24  ;;  %s573_s24 = scalar_lea.vmem [#allocation19], %s7154_s19 }
0x14f3   : > { %v9461_v40 = vpop.permute.xlu1 %5761  ;;  %v9463_v43 = vpop.permute.xlu0 %5758 }
0x14f4   : > { %v5767_v49 = vcombine.low %v9445_v42, %v9461_v40  ;;  %v5768_v51 = vcombine.high %v9445_v42, %v9461_v40 }
0x14f6   : > { %v5775_v61 = vrot.slane %v5767_v49, %v8698_v44  ;;  %v5782_v63 = vrot.slane %v5768_v51, %v8698_v44 }
0x14f7   : > { %v5474_v54 = vpop.permute.xlu1 %5473  ;;  %v9469_v33 = vpop.permute.xlu0 %5764 }
0x14f8   : > { %v5783_v57 = vcombine.low %v9463_v43, %v9469_v33  ;;  %v5784_v59 = vcombine.high %v9463_v43, %v9469_v33  ;;  %v5485_v4 = vcombine.low %v9430_v23, %v5474_v54  ;;  %v5486_v5 = vcombine.high %v9430_v23, %v5474_v54 }
0x14fa   : > { %v5791_v2 = vrot.slane %v5783_v57, %v8698_v44  ;;  %v5798_v3 = vrot.slane %v5784_v59, %v8698_v44  ;;  %v5493_v16 = vrot.slane %v5485_v4, %v8698_v44  ;;  %v5500_v12 = vrot.slane %v5486_v5, %v8698_v44 }
0x14fb   : > { %v5480_v6 = vpop.permute.xlu1 %5479  ;;  %v5476_v7 = vpop.permute.xlu0 %5475 }
0x14fc   : > { %v5799_v9 = vcombine.low %v5775_v61, %v5791_v2  ;;  %v5800_v29 = vcombine.high %v5775_v61, %v5791_v2  ;;  %v5815_v30 = vcombine.low %v5782_v63, %v5798_v3  ;;  %v5816_v10 = vcombine.high %v5782_v63, %v5798_v3 }
0x14fd   : > { %v5501_v46 = vcombine.low %v5468_v37, %v5480_v6  ;;  %v5502_v8 = vcombine.high %v5468_v37, %v5480_v6  ;;  %v5553_v38 = vcombine.low %v9425_v39, %v5476_v7  ;;  %v5554_v22 = vcombine.high %v9425_v39, %v5476_v7 }
0x14fe   : > { %v5807_v45 = vrot.slane %v5799_v9, %v8706_v50  ;;  %v5814_v52 = vrot.slane %v5800_v29, %v8706_v50  ;;  %v5823_v11 = vrot.slane %v5815_v30, %v8706_v50  ;;  %v5830_v56 = vrot.slane %v5816_v10, %v8706_v50 }
0x14ff   : > { %v5509_v13 = vrot.slane %v5501_v46, %v8698_v44  ;;  %v5516_v15 = vrot.slane %v5502_v8, %v8698_v44  ;;  %v5482_v55 = vpop.permute.xlu0 %5481  ;;  %v5561_v18 = vrot.slane %v5553_v38, %v8698_v44  ;;  %v5568_v39 = vrot.slane %v5554_v22, %v8698_v44 }
0x1500   : > { %v5835_v19 = vcombine.low %v5807_v45, %v5814_v52  ;;  %v7270_v21 = vcombine.high %v5807_v45, %v5814_v52  ;;  %v5851_v26 = vcombine.low %v5823_v11, %v5830_v56  ;;  %v7271_v28 = vcombine.high %v5823_v11, %v5830_v56 }
0x1501   : > { %v5517_v23 = vcombine.low %v5493_v16, %v5509_v13  ;;  %v5518_v20 = vcombine.high %v5493_v16, %v5509_v13  ;;  %v5533_v48 = vcombine.low %v5500_v12, %v5516_v15  ;;  %v5534_v24 = vcombine.high %v5500_v12, %v5516_v15 }
0x1502   : > { %v5569_v62 = vcombine.low %v5470_v25, %v5482_v55  ;;  %v5570_v1 = vcombine.high %v5470_v25, %v5482_v55  ;;  %v5842_v37 = vrot.slane %v5835_v19, %v8698_v44  ;;  %v5850_v49 = vrot.slane %v7270_v21, %v8698_v44 }
0x1503   : > { %v5525_v58 = vrot.slane %v5517_v23, %v8706_v50  ;;  %v5532_v36 = vrot.slane %v5518_v20, %v8706_v50  ;;  %v5541_v60 = vrot.slane %v5533_v48, %v8706_v50  ;;  %v5548_v17 = vrot.slane %v5534_v24, %v8706_v50 }
0x1504   : > { %v5577_v41 = vrot.slane %v5569_v62, %v8698_v44  ;;  %v5584_v31 = vrot.slane %v5570_v1, %v8698_v44  ;;  %v5858_v51 = vrot.slane %v5851_v26, %v8698_v44  ;;  %v5866_v54 = vrot.slane %v7271_v28, %v8698_v44 }
0x1505   : > { %v5621_v32 = vcombine.low %v5525_v58, %v5532_v36  ;;  %v7266_v27 = vcombine.high %v5525_v58, %v5532_v36  ;;  %v5637_v47 = vcombine.low %v5541_v60, %v5548_v17  ;;  %v7267_v34 = vcombine.high %v5541_v60, %v5548_v17 }
0x1506   : > { %v5585_v53 = vcombine.low %v5561_v18, %v5577_v41  ;;  %v5586_v14 = vcombine.high %v5561_v18, %v5577_v41  ;;  %v5601_v35 = vcombine.low %v5568_v39, %v5584_v31  ;;  %v5602_v25 = vcombine.high %v5568_v39, %v5584_v31 }
0x1507   : > { %v5628_v2 = vrot.slane %v5621_v32, %v8698_v44  ;;  %v5636_v3 = vrot.slane %v7266_v27, %v8698_v44  ;;  %v5644_v4 = vrot.slane %v5637_v47, %v8698_v44  ;;  %v5652_v5 = vrot.slane %v7267_v34, %v8698_v44 }
0x1508   : > { %v5593_v57 = vrot.slane %v5585_v53, %v8706_v50  ;;  %v5600_v59 = vrot.slane %v5586_v14, %v8706_v50  ;;  %v5609_v61 = vrot.slane %v5601_v35, %v8706_v50  ;;  %v5616_v63 = vrot.slane %v5602_v25, %v8706_v50 }
0x1509   : > { %v5867_v45 = vcombine.low %v5842_v37, %v5850_v49  ;;  %v5883_v52 = vcombine.low %v5858_v51, %v5866_v54  ;;  %v5653_v11 = vcombine.low %v5628_v2, %v5636_v3  ;;  %v5669_v56 = vcombine.low %v5644_v4, %v5652_v5 }
0x150a   : > { %v5689_v6 = vcombine.low %v5593_v57, %v5600_v59  ;;  %v7268_v7 = vcombine.high %v5593_v57, %v5600_v59  ;;  %v5705_v9 = vcombine.low %v5609_v61, %v5616_v63  ;;  %v7269_v29 = vcombine.high %v5609_v61, %v5616_v63 }
0x150b   : > { %v5875_v13 = vrot.slane %v5867_v45, %v8706_v50  ;;  %v5891_v15 = vrot.slane %v5883_v52, %v8706_v50  ;;  %v5868_v55 = vcombine.high %v5842_v37, %v5850_v49  ;;  %v5884_v19 = vcombine.high %v5858_v51, %v5866_v54 }
0x150c   : > { %v5696_v30 = vrot.slane %v5689_v6, %v8698_v44  ;;  %v5704_v10 = vrot.slane %v7268_v7, %v8698_v44  ;;  %v5712_v46 = vrot.slane %v5705_v9, %v8698_v44  ;;  %v5720_v8 = vrot.slane %v7269_v29, %v8698_v44 }
0x150d   : > { %v5899_v22 = vcombine.low %v5875_v13, %v5891_v15  ;;  %v5900_v23 = vcombine.high %v5875_v13, %v5891_v15  ;;  %v5882_v20 = vrot.slane %v5868_v55, %v8706_v50  ;;  %v5898_v48 = vrot.slane %v5884_v19, %v8706_v50 }
0x150e   : > { %v5721_v16 = vcombine.low %v5696_v30, %v5704_v10  ;;  %v5737_v12 = vcombine.low %v5712_v46, %v5720_v8  ;;  %v5661_v24 = vrot.slane %v5653_v11, %v8706_v50  ;;  %v5677_v26 = vrot.slane %v5669_v56, %v8706_v50 }
0x150f   : > { %v6055_v28 = vpack.c.bf16 %v5899_v22, %v5899_v22  ;;  %v6056_v62 = vpack.c.bf16 %v5900_v23, %v5900_v23  ;;  %v5901_v17 = vcombine.low %v5882_v20, %v5898_v48  ;;  %v5902_v18 = vcombine.high %v5882_v20, %v5898_v48 }
0x1510   : > { %v5729_v21 = vrot.slane %v5721_v16, %v8706_v50  ;;  %v5745_v38 = vrot.slane %v5737_v12, %v8706_v50  ;;  %v5685_v39 = vcombine.low %v5661_v24, %v5677_v26  ;;  %v5722_v41 = vcombine.high %v5696_v30, %v5704_v10 }
0x1511   : > { %v6063_v36 = vsel %vm1548_vm4, %v6055_v28, 0  ;;  %v6110_v60 = vsel %vm1548_vm4, %v6056_v62, 0  ;;  %v5738_v31 = vcombine.high %v5712_v46, %v5720_v8  ;;  %v5686_v32 = vcombine.high %v5661_v24, %v5677_v26 }
0x1512   : > { %v5753_v1 = vcombine.low %v5729_v21, %v5745_v38  ;;  %v5754_v58 = vcombine.high %v5729_v21, %v5745_v38  ;;  %7649 = vmatpush3.bf16.xpose.msra.mxu1 %v6063_v36  ;;  %7655 = vmatpush3.bf16.xpose.msra.mxu0 %v6110_v60  ;;  %v5654_v27 = vcombine.high %v5628_v2, %v5636_v3 }
0x1513   : > { %7660 = vmatprep.subr.bf16.mxu1 %v8380_v0  ;;  %7666 = vmatprep.subr.bf16.mxu0 %v8380_v0  ;;  %v5670_v47 = vcombine.high %v5644_v4, %v5652_v5  ;;  %v6057_v14 = vpack.c.bf16 %v5901_v17, %v5901_v17  ;;  %v6058_v35 = vpack.c.bf16 %v5902_v18, %v5902_v18 }
0x1514   : > { %v6051_v34 = vpack.c.bf16 %v5753_v1, %v5685_v39  ;;  %v6052_v53 = vpack.c.bf16 %v5754_v58, %v5686_v32  ;;  %v5736_v25 = vrot.slane %v5722_v41, %v8706_v50  ;;  %v5752_v37 = vrot.slane %v5738_v31, %v8706_v50 }
0x1515   : > { %v5668_v49 = vrot.slane %v5654_v27, %v8706_v50  ;;  %v5684_v51 = vrot.slane %v5670_v47, %v8706_v50  ;;  %v6157_v54 = vsel %vm1548_vm4, %v6057_v14, 0  ;;  %v6204_v57 = vsel %vm1548_vm4, %v6058_v35, 0 }
0x1516   : > { %v5755_v59 = vcombine.low %v5736_v25, %v5752_v37  ;;  %v5756_v61 = vcombine.high %v5736_v25, %v5752_v37 }
0x1517   : > { %v5687_v63 = vcombine.low %v5668_v49, %v5684_v51  ;;  %v5688_v2 = vcombine.high %v5668_v49, %v5684_v51 }
0x1519   : > { %7651 = vmatmul.mubr.msk.bf16.vlgmr.msra.gmra.mxu1 %vm1548_vm4, %v6051_v34  ;;  %7657 = vmatmul.mubr.msk.bf16.vlgmr.msra.gmra.mxu0 %vm1548_vm4, %v6052_v53  ;;  %v6053_v3 = vpack.c.bf16 %v5755_v59, %v5687_v63  ;;  %v6054_v4 = vpack.c.bf16 %v5756_v61, %v5688_v2 }
0x151a   : > { %7661 = vmatpush3.bf16.xpose.msra.mxu1 %v6157_v54  ;;  %7667 = vmatpush3.bf16.xpose.msra.mxu0 %v6204_v57 }
0x151b   : > { %7662 = vmatprep.mubr.msk.bf16.mxu1 %vm8381_vm1, %v8380_v0  ;;  %7668 = vmatprep.mubr.msk.bf16.mxu0 %vm8381_vm1, %v8380_v0 }
0x151c   : > { %7672 = vmatprep.subr.bf16.mxu1 %v8380_v0  ;;  %7678 = vmatprep.subr.bf16.mxu0 %v8380_v0 }
0x1521   : > { %7663 = vmatmul.mubr.msk.bf16.vlgmr.msra.gmra.mxu1 %vm1548_vm4, %v6053_v3  ;;  %7669 = vmatmul.mubr.msk.bf16.vlgmr.msra.gmra.mxu0 %vm1548_vm4, %v6054_v4 }
0x1522   : > { %7674 = vmatprep.mubr.msk.bf16.mxu1 %vm8381_vm1, %v8380_v0  ;;  %7680 = vmatprep.mubr.msk.bf16.mxu0 %vm8381_vm1, %v8380_v0 }
0x15d9   : > { %v6099_v5 = vpop.f32.mrf.mxu1  ;;  %v6146_v6 = vpop.f32.mrf.mxu0 }
0x15da   : > { %v6247_v7 = vsel %vm1548_vm4, %v6099_v5, -inf  ;;  %v6253_v9 = vsel %vm1548_vm4, %v6146_v6, -inf }
0x15db   : > { %6248 = vmax.xlane.f32.xlu1 %v6247_v7  ;;  %v7652_v29 = vpop.f32.mrf.mxu1  ;;  %6254 = vmax.xlane.f32.xlu0 %v6253_v9  ;;  %v7658_v30 = vpop.f32.mrf.mxu0 }
0x15dd   : > { %v6102_v10 = vpop.f32.mrf.mxu1  ;;  %v6149_v46 = vpop.f32.mrf.mxu0 }
0x15de   : > { %v6250_v8 = vsel %vm1548_vm4, %v6102_v10, -inf  ;;  %v6256_v12 = vsel %vm1548_vm4, %v6149_v46, -inf }
0x15df   : > { %v7653_v45 = vpop.f32.mrf.mxu1  ;;  %6251 = vmax.xlane.f32.xlu0 %v6250_v8  ;;  %v7659_v52 = vpop.f32.mrf.mxu0 }
0x15e1   : > { %v9550_v11 = vpop.f32.mrf.mxu1  ;;  %v6240_v56 = vpop.f32.mrf.mxu0 }
0x15e2   : > { %v6259_v16 = vsel %vm1548_vm4, %v9550_v11, -inf  ;;  %v6265_v38 = vsel %vm1548_vm4, %v6240_v56, -inf }
0x15e3   : > { %6260 = vmax.xlane.f32.xlu1 %v6259_v16  ;;  %v7664_v13 = vpop.f32.mrf.mxu1  ;;  %6257 = vmax.xlane.f32.xlu0 %v6256_v12  ;;  %v7670_v15 = vpop.f32.mrf.mxu0 }
0x15e5   : > { %v6196_v55 = vpop.f32.mrf.mxu1  ;;  %v6243_v19 = vpop.f32.mrf.mxu0 }
0x15e6   : > { %v6262_v21 = vsel %vm1548_vm4, %v6196_v55, -inf  ;;  %v6268_v20 = vsel %vm1548_vm4, %v6243_v19, -inf }
0x15e7   : > { %v7665_v22 = vpop.f32.mrf.mxu1  ;;  %6263 = vmax.xlane.f32.xlu0 %v6262_v21  ;;  %6266 = vmax.xlane.f32.xlu1 %v6265_v38  ;;  %v7671_v23 = vpop.f32.mrf.mxu0 }
0x15eb   : > { %6269 = vmax.xlane.f32.xlu0 %v6268_v20 }
0x15f8   : > { %5903 = vrot.lane.b32.xlu1 %v9445_v42, %s8385_s22 }
0x15fc   : > { %5907 = vrot.lane.b32.xlu1 %v9461_v40, %s8385_s22 }
0x1601   : > { %5905 = vrot.lane.b32.xlu0 %v9463_v43, %s8385_s22 }
0x1664   : > { %v6249_v48 = vpop.xlane.xlu1 %6248  ;;  %v6255_v24 = vpop.xlane.xlu0 %6254 }
0x1665   : > { %v6271_v26 = vsub.f32 %v6099_v5, %v6249_v48  ;;  %v6273_v28 = vsub.f32 %v6146_v6, %v6255_v24 }
0x1667   : > { %v6279_v62 = vmul.f32 1.442695, %v6271_v26  ;;  %v6283_v1 = vmul.f32 1.442695, %v6273_v28 }
0x1668   : > { %v6252_v58 = vpop.xlane.xlu0 %6251 }
0x1669   : > { %7988 = vpow2.f32 %v6279_v62  ;;  %v6272_v36 = vsub.f32 %v6102_v10, %v6252_v58 }
0x166a   : > { %7990 = vpow2.f32 %v6283_v1 }
0x166b   : > { %v6281_v60 = vmul.f32 1.442695, %v6272_v36 }
0x166c   : > { %v6261_v17 = vpop.xlane.xlu1 %6260  ;;  %v6258_v18 = vpop.xlane.xlu0 %6257 }
0x166d   : > { %7992 = vpow2.f32 %v6281_v60  ;;  %v6274_v42 = vsub.f32 %v6149_v46, %v6258_v18  ;;  %v6275_v5 = vsub.f32 %v9550_v11, %v6261_v17 }
0x166f   : > { %v6285_v39 = vmul.f32 1.442695, %v6274_v42  ;;  %v6287_v6 = vmul.f32 1.442695, %v6275_v5 }
0x1670   : > { %v6264_v40 = vpop.xlane.xlu0 %6263  ;;  %v6267_v41 = vpop.xlane.xlu1 %6266 }
0x1671   : > { %v6276_v31 = vsub.f32 %v6196_v55, %v6264_v40  ;;  %v6277_v43 = vsub.f32 %v6240_v56, %v6267_v41  ;;  %7994 = vpow2.f32 %v6285_v39 }
0x1673   : > { %v6291_v32 = vmul.f32 1.442695, %v6277_v43  ;;  %v6289_v27 = vmul.f32 1.442695, %v6276_v31 }
0x1674   : > { %v6270_v47 = vpop.xlane.xlu0 %6269  ;;  %v5904_v29 = vpop.permute.xlu1 %5903 }
0x1675   : > { %v6278_v34 = vsub.f32 %v6243_v19, %v6270_v47  ;;  %7996 = vpow2.f32 %v6291_v32 }
0x1676   : > { %v9564_v53 = vpop.eup %7988  ;;  %7998 = vpow2.f32 %v6289_v27 }
0x1677   : > { %v6295_v14 = vsel %vm1548_vm4, %v9564_v53, 0.0  ;;  %v9568_v35 = vpop.eup %7990  ;;  %v6293_v25 = vmul.f32 1.442695, %v6278_v34 }
0x1678   : > { %6296 = vadd.xlane.f32.xlu1 %v6295_v14  ;;  %v6301_v49 = vsel %vm1548_vm4, %v9568_v35, 0.0  ;;  %v5908_v30 = vpop.permute.xlu1 %5907  ;;  %v5906_v10 = vpop.permute.xlu0 %5905 }
0x1679   : > { %8000 = vpow2.f32 %v6293_v25  ;;  %v5915_v52 = vcombine.low %v5904_v29, %v5908_v30  ;;  %v5916_v56 = vcombine.high %v5904_v29, %v5908_v30 }
0x167a   : > { %v9570_v37 = vpop.eup %7992  ;;  %8002 = vpow2.f32 %v6287_v6 }
0x167b   : > { %v6298_v51 = vsel %vm1548_vm4, %v9570_v37, 0.0  ;;  %v5923_v13 = vrot.slane %v5915_v52, %v8698_v44  ;;  %v5930_v15 = vrot.slane %v5916_v56, %v8698_v44 }
0x167c   : > { %6302 = vadd.xlane.f32.xlu1 %v6301_v49  ;;  %6299 = vadd.xlane.f32.xlu0 %v6298_v51 }
0x167e   : > { %v9576_v54 = vpop.eup %7994 }
0x167f   : > { %v6304_v57 = vsel %vm1548_vm4, %v9576_v54, 0.0 }
0x1680   : > { %6305 = vadd.xlane.f32.xlu0 %v6304_v57 }
0x1682   : > { %v9580_v59 = vpop.eup %7996 }
0x1683   : > { %v6313_v61 = vsel %vm1548_vm4, %v9580_v59, 0.0  ;;  %v9584_v63 = vpop.eup %7998 }
0x1684   : > { %6314 = vadd.xlane.f32.xlu0 %v6313_v61  ;;  %v6310_v2 = vsel %vm1548_vm4, %v9584_v63, 0.0 }
0x1686   : > { %v9588_v3 = vpop.eup %8000 }
0x1687   : > { %v6316_v4 = vsel %vm1548_vm4, %v9588_v3, 0.0  ;;  %v9595_v7 = vpop.eup %8002 }
0x1688   : > { %6311 = vadd.xlane.f32.xlu0 %v6310_v2  ;;  %v6307_v9 = vsel %vm1548_vm4, %v9595_v7, 0.0 }
0x168c   : > { %6317 = vadd.xlane.f32.xlu0 %v6316_v4 }
0x168d   : > { %5909 = vrot.lane.b32.xlu1 %v9469_v33, %s8385_s22  ;;  %s6973_s22 = sshll.u32 %s573_s24, 4  ;;  %s9698_s22 = int_to_ptr.vmem [resolvable:$true] %s6973_s22 }
0x168e   : > { %s8280_s29 = scalar_lea.vmem %s9698_s22, 64  ;;  %p8287_p1 = scmp.lt.s32.totalorder %s9698_s22, %s8285_s17 }
0x168f   : > { %p8281_p8 = scmp.ne.s32.totalorder %s9698_s22, %s8280_s29  ;;  %p8288_p9 = scmp.lt.s32.totalorder %s8286_s20, %s8280_s29 }
0x1691   : > { %p8282_p13 = pnand %p8281_p8, %p9784_p11  ;;  %p8289_p12 = por %p8288_p9, %p8287_p1 }
0x1693   : > { %p8283_p0 = pneg %p8282_p13 }
0x1695   : > { %p8290_p2 = pnand %p8289_p12, %p8283_p0 }
0x16b1   : > { %6308 = vadd.xlane.f32.xlu1 %v6307_v9 }
0x1701   : > { %v6297_v46 = vpop.xlane.xlu1 %6296 }
0x1702   : > { %8004 = vrcp.f32 %v6297_v46 }
0x1705   : > { %v6303_v8 = vpop.xlane.xlu1 %6302  ;;  %v6300_v45 = vpop.xlane.xlu0 %6299 }
0x1706   : > { %8006 = vrcp.f32 %v6300_v45 }
0x1709   : > { %v5910_v16 = vpop.permute.xlu1 %5909  ;;  %v6306_v12 = vpop.xlane.xlu0 %6305 }
0x170a   : > { %v5931_v33 = vcombine.low %v5906_v10, %v5910_v16  ;;  %v5932_v11 = vcombine.high %v5906_v10, %v5910_v16  ;;  %8008 = vrcp.f32 %v6306_v12 }
0x170b   : > { %8010 = vrcp.f32 %v6303_v8 }
0x170c   : > { %v5939_v55 = vrot.slane %v5931_v33, %v8698_v44  ;;  %v5946_v19 = vrot.slane %v5932_v11, %v8698_v44 }
0x170d   : > { %v6315_v20 = vpop.xlane.xlu0 %6314 }
0x170e   : > { %v5947_v21 = vcombine.low %v5923_v13, %v5939_v55  ;;  %v5948_v38 = vcombine.high %v5923_v13, %v5939_v55  ;;  %v5963_v22 = vcombine.low %v5930_v15, %v5946_v19  ;;  %v5964_v23 = vcombine.high %v5930_v15, %v5946_v19 }
0x170f   : > { %8012 = vrcp.f32 %v6315_v20  ;;  %v8005_v27 = vpop.eup %8004 }
0x1710   : > { %v5955_v48 = vrot.slane %v5947_v21, %v8706_v50  ;;  %v5962_v24 = vrot.slane %v5948_v38, %v8706_v50  ;;  %v5971_v26 = vrot.slane %v5963_v22, %v8706_v50  ;;  %v5978_v28 = vrot.slane %v5964_v23, %v8706_v50 }
0x1711   : > { %v6312_v60 = vpop.xlane.xlu0 %6311  ;;  %v6327_v10 = vmul.f32 %v8005_v27, %v9564_v53 }
0x1712   : > { %v5983_v62 = vcombine.low %v5955_v48, %v5962_v24  ;;  %v7272_v1 = vcombine.high %v5955_v48, %v5962_v24  ;;  %v5999_v58 = vcombine.low %v5971_v26, %v5978_v28  ;;  %v7273_v36 = vcombine.high %v5971_v26, %v5978_v28 }
0x1713   : > { %v8007_v47 = vpop.eup %8006 }
0x1714   : > { %v5990_v17 = vrot.slane %v5983_v62, %v8698_v44  ;;  %v5998_v18 = vrot.slane %v7272_v1, %v8698_v44  ;;  %v6006_v42 = vrot.slane %v5999_v58, %v8698_v44  ;;  %v6014_v39 = vrot.slane %v7273_v36, %v8698_v44 }
0x1715   : > { %v6318_v40 = vpop.xlane.xlu0 %6317  ;;  %v6328_v29 = vmul.f32 %v8007_v47, %v9570_v37 }
0x1716   : > { %v6015_v41 = vcombine.low %v5990_v17, %v5998_v18  ;;  %v6031_v31 = vcombine.low %v6006_v42, %v6014_v39  ;;  %v6016_v43 = vcombine.high %v5990_v17, %v5998_v18  ;;  %v6032_v32 = vcombine.high %v6006_v42, %v6014_v39 }
0x1717   : > { %8014 = vrcp.f32 %v6318_v40  ;;  %v8009_v51 = vpop.eup %8008  ;;  %v6335_v16 = vpack.c.bf16 %v6328_v29, %v6327_v10 }
0x1718   : > { %v6023_v34 = vrot.slane %v6015_v41, %v8706_v50  ;;  %v6039_v14 = vrot.slane %v6031_v31, %v8706_v50  ;;  %v6030_v25 = vrot.slane %v6016_v43, %v8706_v50  ;;  %v6046_v49 = vrot.slane %v6032_v32, %v8706_v50  ;;  %v8011_v57 = vpop.eup %8010 }
0x1719   : > { %v6330_v30 = vmul.f32 %v8009_v51, %v9576_v54  ;;  %v6329_v46 = vmul.f32 %v8011_v57, %v9568_v35  ;;  %8016 = vrcp.f32 %v6312_v60 }
0x171a   : > { %v6047_v61 = vcombine.low %v6023_v34, %v6039_v14  ;;  %v6048_v2 = vcombine.high %v6023_v34, %v6039_v14  ;;  %v6049_v4 = vcombine.low %v6030_v25, %v6046_v49  ;;  %v6050_v5 = vcombine.high %v6030_v25, %v6046_v49 }
0x171b   : > { %v6336_v33 = vpack.c.bf16 %v6330_v30, %v6329_v46 }
0x171c   : > { %v6339_v6 = vpack.c.bf16 %v6047_v61, %v6047_v61  ;;  %v6340_v9 = vpack.c.bf16 %v6048_v2, %v6048_v2  ;;  %v6341_v52 = vpack.c.bf16 %v6049_v4, %v6049_v4  ;;  %v6342_v56 = vpack.c.bf16 %v6050_v5, %v6050_v5  ;;  %v8013_v37 = vpop.eup %8012 }
0x171d   : > { %v6333_v12 = vmul.f32 %v8013_v37, %v9580_v59 }
0x171e   : > { %v6347_v8 = vsel %vm3193_vm7, %v6339_v6, 0  ;;  %v6394_v45 = vsel %vm3193_vm7, %v6340_v9, 0  ;;  %v6441_v53 = vsel %vm3193_vm7, %v6341_v52, 0  ;;  %v6488_v35 = vsel %vm3193_vm7, %v6342_v56, 0 }
0x171f   : > { %7673 = vmatpush3.bf16.msra.mxu1 %v6347_v8  ;;  %7679 = vmatpush3.bf16.msra.mxu0 %v6394_v45 }
0x1720   : > { %7684 = vmatprep.subr.bf16.mxu1 %v8380_v0  ;;  %7690 = vmatprep.subr.bf16.mxu0 %v8380_v0 }
0x1722   : > { %7675 = vmatmul.mubr.msk.bf16.vlgmr.msra.gmra.mxu1 %vm1548_vm4, %v6335_v16  ;;  %7681 = vmatmul.mubr.msk.bf16.vlgmr.msra.gmra.mxu0 %vm1548_vm4, %v6336_v33 }
0x1723   : > { %7685 = vmatpush3.bf16.msra.mxu1 %v6441_v53  ;;  %7691 = vmatpush3.bf16.msra.mxu0 %v6488_v35 }
0x1724   : > { %v8015_v54 = vpop.eup %8014  ;;  %7692 = vmatprep.mubr.msk.bf16.mxu0 %vm8381_vm1, %v8380_v0  ;;  %7686 = vmatprep.mubr.msk.bf16.mxu1 %vm8381_vm1, %v8380_v0 }
0x1725   : > { %v6334_v11 = vmul.f32 %v8015_v54, %v9588_v3  ;;  %7696 = vmatprep.subr.bf16.mxu1 %v8380_v0  ;;  %7704 = vmatprep.subr.bf16.mxu0 %v8380_v0 }
0x1726   : > { %v8017_v55 = vpop.eup %8016 }
0x1727   : > { %v6338_v13 = vpack.c.bf16 %v6334_v11, %v6333_v12  ;;  %v6332_v3 = vmul.f32 %v8017_v55, %v9584_v63 }
0x172a   : > { %7693 = vmatmul.mubr.msk.bf16.vlgmr.msra.gmra.mxu0 %vm1548_vm4, %v6338_v13 }
0x172b   : > { %7706 = vmatprep.mubr.msk.bf16.mxu0 %vm8381_vm1, %v8380_v0 }
0x173a   : > { %v6309_v15 = vpop.xlane.xlu1 %6308 }
0x173b   : > { %8018 = vrcp.f32 %v6309_v15 }
0x1748   : > { %v8019_v19 = vpop.eup %8018 }
0x1749   : > { %v6331_v21 = vmul.f32 %v8019_v19, %v9595_v7 }
0x174b   : > { %v6337_v38 = vpack.c.bf16 %v6332_v3, %v6331_v21 }
0x174d   : > { %7687 = vmatmul.mubr.msk.bf16.vlgmr.msra.gmra.mxu1 %vm1548_vm4, %v6337_v38 }
0x174e   : > { %7700 = vmatprep.mubr.msk.bf16.mxu1 %vm8381_vm1, %v8380_v0 }
0x17e2   : > { %v6383_v59 = vpop.f32.mrf.mxu1  ;;  %v6430_v22 = vpop.f32.mrf.mxu0 }
0x17e4   : > { %v7676_v23 = vpop.f32.mrf.mxu1  ;;  %v7682_v20 = vpop.f32.mrf.mxu0 }
0x17e5   : > { %v7922_v20 = vld [vmem:[#allocation14 + $0x38] sm:$0xff]  }
0x17e6   : > { %v6386_v48 = vpop.f32.mrf.mxu1  ;;  %v6433_v24 = vpop.f32.mrf.mxu0  ;;  %7697 = vmatpush3.bf16.msra.mxu1 %v7922_v20 }
0x17e7   : > { %7698 = vmatprep.subr.bf16.mxu1 %v8380_v0 }
0x17e8   : > { %v7677_v26 = vpop.f32.mrf.mxu1  ;;  %v7683_v28 = vpop.f32.mrf.mxu0 }
0x17ea   : > { %v6524_v62 = vpop.f32.mrf.mxu0 }
0x17eb   : > { %v6547_v36 = vcombine.low %v6430_v22, %v6524_v62  ;;  %v6548_v63 = vcombine.high %v6430_v22, %v6524_v62 }
0x17ec   : > { %v7694_v1 = vpop.f32.mrf.mxu0 }
0x17ed   : > { %v6555_v39 = vrot.slane %v6547_v36, %v8698_v44  ;;  %v6562_v40 = vrot.slane %v6548_v63, %v8698_v44 }
0x17ee   : > { %v6527_v58 = vpop.f32.mrf.mxu0 }
0x17ef   : > { %v6615_v43 = vcombine.low %v6433_v24, %v6527_v58  ;;  %v6616_v32 = vcombine.high %v6433_v24, %v6527_v58 }
0x17f0   : > { %v7695_v7 = vpop.f32.mrf.mxu0 }
0x17f1   : > { %v6623_v6 = vrot.slane %v6615_v43, %v8698_v44  ;;  %v6630_v9 = vrot.slane %v6616_v32, %v8698_v44 }
0x180d   : > { %v6477_v60 = vpop.f32.mrf.mxu1 }
0x180e   : > { %v6531_v17 = vcombine.low %v6383_v59, %v6477_v60  ;;  %v6532_v18 = vcombine.high %v6383_v59, %v6477_v60 }
0x180f   : > { %v7688_v42 = vpop.f32.mrf.mxu1 }
0x1810   : > { %v6539_v41 = vrot.slane %v6531_v17, %v8698_v44  ;;  %v6546_v31 = vrot.slane %v6532_v18, %v8698_v44  ;;  %v7923_v42 = vld [vmem:[#allocation14 + $0x30] sm:$0xff]  }
0x1811   : > { %v6480_v27 = vpop.f32.mrf.mxu1  ;;  %7699 = vmatpush3.bf16.msra.mxu1 %v7923_v42 }
0x1812   : > { %v6563_v47 = vcombine.low %v6539_v41, %v6555_v39  ;;  %v6564_v34 = vcombine.high %v6539_v41, %v6555_v39  ;;  %v6579_v14 = vcombine.low %v6546_v31, %v6562_v40  ;;  %v6580_v25 = vcombine.high %v6546_v31, %v6562_v40 }
0x1813   : > { %v6599_v49 = vcombine.low %v6386_v48, %v6480_v27  ;;  %v6600_v51 = vcombine.high %v6386_v48, %v6480_v27  ;;  %v7689_v57 = vpop.f32.mrf.mxu1 }
0x1814   : > { %v6571_v61 = vrot.slane %v6563_v47, %v8706_v50  ;;  %v6578_v2 = vrot.slane %v6564_v34, %v8706_v50  ;;  %v6587_v4 = vrot.slane %v6579_v14, %v8706_v50  ;;  %v6594_v5 = vrot.slane %v6580_v25, %v8706_v50 }
0x1815   : > { %v6607_v29 = vrot.slane %v6599_v49, %v8698_v44  ;;  %v6614_v30 = vrot.slane %v6600_v51, %v8698_v44 }
0x1816   : > { %v6667_v10 = vcombine.low %v6571_v61, %v6578_v2  ;;  %v7282_v46 = vcombine.high %v6571_v61, %v6578_v2  ;;  %v6683_v8 = vcombine.low %v6587_v4, %v6594_v5  ;;  %v7283_v45 = vcombine.high %v6587_v4, %v6594_v5 }
0x1817   : > { %v6631_v52 = vcombine.low %v6607_v29, %v6623_v6  ;;  %v6632_v56 = vcombine.high %v6607_v29, %v6623_v6  ;;  %v6647_v16 = vcombine.low %v6614_v30, %v6630_v9  ;;  %v6648_v33 = vcombine.high %v6614_v30, %v6630_v9 }
0x1818   : > { %v6674_v37 = vrot.slane %v6667_v10, %v8698_v44  ;;  %v6682_v53 = vrot.slane %v7282_v46, %v8698_v44  ;;  %v6690_v35 = vrot.slane %v6683_v8, %v8698_v44  ;;  %v6698_v54 = vrot.slane %v7283_v45, %v8698_v44 }
0x1819   : > { %v6639_v11 = vrot.slane %v6631_v52, %v8706_v50  ;;  %v6646_v12 = vrot.slane %v6632_v56, %v8706_v50  ;;  %v6655_v13 = vrot.slane %v6647_v16, %v8706_v50  ;;  %v6662_v15 = vrot.slane %v6648_v33, %v8706_v50  ;;  %v6905_v56 = vld [vmem:[%s9749_s12] sm:$0xf] }
0x181a   : > { %v6700_v55 = vcombine.high %v6674_v37, %v6682_v53  ;;  %v6716_v19 = vcombine.high %v6690_v35, %v6698_v54  ;;  %v6699_v21 = vcombine.low %v6674_v37, %v6682_v53  ;;  %v6715_v3 = vcombine.low %v6690_v35, %v6698_v54  ;;  %v7286_v37 = vld [vmem:[#allocation16 + $0x3] ss:$0 sm:$0xff] }
0x181b   : > { %v6735_v38 = vcombine.low %v6639_v11, %v6646_v12  ;;  %v7284_v59 = vcombine.high %v6639_v11, %v6646_v12  ;;  %v6751_v22 = vcombine.low %v6655_v13, %v6662_v15  ;;  %v7285_v23 = vcombine.high %v6655_v13, %v6662_v15 }
0x181c   : > { %v6707_v48 = vrot.slane %v6699_v21, %v8706_v50  ;;  %v6723_v24 = vrot.slane %v6715_v3, %v8706_v50  ;;  %v6714_v58 = vrot.slane %v6700_v55, %v8706_v50  ;;  %v6730_v7 = vrot.slane %v6716_v19, %v8706_v50  ;;  %v6903_v55 = vld [vmem:[#allocation17] sm:$0x3] }
0x181d   : > { %v6742_v26 = vrot.slane %v6735_v38, %v8698_v44  ;;  %v6750_v28 = vrot.slane %v7284_v59, %v8698_v44  ;;  %v6758_v62 = vrot.slane %v6751_v22, %v8698_v44  ;;  %v6766_v1 = vrot.slane %v7285_v23, %v8698_v44 }
0x181e   : > { %v6731_v36 = vcombine.low %v6707_v48, %v6723_v24  ;;  %v6733_v31 = vcombine.low %v6714_v58, %v6730_v7  ;;  %v6732_v32 = vcombine.high %v6707_v48, %v6723_v24  ;;  %v6734_v25 = vcombine.high %v6714_v58, %v6730_v7 }
0x181f   : > { %v6768_v63 = vcombine.high %v6742_v26, %v6750_v28  ;;  %v6784_v60 = vcombine.high %v6758_v62, %v6766_v1  ;;  %v6767_v17 = vcombine.low %v6742_v26, %v6750_v28  ;;  %v6783_v18 = vcombine.low %v6758_v62, %v6766_v1 }
0x1820   : > { %v8391_v16 = vmov 0  }
0x1821   : > { %v6782_v39 = vrot.slane %v6768_v63, %v8706_v50  ;;  %v6798_v40 = vrot.slane %v6784_v60, %v8706_v50  ;;  %v6775_v41 = vrot.slane %v6767_v17, %v8706_v50  ;;  %v6791_v44 = vrot.slane %v6783_v18, %v8706_v50  ;;  %7896 = vset.pattern.permute.xlu1 %v8391_v16 }
0x1822   : > { %7897 = vset.pattern.permute.xlu0 %v8391_v16 }
0x1823   : > { %v6801_v43 = vcombine.low %v6782_v39, %v6798_v40  ;;  %v6800_v27 = vcombine.high %v6775_v41, %v6791_v44  ;;  %v6799_v47 = vcombine.low %v6775_v41, %v6791_v44  ;;  %v6802_v14 = vcombine.high %v6782_v39, %v6798_v40 }
0x1825   : > { %v7886_v0 = vpack.i.bf16 %v6801_v43, %v6733_v31  ;;  %v7881_v34 = vpack.i.bf16 %v6800_v27, %v6732_v32  ;;  %v7891_v49 = vpack.i.bf16 %v6802_v14, %v6734_v25 }
0x1827   : > { %7887 = vrot.lane.b32.xlu0 %v7886_v0, %s8388_s27  ;;  %7882 = vrot.lane.b32.xlu1 %v7881_v34, %s8389_s5 }
0x182b   : > { %7892 = vrot.lane.b32.xlu1 %v7891_v49, %s8390_s14  ;;  %s9696_s14 = scalar_lea.hbm %s9750_s13, %s7292_s30 }
0x182f   : > { %6908 = vperm.xlu1 %7896, %v6905_v56  }
0x1899   : > { %v7888_v51 = vpop.permute.xlu0 %7887  ;;  %v7883_v57 = vpop.permute.xlu1 %7882 }
0x189a   : > { %v7885_v50 = vunpack.i.h.bf16 %v7883_v57  ;;  %v7884_v61 = vunpack.i.l.bf16 %v7883_v57  ;;  %v7890_v2 = vunpack.i.h.bf16 %v7888_v51  ;;  %v7889_v4 = vunpack.i.l.bf16 %v7888_v51 }
0x189c   : > { %v6827_v5 = vsel %vm1548_vm4, %v6731_v36, %v7884_v61  ;;  %v6828_v6 = vsel %vm1548_vm4, %v6799_v47, %v7885_v50 }
0x189d   : > { %v7893_v9 = vpop.permute.xlu1 %7892  ;;  %v6829_v10 = vsel %vm1733_vm5, %v6827_v5, %v7889_v4  ;;  %v6830_v46 = vsel %vm1733_vm5, %v6828_v6, %v7890_v2 }
0x189e   : > { %v7895_v29 = vunpack.i.h.bf16 %v7893_v9  ;;  %v7894_v30 = vunpack.i.l.bf16 %v7893_v9 }
0x18a0   : > { %v6831_v8 = vsel %vm2108_vm6, %v6829_v10, %v7894_v30  ;;  %v6832_v45 = vsel %vm2108_vm6, %v6830_v46, %v7895_v29 }
0x18a1   : > { %v6833_v52 = vpack.c.bf16 %v6832_v45, %v6831_v8 }
0x18a3   : > { %7701 = vmatmul.mubr.msk.bf16.vlgmr.msra.gmra.mxu1 %vm694_vm2, %v6833_v52 }
0x18aa   : > { %v6909_v19 = vpop.permute.xlu1 %6908 }
0x1963   : > { %v6896_v33 = vpop.f32.mrf.mxu1 }
0x1964   : > { %v6897_v54 = vadd.f32 %v7286_v37, %v6896_v33 }
0x1965   : > { %v7702_v53 = vpop.f32.mrf.mxu1 }
0x1967   : > { %v6899_v35 = vpop.f32.mrf.mxu1 }
0x1968   : > { %v6900_v11 = vadd.f32 %v7286_v37, %v6899_v35 }
0x1969   : > { %v7703_v12 = vpop.f32.mrf.mxu1 }
0x196a   : > { %v6904_v13 = vpack.c.bf16 %v6900_v11, %v6897_v54 }
0x196c   : > { %v6915_v15 = vsel %vm694_vm2, %v6904_v13, 0 }
0x196d   : > { %7705 = vmatpush3.bf16.xpose.msra.mxu0 %v6915_v15 }
0x1974   : > { %7707 = vmatmul.mubr.msk.bf16.vlgmr.msra.gmra.mxu0 %vm694_vm2, %v6903_v55 }
0x1a34   : > { %v6951_v21 = vpop.f32.mrf.mxu0 }
0x1a35   : > { %v6952_v3 = vadd.f32 %v6951_v21, %v6909_v19 }
0x1a36   : > { %v7708_v38 = vpop.f32.mrf.mxu0 }
0x1a37   : > { %6958 = vst.msk [vmem:[%s573_s24] sm:$0xf] %vm6957_vm8, %v6952_v3 }
0x1a38   : > { %v6954_v59 = vpop.f32.mrf.mxu0 }
0x1a39   : > { %8293 = shalt.err (!%p8290_p2)
}
0x1a3a   : > { %s8294_s23 = scalar_lea.hbm %s9696_s14, 64  ;;  %s8298_s19 = scalar_lea.hbm %s9750_s13, 128 }
0x1a3b   : > { %p8295_p5 = scmp.ne.s32.totalorder %s9696_s14, %s8294_s23  ;;  %p8299_p3 = scmp.lt.s32.totalorder %s9696_s14, %s9750_s13 }
0x1a3c   : > { %p8300_p4 = scmp.lt.s32.totalorder %s8298_s19, %s8294_s23 }
0x1a3d   : > { %p8296_p6 = pnand %p8295_p5, %p9784_p11 }
0x1a3e   : > { %p8301_p7 = por %p8300_p4, %p8299_p3 }
0x1a3f   : > { %p8297_p10 = pneg %p8296_p6 }
0x1a41   : > { %p8302_p8 = pnand %p8301_p7, %p8297_p10 }
0x1a43   : > { %8305 = shalt.err (!%p8302_p8)
}
0x1a44   : > { %7750 = dma.vmem_to_hbm [thread:$0]  (%p9784_p11), %s9698_s22, 64, %s9696_s14, %s6960_s21   ;;  %v7709_v22 = vpop.f32.mrf.mxu0 }
0x1a45 PF: > { %s9785_s27 = sld [smem:[#allocation30_spill]]  ;;  %p7807_p13 = scmp.ge.s32.totalorder %s8364_s28, 2 }
0x1a46   : > { %s6985_s5 = sand.u32 1, %s8352_s25  }
0x1a47   : > { %s6986_s29 = scalar_lea.sflag [#allocation4], %s6985_s5 }
0x1a4b   : > { %p9786_p0 = scmp.ne.s32.totalorder %s9785_s27, 0 }
0x1a4d   : > { %p7784_p1 = pnand %p7807_p13, %p9786_p0 }
0x1a4f   : > { %p7785_p9 = pneg %p7784_p1 }
0x1a51   : > { %8347 = dma.done.wait (%p7785_p9), %s6986_s29, 64  }
0x1a52   : > { %8349 = vsyncadd (%p7785_p9), %s6986_s29, 4294967232  ;;  %s9787_s28 = sld [smem:[#allocation28_spill]]  ;;  %s9790_s25 = smov %s8356_s26 }
0x1a53   : > { %s9788_s15 = sld [smem:[#allocation27_spill]] }
0x1a54   : > { %s9789_s27 = sld [smem:[#allocation29_spill]] }
0x1a58   : > { %p29_p12 = scmp.ge.s32.totalorder %s9787_s28, 4  }
0x1a59   : > { %s9791_s26 = smov %s9788_s15 }
0x1a5a   :  { %31 = sbr.rel (!%p29_p12) target bundleno = 12 (0xc), region = 168 }
0x1a5f   :  { %6991 = vsyncpa [#allocation3], 1 }
0x1a60   :  { %6993 = vsyncpa [#allocation3 + $0x1], 1 }
0x1a61   :  { %6994 = vsyncpa [#allocation6], 1 }
0x1a62   :  { %6995 = vsyncpa [#allocation9], 1 }
0x1a63   :  { %6996 = vsyncpa [#allocation12], 1 }
0x1a64   :  { %6997 = vsyncpa [#allocation15], 1 }
0x1a65   :  { %6998 = vsyncpa [#allocation18], 1 }
0x1a66   :  { %6999 = vsyncpa [#allocation4], 1 }
0x1a67   :  { %7001 = vsyncpa [#allocation4 + $0x1], 1 }

</bundles_post_ra>
